<compile_context>
chip_gen: v5e
topology: v5e:2x2
jax: 0.10.0
libtpu: 0.0.40
codegen_flags: <defaults>
</compile_context>

<pallas_src>
import functools

import jax
import jax.numpy as jnp
import numpy as np
from jax.experimental import pallas as pl
from jax.experimental.pallas import tpu as pltpu

# ---- hyper-parameters (small, consistent with the module structure) ---------
N_TRIALS    = 256
N_CHANNELS  = 4      # EEG channels == spatial-conv kernel height
N_TIMES     = 20     # time samples
CONV1_SIZE  = 5      # temporal conv kernel width
F1          = 8      # number of filters
POOL_SIZE   = 4      # avg-pool window along time
POOL_STRIDE = 2
N_CLASSES   = 4
BN_EPS      = 1e-5
TILE        = 128    # trials per grid step
LOG_CLIP    = 1e-6   # torch.clip(min=1e-6) before log
NEG_BIG     = -1e30  # effective -inf for pad-class logits

T1 = N_TIMES - CONV1_SIZE + 1                  # temporal-conv output length
L  = (T1 - POOL_SIZE) // POOL_STRIDE + 1       # == in_features_length


def _round_up(a, b):
    return (a + b - 1) // b * b


CKP = _round_up(N_CHANNELS * N_TIMES + 1, 128)   # augmented (ch*time + 1) dim
TFP = _round_up(T1 * F1, 128)                    # conv-output dim (t*F1 + g)
FLP = _round_up(F1 * L, 128)                     # pooled-feature dim (g*L + l)
NCP = _round_up(N_CLASSES, 128)                  # lane-dense class dim

# Need at least one spare pooled-feature lane to carry the folded FC bias.
assert F1 * L < FLP


def shallowconvnet_kernel(x_ref, w1_ref, p2_ref, wfc_ref, out_ref):
    # x_ref  : (TILE, CKP)  flattened trials; col C*T == 1.0 (bias), rest 0-pad
    # w1_ref : (CKP, TFP)   folded temporal+spatial conv (+bias+BN), Toeplitz form
    # p2_ref : (TFP, FLP)   avg-pool as a block-diagonal matmul (pad cols zero)
    # wfc_ref: (FLP, NCP)   FC weight; row F1*L carries the folded FC bias and
    #                       the -1e30 pad-class logits (scaled by 1/log(1e-6))
    # out_ref: (TILE, NCP)  softmax probabilities (pad lanes == 0)
    y = jnp.dot(x_ref[...], w1_ref[...], preferred_element_type=jnp.float32)
    ysq = y * y                                             # square nonlinearity
    pooled = jnp.dot(ysq, p2_ref[...], preferred_element_type=jnp.float32)
    feat = jnp.log(jnp.maximum(pooled, LOG_CLIP))           # log(clip(., 1e-6))
    # TODO(synk): training-mode Dropout / batch-stat BatchNorm not reproduced;
    # eval-mode semantics are used.
    logits = jnp.dot(feat, wfc_ref[...], preferred_element_type=jnp.float32)
    m = jnp.max(logits, axis=1, keepdims=True)
    e = jnp.exp(logits - m)
    out_ref[...] = e / jnp.sum(e, axis=1, keepdims=True)


@functools.partial(jax.jit, static_argnames=())
def shallowconvnet_forward(x, w1p, p2p, wfcp):
    n = x.shape[0]
    np_ = _round_up(max(n, 1), TILE)
    # flatten (C, T), append the constant-1 bias column, zero-pad to CKP lanes
    xf = jnp.zeros((np_, CKP), jnp.float32)
    xf = xf.at[:n, :N_CHANNELS * N_TIMES].set(
        x.reshape(n, N_CHANNELS * N_TIMES).astype(jnp.float32))
    xf = xf.at[:, N_CHANNELS * N_TIMES].set(1.0)

    out = pl.pallas_call(
        shallowconvnet_kernel,
        out_shape=jax.ShapeDtypeStruct((np_, NCP), jnp.float32),
        grid=(np_ // TILE,),
        in_specs=[
            pl.BlockSpec((TILE, CKP), lambda i: (i, 0)),
            pl.BlockSpec((CKP, TFP), lambda i: (0, 0)),
            pl.BlockSpec((TFP, FLP), lambda i: (0, 0)),
            pl.BlockSpec((FLP, NCP), lambda i: (0, 0)),
        ],
        out_specs=pl.BlockSpec((TILE, NCP), lambda i: (i, 0)),
        compiler_params=pltpu.CompilerParams(
            dimension_semantics=("parallel",)),
    )(xf, w1p, p2p, wfcp)
    return out[:n, :N_CLASSES]


# ---- glue: renorm constraint + algebraic folding into kernel operands -------
def renorm(w, maxnorm, eps=1e-7):
    """torch.renorm(w, p=2, dim=0, maxnorm) semantics."""
    flat = w.reshape(w.shape[0], -1)
    norms = jnp.sqrt(jnp.sum(flat * flat, axis=1, keepdims=True))
    scale = jnp.where(norms > maxnorm, maxnorm / (norms + eps), 1.0)
    return (flat * scale).reshape(w.shape)


def fold_params(wt4, bt1, ws4, gamma, beta, rmean, rvar, wfc2, bfc1):
    """Fold conv1 + conv2 + conv-bias + eval-mode BN into one Toeplitz weight,
    build the pool matrix, and fold FC bias + pad-class masking into the FC
    weight. Must be called AFTER the max-norm (renorm) constraints."""
    C, T, K, G = N_CHANNELS, N_TIMES, CONV1_SIZE, F1
    wt = wt4.reshape(G, K)                        # temporal kernel (F1, K)
    ws = ws4[:, :, :, 0]                          # spatial kernel  (G, F, C)
    s = gamma / jnp.sqrt(rvar + BN_EPS)           # BN scale
    h = beta - rmean * s                          # BN shift

    A = jnp.einsum('gfc,fk->gck', ws, wt) * s[:, None, None]   # (G, C, K)
    B = s * jnp.einsum('gfc,f->g', ws, bt1) + h                # (G,)

    # Toeplitz form:  W1[c*T + tau, t*G + g] = A[g, c, tau - t]  (0 <= tau-t < K)
    t_out = jnp.arange(T1)[:, None]
    tau   = jnp.arange(T)[None, :]
    diff  = tau - t_out                                        # (T1, T)
    mask  = ((diff >= 0) & (diff < K)).astype(jnp.float32)
    k_idx = jnp.clip(diff, 0, K - 1)
    Ag = A[:, :, k_idx] * mask[None, None]                     # (G, C, T1, T)
    w1 = jnp.transpose(Ag, (1, 3, 2, 0)).reshape(C * T, T1 * G)
    brow = jnp.broadcast_to(B[None, :], (T1, G)).reshape(T1 * G)
    w1p = jnp.zeros((CKP, TFP), jnp.float32)
    w1p = w1p.at[:C * T, :T1 * G].set(w1).at[C * T, :T1 * G].set(brow)

    # avg-pool as block-diagonal matmul: P2[t*G + g, g'*L + l]
    t_idx = jnp.arange(T1)[:, None]
    l_idx = jnp.arange(L)[None, :]
    pool_tl = (((t_idx >= l_idx * POOL_STRIDE)
                & (t_idx < l_idx * POOL_STRIDE + POOL_SIZE))
               .astype(jnp.float32) / POOL_SIZE)               # (T1, L)
    p2 = jnp.einsum('tl,gh->tghl', pool_tl,
                    jnp.eye(G, dtype=jnp.float32)).reshape(T1 * G, G * L)
    p2p = jnp.zeros((TFP, FLP), jnp.float32).at[:T1 * G, :G * L].set(p2)

    # FC weight, class-padded to a lane-dense 128.  Pooled pad lanes are exactly
    # 0, so after clip+log every pad feature equals log(LOG_CLIP); scale the FC
    # bias (and the -1e30 pad-class logits) by 1/log(LOG_CLIP) and put them in
    # pad-feature row G*L -> the matmul reproduces `feat @ W^T + b` and pushes
    # pad-class logits to ~-1e30 so the softmax ignores them.
    pad_feat = jnp.log(jnp.float32(LOG_CLIP))                  # ~ -13.8155
    wfcp = jnp.zeros((FLP, NCP), jnp.float32)
    wfcp = wfcp.at[:G * L, :N_CLASSES].set(wfc2.T)
    wfcp = wfcp.at[G * L, :N_CLASSES].set(bfc1 / pad_feat)
    wfcp = wfcp.at[G * L, N_CLASSES:].set(jnp.float32(NEG_BIG) / pad_feat)
    return w1p, p2p, wfcp


def reference_forward(x, wt4, bt1, ws4, gamma, beta, rmean, rvar, wfc2, bfc1):
    """Pure-JAX reference matching the PyTorch forward (eval mode)."""
    N = x.shape[0]
    wt = wt4.reshape(F1, CONV1_SIZE)
    y1 = jnp.zeros((N, F1, N_CHANNELS, T1), jnp.float32)
    for k in range(CONV1_SIZE):
        y1 = y1 + wt[:, k].reshape(1, F1, 1, 1) * x[:, None, :, k:k + T1]
    y1 = y1 + bt1.reshape(1, F1, 1, 1)
    ws = ws4[:, :, :, 0]                                  # (G, F, C)
    y2 = jnp.einsum('gfc,nfct->ngt', ws, y1)
    yb = ((y2 - rmean.reshape(1, F1, 1))
          / jnp.sqrt(rvar.reshape(1, F1, 1) + BN_EPS)
          * gamma.reshape(1, F1, 1) + beta.reshape(1, F1, 1))
    ysq = yb * yb
    pooled = jnp.stack(
        [ysq[:, :, l * POOL_STRIDE:l * POOL_STRIDE + POOL_SIZE].mean(axis=-1)
         for l in range(L)], axis=-1)                     # (N, F1, L)
    feat = jnp.log(jnp.maximum(pooled, LOG_CLIP)).reshape(N, F1 * L)
    logits = feat @ wfc2.T + bfc1[None, :]
    return jax.nn.softmax(logits, axis=1)


if __name__ == "__main__":
    jax.config.update("jax_default_matmul_precision", "float32")
    key = jax.random.PRNGKey(0)
    ks = jax.random.split(key, 10)

    # parameters in their PyTorch shapes
    wt4   = jax.random.normal(ks[0], (F1, 1, 1, CONV1_SIZE), jnp.float32) * 0.5
    bt1   = jax.random.normal(ks[1], (F1,), jnp.float32) * 0.1
    ws4   = jax.random.normal(ks[2], (F1, F1, N_CHANNELS, 1), jnp.float32) * 0.3
    gamma = jax.random.normal(ks[3], (F1,), jnp.float32) * 0.1 + 1.0
    beta  = jax.random.normal(ks[4], (F1,), jnp.float32) * 0.1
    rmean = jax.random.normal(ks[5], (F1,), jnp.float32) * 0.1
    rvar  = jax.random.uniform(ks[6], (F1,), jnp.float32, 0.5, 1.5)
    wfc2  = jax.random.normal(ks[7], (N_CLASSES, F1 * L), jnp.float32) * 0.2
    bfc1  = jax.random.normal(ks[8], (N_CLASSES,), jnp.float32) * 0.1
    x     = jax.random.normal(ks[9], (N_TRIALS, N_CHANNELS, N_TIMES), jnp.float32)

    # max-norm weight constraints (Conv2dWithConstraint / LinearWithConstraint)
    wt4  = renorm(wt4, 2.0)     # max_norm_temporal_conv
    ws4  = renorm(ws4, 2.0)     # max_norm_spatial_conv
    wfc2 = renorm(wfc2, 0.5)    # max_norm_linear

    w1p, p2p, wfcp = fold_params(wt4, bt1, ws4, gamma, beta,
                                 rmean, rvar, wfc2, bfc1)

    out = shallowconvnet_forward(x, w1p, p2p, wfcp)
    out = jax.block_until_ready(out)

    ref = reference_forward(x, wt4, bt1, ws4, gamma, beta, rmean, rvar,
                            wfc2, bfc1)
    np.testing.assert_allclose(np.asarray(out), np.asarray(ref),
                               rtol=2e-4, atol=2e-5)
    print("KERNEL_OK")
</pallas_src>

<mosaic_0001>
module attributes {stable_mosaic.version = 11 : i64} {
  func.func @shallowconvnet_kernel(%arg0: i32, %arg1: memref<128x128xf32, #tpu.memory_space<vmem>>, %arg2: memref<128x128xf32, #tpu.memory_space<vmem>>, %arg3: memref<128x128xf32, #tpu.memory_space<vmem>>, %arg4: memref<128x128xf32, #tpu.memory_space<vmem>>, %arg5: memref<128x128xf32, #tpu.memory_space<vmem>>) attributes {dimension_semantics = [#tpu.dimension_semantics<parallel>], iteration_bounds = array<i64: 2>, scalar_prefetch = 0 : i64, scratch_operands = 0 : i64, tpu.core_type = #tpu.core_type<tc>, window_params = [{transform_indices = @transform_0, window_bounds = array<i64: 128, 128>}, {pipeline_mode = #tpu.pipeline_mode<synchronous>, transform_indices = @transform_1, window_bounds = array<i64: 128, 128>}, {pipeline_mode = #tpu.pipeline_mode<synchronous>, transform_indices = @transform_2, window_bounds = array<i64: 128, 128>}, {pipeline_mode = #tpu.pipeline_mode<synchronous>, transform_indices = @transform_3, window_bounds = array<i64: 128, 128>}, {transform_indices = @transform_4, window_bounds = array<i64: 128, 128>}]} {
    %c0 = arith.constant 0 : index
    %c0_0 = arith.constant 0 : index
    %0 = vector.load %arg1[%c0, %c0_0] : memref<128x128xf32, #tpu.memory_space<vmem>>, vector<128x128xf32>
    %c0_1 = arith.constant 0 : index
    %c0_2 = arith.constant 0 : index
    %1 = vector.load %arg2[%c0_1, %c0_2] : memref<128x128xf32, #tpu.memory_space<vmem>>, vector<128x128xf32>
    %cst = arith.constant dense<0.000000e+00> : vector<128x128xf32>
    %2 = tpu.matmul %0, %1, %cst {dimension_numbers = #tpu.dot_dimension_numbers<[1], [0], [0], [1], [0, 0, 1, 1], [], []>, precision = #tpu.contract_precision<fp32>} : vector<128x128xf32>, vector<128x128xf32>, vector<128x128xf32> -> vector<128x128xf32>
    %3 = arith.mulf %2, %2 : vector<128x128xf32>
    %c0_3 = arith.constant 0 : index
    %c0_4 = arith.constant 0 : index
    %4 = vector.load %arg3[%c0_3, %c0_4] : memref<128x128xf32, #tpu.memory_space<vmem>>, vector<128x128xf32>
    %cst_5 = arith.constant dense<0.000000e+00> : vector<128x128xf32>
    %5 = tpu.matmul %3, %4, %cst_5 {dimension_numbers = #tpu.dot_dimension_numbers<[1], [0], [0], [1], [0, 0, 1, 1], [], []>, precision = #tpu.contract_precision<fp32>} : vector<128x128xf32>, vector<128x128xf32>, vector<128x128xf32> -> vector<128x128xf32>
    %cst_6 = arith.constant 9.99999997E-7 : f32
    %6 = vector.broadcast %cst_6 : f32 to vector<128x128xf32>
    %7 = arith.maximumf %5, %6 : vector<128x128xf32>
    %8 = math.log %7 : vector<128x128xf32>
    %c0_7 = arith.constant 0 : index
    %c0_8 = arith.constant 0 : index
    %9 = vector.load %arg4[%c0_7, %c0_8] : memref<128x128xf32, #tpu.memory_space<vmem>>, vector<128x128xf32>
    %cst_9 = arith.constant dense<0.000000e+00> : vector<128x128xf32>
    %10 = tpu.matmul %8, %9, %cst_9 {dimension_numbers = #tpu.dot_dimension_numbers<[1], [0], [0], [1], [0, 0, 1, 1], [], []>, precision = #tpu.contract_precision<fp32>} : vector<128x128xf32>, vector<128x128xf32>, vector<128x128xf32> -> vector<128x128xf32>
    %cst_10 = arith.constant dense<0xFF800000> : vector<128xf32>
    %11 = vector.multi_reduction <maximumf>, %10, %cst_10 [1] : vector<128x128xf32> to vector<128xf32>
    %12 = vector.shape_cast %11 : vector<128xf32> to vector<128x1xf32>
    %13 = vector.broadcast %12 : vector<128x1xf32> to vector<128x128xf32>
    %14 = arith.subf %10, %13 : vector<128x128xf32>
    %15 = math.exp %14 : vector<128x128xf32>
    %cst_11 = arith.constant dense<0.000000e+00> : vector<128xf32>
    %16 = vector.multi_reduction <add>, %15, %cst_11 [1] : vector<128x128xf32> to vector<128xf32>
    %17 = vector.shape_cast %16 : vector<128xf32> to vector<128x1xf32>
    %18 = vector.broadcast %17 : vector<128x1xf32> to vector<128x128xf32>
    %19 = arith.divf %15, %18 : vector<128x128xf32>
    %c0_12 = arith.constant 0 : index
    %c0_13 = arith.constant 0 : index
    %20 = vector.load %arg5[%c0_12, %c0_13] : memref<128x128xf32, #tpu.memory_space<vmem>>, vector<128x128xf32>
    tpu.vector_store %arg5[%c0_12, %c0_13], %19 {strides = array<i32>} : memref<128x128xf32, #tpu.memory_space<vmem>>, vector<128x128xf32>,
    return
  }
  func.func @transform_0(%arg0: i32) -> (i32, i32) {
    %c0_i32 = arith.constant 0 : i32
    %c0_i32_0 = arith.constant 0 : i32
    return %arg0, %c0_i32 : i32, i32
  }
  func.func @transform_1(%arg0: i32) -> (i32, i32) {
    %c0_i32 = arith.constant 0 : i32
    %c0_i32_0 = arith.constant 0 : i32
    %c0_i32_1 = arith.constant 0 : i32
    return %c0_i32, %c0_i32_0 : i32, i32
  }
  func.func @transform_2(%arg0: i32) -> (i32, i32) {
    %c0_i32 = arith.constant 0 : i32
    %c0_i32_0 = arith.constant 0 : i32
    %c0_i32_1 = arith.constant 0 : i32
    return %c0_i32, %c0_i32_0 : i32, i32
  }
  func.func @transform_3(%arg0: i32) -> (i32, i32) {
    %c0_i32 = arith.constant 0 : i32
    %c0_i32_0 = arith.constant 0 : i32
    %c0_i32_1 = arith.constant 0 : i32
    return %c0_i32, %c0_i32_0 : i32, i32
  }
  func.func @transform_4(%arg0: i32) -> (i32, i32) {
    %c0_i32 = arith.constant 0 : i32
    %c0_i32_0 = arith.constant 0 : i32
    return %arg0, %c0_i32 : i32, i32
  }
}

</mosaic_0001>

<bundles_post_ra>
// kernel: shallowconvnet_forward.1
= control target key start
LH: loop header
LB: loop body
LE: loop exit
PB: predicated region body
PF: predicated region fallthrough
CT: control target
= control target key end

     0   :  { %s3351_s15 = smov 0   ;;  %s5095_s0 = inlined_call_operand.vmem [shape: f32[256,128], index: 0, kind: input, shape index: {}]   ;;  %s5096_s1 = inlined_call_operand.vmem [shape: f32[128,128], index: 1, kind: input, shape index: {}]   ;;  %s5097_s2 = inlined_call_operand.vmem [shape: f32[128,128], index: 2, kind: input, shape index: {}]   ;;  %s5098_s3 = inlined_call_operand.vmem [shape: f32[128,128], index: 3, kind: input, shape index: {}]   ;;  %s5099_s4 = inlined_call_operand.vmem [shape: f32[256,128], index: 4, kind: output, shape index: {}]  }
   0x1 LB: > { %s3171_s16 = sadd.s32 4294967295, %s3324_s15   ;;  %p3175_p0 = scmp.ge.s32.totalorder %s3324_s15, 1  ;;  %s3324_s15 = sphi %s3351_s15, %s14_s15  }
   0x2   : > { %p163_p1 = scmp.lt.s32.totalorder %s3324_s15, 3 }
   0x4   : > { %p164_p2 = pnand %p3175_p0, %p163_p1 }
   0x6   : > { %167 = sbr.rel (%p164_p2) target bundleno = 1193 (0x4a9), region = 36 }
   0xb   : > { %v232_v0 = vld [vmem:[%s5096_s1 + $0x78] sm:$0xff]  ;;  %v231_v1 = vld [vmem:[%s5096_s1 + $0x70] sm:$0xff]  ;;  %v230_v2 = vld [vmem:[%s5096_s1 + $0x68] sm:$0xff]  ;;  %s3176_s23 = sshll.u32 %s3171_s16, 4 }
   0xc   : > { %v3368_v3 = vand.u32 4294901760, %v232_v0  ;;  %v3370_v4 = vand.u32 4294901760, %v231_v1  ;;  %v3372_v5 = vand.u32 4294901760, %v230_v2  ;;  %v229_v6 = vld [vmem:[%s5096_s1 + $0x60] sm:$0xff]  ;;  %v228_v7 = vld [vmem:[%s5096_s1 + $0x58] sm:$0xff]  ;;  %v227_v8 = vld [vmem:[%s5096_s1 + $0x50] sm:$0xff] }
   0xd   : > { %v3383_v9 = vand.u32 4294901760, %v229_v6  ;;  %v3385_v10 = vand.u32 4294901760, %v228_v7  ;;  %v3387_v11 = vand.u32 4294901760, %v227_v8  ;;  %v226_v12 = vld [vmem:[%s5096_s1 + $0x48] sm:$0xff]  ;;  %v225_v13 = vld [vmem:[%s5096_s1 + $0x40] sm:$0xff]  ;;  %v224_v17 = vld [vmem:[%s5096_s1 + $0x38] sm:$0xff] }
   0xe   : > { %3182 = vmatpush.msra.mxu2 %v3368_v3  ;;  %v3397_v14 = vsub.f32 %v232_v0, %v3368_v3  ;;  %v3400_v15 = vsub.f32 %v231_v1, %v3370_v4  ;;  %v3403_v16 = vsub.f32 %v230_v2, %v3372_v5  ;;  %234 = vmatpush.msra.mxu0 %v3368_v3  ;;  %p190_p3 = scmp.lt.s32.totalorder %s3176_s23, 31  ;;  %v3409_v18 = vand.u32 4294901760, %v226_v12  ;;  %v223_v25 = vld [vmem:[%s5096_s1 + $0x30] sm:$0xff]  ;;  %v222_v33 = vld [vmem:[%s5096_s1 + $0x28] sm:$0xff]  ;;  %v221_v42 = vld [vmem:[%s5096_s1 + $0x20] sm:$0xff] }
   0xf   : > { %v3412_v19 = vsub.f32 %v229_v6, %v3383_v9  ;;  %v3415_v20 = vsub.f32 %v228_v7, %v3385_v10  ;;  %v3421_v24 = vand.u32 4294901760, %v225_v13  ;;  %v3430_v27 = vand.u32 4294901760, %v224_v17  ;;  %v220_v49 = vld [vmem:[%s5096_s1 + $0x18] sm:$0xff]  ;;  %v219_v55 = vld [vmem:[%s5096_s1 + $0x10] sm:$0xff]  ;;  %v218_v62 = vld [vmem:[%s5096_s1 + $0x8] sm:$0xff] }
  0x10   : > { %3183 = vmatpush.msra.mxu2 %v3370_v4  ;;  %v396_v21 = vand.u32 4294901760, %v3397_v14  ;;  %v402_v22 = vand.u32 4294901760, %v3400_v15  ;;  %v408_v23 = vand.u32 4294901760, %v3403_v16  ;;  %236 = vmatpush.msra.mxu0 %v3370_v4  ;;  %s5219_s23 = smov (!%p190_p3, %s3176_s23), 31  ;;  %v3433_v28 = vsub.f32 %v227_v8, %v3387_v11  ;;  %v217_v2 = vld [vmem:[%s5096_s1] sm:$0xff] }
  0x11   : > { %v414_v26 = vand.u32 4294901760, %v3412_v19  ;;  %v420_v32 = vand.u32 4294901760, %v3415_v20  ;;  %s3177_s14 = sshll.u32 %s5219_s23, 3  ;;  %v3454_v35 = vand.u32 4294901760, %v223_v25  ;;  %v3457_v36 = vsub.f32 %v226_v12, %v3409_v18 }
  0x12   : > { %3184 = vmatpush.msra.mxu2 %v3372_v5  ;;  %v397_v29 = vsub.f32 %v3397_v14, %v396_v21  ;;  %v403_v30 = vsub.f32 %v3400_v15, %v402_v22  ;;  %v409_v31 = vsub.f32 %v3403_v16, %v408_v23  ;;  %238 = vmatpush.msra.mxu0 %v3372_v5  ;;  %s3464_s18 = scalar_lea.vmem %s5095_s0, %s3177_s14  ;;  %v5111_v39 = vand.u32 4294901760, %v3433_v28  ;;  %s5058_s27 = scalar_lea.vmem %s5099_s4, %s3177_s14 }
  0x13   : > { %v415_v34 = vsub.f32 %v3412_v19, %v414_v26  ;;  %v3470_v40 = vsub.f32 %v225_v13, %v3421_v24  ;;  %v3472_v41 = vand.u32 4294901760, %v222_v33  ;;  %v421_v44 = vsub.f32 %v3415_v20, %v420_v32  ;;  %v209_v47 = vld [vmem:[%s3464_s18 + $0x40] sm:$0xff] }
  0x14   : > { %3185 = vmatpush.msra.mxu2 %v3383_v9  ;;  %v398_v37 = vand.u32 4294901760, %v397_v29  ;;  %v404_v38 = vand.u32 4294901760, %v403_v30  ;;  %240 = vmatpush.msra.mxu0 %v3383_v9  ;;  %v410_v43 = vand.u32 4294901760, %v409_v31  ;;  %v5110_v45 = vand.u32 4294901760, %v3457_v36  ;;  %v201_v12 = vld [vmem:[%s3464_s18] sm:$0xff]  ;;  %v210_v30 = vld [vmem:[%s3464_s18 + $0x48] sm:$0xff] }
  0x15   : > { %v3483_v46 = vsub.f32 %v224_v17, %v3430_v27  ;;  %v5108_v48 = vand.u32 4294901760, %v3470_v40  ;;  %v416_v50 = vand.u32 4294901760, %v415_v34  ;;  %v427_v51 = vsub.f32 %v3433_v28, %v5111_v39 }
  0x16   : > { %3186 = vmatpush.msra.mxu2 %v3385_v10  ;;  %3198 = vmatpush.msra.mxu3 %v398_v37  ;;  %v3495_v52 = vand.u32 4294901760, %v221_v42  ;;  %v3498_v53 = vsub.f32 %v223_v25, %v3454_v35  ;;  %v3505_v56 = vand.u32 4294901760, %v209_v47  ;;  %v422_v57 = vand.u32 4294901760, %v421_v44 }
  0x17   : > { %399 = vmatpush.msra.mxu1 %v398_v37  ;;  %242 = vmatpush.msra.mxu0 %v3385_v10  ;;  %v5104_v54 = vand.u32 4294901760, %v3483_v46  ;;  %v433_v58 = vsub.f32 %v3457_v36, %v5110_v45  ;;  %v3511_v59 = vand.u32 4294901760, %v220_v49  ;;  %v3514_v60 = vsub.f32 %v222_v33, %v3472_v41  ;;  %v212_v45 = vld [vmem:[%s3464_s18 + $0x58] sm:$0xff] }
  0x18   : > { %3187 = vmatpush.msra.mxu2 %v3387_v11  ;;  %3199 = vmatpush.msra.mxu3 %v404_v38  ;;  %v439_v61 = vsub.f32 %v3470_v40, %v5108_v48  ;;  %v428_v63 = vand.u32 4294901760, %v427_v51  ;;  %v3524_v0 = vand.u32 4294901760, %v219_v55  ;;  %v5103_v1 = vand.u32 4294901760, %v3498_v53 }
  0x19   : > { %405 = vmatpush.msra.mxu1 %v404_v38  ;;  %244 = vmatpush.msra.mxu0 %v3387_v11  ;;  %v3531_v6 = vsub.f32 %v221_v42, %v3495_v52  ;;  %v445_v7 = vsub.f32 %v3483_v46, %v5104_v54  ;;  %v3538_v8 = vsub.f32 %v209_v47, %v3505_v56  ;;  %v434_v13 = vand.u32 4294901760, %v433_v58 }
  0x1a   : > { %3188 = vmatpush.msra.mxu2 %v3409_v18  ;;  %3200 = vmatpush.msra.mxu3 %v410_v43  ;;  %v3542_v17 = vand.u32 4294901760, %v218_v62  ;;  %v5100_v25 = vand.u32 4294901760, %v3514_v60  ;;  %v3546_v29 = vsub.f32 %v220_v49, %v3511_v59  ;;  %v440_v31 = vand.u32 4294901760, %v439_v61 }
  0x1b   : > { %411 = vmatpush.msra.mxu1 %v410_v43  ;;  %246 = vmatpush.msra.mxu0 %v3409_v18  ;;  %v3549_v33 = vand.u32 4294901760, %v217_v2  ;;  %v451_v34 = vsub.f32 %v3498_v53, %v5103_v1  ;;  %v5102_v37 = vand.u32 4294901760, %v3531_v6  ;;  %v3558_v38 = vsub.f32 %v219_v55, %v3524_v0 }
  0x1c   : > { %3189 = vmatpush.msra.mxu2 %v3421_v24  ;;  %3201 = vmatpush.msra.mxu3 %v416_v50  ;;  %v3560_v42 = vand.u32 4294901760, %v201_v12  ;;  %v446_v43 = vand.u32 4294901760, %v445_v7  ;;  %v5101_v44 = vand.u32 4294901760, %v3538_v8  ;;  %v3564_v47 = vand.u32 4294901760, %v210_v30 }
  0x1d   : > { %417 = vmatpush.msra.mxu1 %v416_v50  ;;  %248 = vmatpush.msra.mxu0 %v3421_v24  ;;  %v457_v49 = vsub.f32 %v3514_v60, %v5100_v25  ;;  %v5105_v50 = vand.u32 4294901760, %v3546_v29  ;;  %v3572_v51 = vsub.f32 %v218_v62, %v3542_v17  ;;  %v452_v58 = vand.u32 4294901760, %v451_v34  ;;  %v211_v34 = vld [vmem:[%s3464_s18 + $0x50] sm:$0xff] }
  0x1e   : > { %3190 = vmatpush.msra.mxu2 %v3430_v27  ;;  %3202 = vmatpush.msra.mxu3 %v422_v57  ;;  %v3575_v55 = vsub.f32 %v201_v12, %v3560_v42  ;;  %v463_v61 = vsub.f32 %v3531_v6, %v5102_v37  ;;  %v3585_v62 = vsub.f32 %v217_v2, %v3549_v33  ;;  %v3609_v1 = vand.u32 4294901760, %v211_v34 }
  0x1f   : > { %423 = vmatpush.msra.mxu1 %v422_v57  ;;  %250 = vmatpush.msra.mxu0 %v3430_v27  ;;  %v202_v57 = vld [vmem:[%s3464_s18 + $0x8] sm:$0xff]  ;;  %v332_v7 = vsub.f32 %v3538_v8, %v5101_v44  ;;  %v3592_v12 = vsub.f32 %v210_v30, %v3564_v47  ;;  %v458_v2 = vand.u32 4294901760, %v457_v49  ;;  %v5109_v44 = vand.u32 4294901760, %v3572_v51 }
  0x20   : > { %3191 = vmatpush.msra.mxu2 %v3454_v35  ;;  %3203 = vmatpush.msra.mxu3 %v428_v63  ;;  %v3596_v25 = vand.u32 4294901760, %v202_v57  ;;  %v464_v30 = vand.u32 4294901760, %v463_v61  ;;  %v486_v49 = vand.u32 4294901760, %v3585_v62  ;;  %v3630_v48 = vsub.f32 %v211_v34, %v3609_v1 }
  0x21   : > { %429 = vmatpush.msra.mxu1 %v428_v63  ;;  %252 = vmatpush.msra.mxu0 %v3454_v35  ;;  %v5106_v63 = vand.u32 4294901760, %v3558_v38  ;;  %v333_v54 = vand.u32 4294901760, %v332_v7  ;;  %v203_v7 = vld [vmem:[%s3464_s18 + $0x10] sm:$0xff]  ;;  %v3642_v34 = vand.u32 4294901760, %v212_v45 }
  0x22   : > { %3192 = vmatpush.msra.mxu2 %v3472_v41  ;;  %3204 = vmatpush.msra.mxu3 %v434_v13  ;;  %v3617_v61 = vsub.f32 %v202_v57, %v3596_v25  ;;  %v487_v57 = vsub.f32 %v3585_v62, %v486_v49  ;;  %v3637_v39 = vand.u32 4294901760, %v203_v7 }
  0x23   : > { %435 = vmatpush.msra.mxu1 %v434_v13  ;;  %254 = vmatpush.msra.mxu0 %v3472_v41  ;;  %v5107_v13 = vand.u32 4294901760, %v3575_v55  ;;  %v475_v37 = vsub.f32 %v3558_v38, %v5106_v63 }
  0x24   : > { %3193 = vmatpush.msra.mxu2 %v3495_v52  ;;  %3205 = vmatpush.msra.mxu3 %v440_v31 }
  0x25   : > { %441 = vmatpush.msra.mxu1 %v440_v31  ;;  %256 = vmatpush.msra.mxu0 %v3495_v52  ;;  %v469_v31 = vsub.f32 %v3546_v29, %v5105_v50  ;;  %v5112_v50 = vand.u32 4294901760, %v3592_v12 }
  0x26   : > { %3194 = vmatpush.msra.mxu2 %v3511_v59  ;;  %3206 = vmatpush.msra.mxu3 %v446_v43 }
  0x27   : > { %447 = vmatpush.msra.mxu1 %v446_v43  ;;  %258 = vmatpush.msra.mxu0 %v3511_v59  ;;  %v268_v43 = vsub.f32 %v3575_v55, %v5107_v13  ;;  %v470_v63 = vand.u32 4294901760, %v469_v31  ;;  %v476_v13 = vand.u32 4294901760, %v475_v37  ;;  %v340_v31 = vsub.f32 %v3592_v12, %v5112_v50 }
  0x28   : > { %3195 = vmatpush.msra.mxu2 %v3524_v0  ;;  %3207 = vmatpush.msra.mxu3 %v452_v58 }
  0x29   : > { %453 = vmatpush.msra.mxu1 %v452_v58  ;;  %260 = vmatpush.msra.mxu0 %v3524_v0  ;;  %v481_v58 = vsub.f32 %v3572_v51, %v5109_v44  ;;  %v275_v44 = vand.u32 4294901760, %v3617_v61 }
  0x2a   : > { %3196 = vmatpush.msra.mxu2 %v3542_v17  ;;  %3208 = vmatpush.msra.mxu3 %v458_v2 }
  0x2b   : > { %459 = vmatpush.msra.mxu1 %v458_v2  ;;  %262 = vmatpush.msra.mxu0 %v3542_v17  ;;  %v269_v2 = vand.u32 4294901760, %v268_v43  ;;  %v482_v37 = vand.u32 4294901760, %v481_v58  ;;  %v347_v43 = vand.u32 4294901760, %v3630_v48  ;;  %v276_v58 = vsub.f32 %v3617_v61, %v275_v44 }
  0x2c   : > { %3197 = vmatpush.msra.mxu2 %v3549_v33  ;;  %3209 = vmatpush.msra.mxu3 %v464_v30 }
  0x2d   : > { %334 = vmatmul.f32.vlgmr.msra.gmra.mxu2 %v333_v54  ;;  %465 = vmatpush.msra.mxu1 %v464_v30  ;;  %v488_v54 = vand.u32 4294901760, %v487_v57  ;;  %v341_v30 = vand.u32 4294901760, %v340_v31  ;;  %v204_v57 = vld [vmem:[%s3464_s18 + $0x18] sm:$0xff]  ;;  %v277_v31 = vand.u32 4294901760, %v276_v58 }
  0x2e   : > { %3210 = vmatpush.msra.mxu3 %v470_v63  ;;  %557 = vmatpush.msrb.mxu2 %v3397_v14  ;;  %v3665_v50 = vand.u32 4294901760, %v204_v57 }
  0x2f   : > { %471 = vmatpush.msra.mxu1 %v470_v63  ;;  %264 = vmatpush.msra.mxu0 %v3549_v33  ;;  %v3649_v63 = vsub.f32 %v203_v7, %v3637_v39  ;;  %v348_v7 = vsub.f32 %v3630_v48, %v347_v43 }
  0x30   : > { %3211 = vmatpush.msra.mxu3 %v476_v13  ;;  %560 = vmatpush.msrb.mxu2 %v3400_v15 }
  0x31   : > { %477 = vmatpush.msra.mxu1 %v476_v13  ;;  %270 = vmatmul.f32.vlgmr.msra.gmra.mxu0 %v269_v2  ;;  %v3657_v13 = vsub.f32 %v212_v45, %v3642_v34  ;;  %v283_v2 = vand.u32 4294901760, %v3649_v63 }
  0x32   : > { %3212 = vmatpush.msra.mxu3 %v482_v37  ;;  %563 = vmatpush.msrb.mxu2 %v3403_v16 }
  0x33   : > { %483 = vmatpush.msra.mxu1 %v482_v37  ;;  %816 = vmatpush.msrb.mxu0 %v396_v21  ;;  %v213_v37 = vld [vmem:[%s3464_s18 + $0x60] sm:$0xff]  ;;  %v349_v21 = vand.u32 4294901760, %v348_v7  ;;  %v355_v45 = vand.u32 4294901760, %v3657_v13 }
  0x34   : > { %3213 = vmatpush.msra.mxu3 %v488_v54  ;;  %566 = vmatpush.msrb.mxu2 %v3412_v19  ;;  %v3673_v14 = vand.u32 4294901760, %v213_v37 }
  0x35   : > { %342 = vmatmul.f32.gmra.mxu2 %v341_v30  ;;  %523 = vmatmul.f32.vlgmr.msra.gmra.mxu3 %v3505_v56  ;;  %v3681_v30 = vsub.f32 %v204_v57, %v3665_v50 }
  0x36   : > { %685 = vmatpush.msrb.mxu3 %v3368_v3  ;;  %489 = vmatpush.msra.mxu1 %v488_v54  ;;  %v284_v54 = vsub.f32 %v3649_v63, %v283_v2  ;;  %v3692_v15 = vsub.f32 %v213_v37, %v3673_v14  ;;  %v5146_v37 = vand.u32 4294901760, %v3433_v28 }
  0x37   : > { %491 = vmatmul.f32.vlgmr.msra.gmra.mxu1 %v3560_v42  ;;  %820 = vmatpush.msrb.mxu0 %v402_v22  ;;  %v291_v16 = vand.u32 4294901760, %v3681_v30 }
  0x38   : > { %687 = vmatpush.msrb.mxu3 %v3370_v4  ;;  %943 = vmatpush.msrb.mxu1 %v3368_v3  ;;  %v205_v3 = vld [vmem:[%s3464_s18 + $0x20] sm:$0xff]  ;;  %v285_v22 = vand.u32 4294901760, %v284_v54  ;;  %v363_v58 = vand.u32 4294901760, %v3692_v15 }
  0x39   : > { %569 = vmatpush.msrb.mxu2 %v3415_v20  ;;  %278 = vmatmul.f32.gmra.mxu0 %v277_v31  ;;  %v292_v19 = vsub.f32 %v3681_v30, %v291_v16 }
  0x3a   : > { %689 = vmatpush.msrb.mxu3 %v3372_v5  ;;  %945 = vmatpush.msrb.mxu1 %v3370_v4  ;;  %v356_v4 = vsub.f32 %v3657_v13, %v355_v45  ;;  %v364_v31 = vsub.f32 %v3692_v15, %v363_v58 }
  0x3b   : > { %824 = vmatpush.msrb.mxu0 %v408_v23  ;;  %572 = vmatpush.msrb.mxu2 %v3433_v28  ;;  %v3699_v23 = vand.u32 4294901760, %v205_v3  ;;  %v5147_v28 = vand.u32 4294901760, %v3457_v36 }
  0x3c   : > { %691 = vmatpush.msrb.mxu3 %v3383_v9  ;;  %947 = vmatpush.msrb.mxu1 %v3372_v5  ;;  %v214_v5 = vld [vmem:[%s3464_s18 + $0x68] sm:$0xff]  ;;  %v357_v57 = vand.u32 4294901760, %v356_v4  ;;  %v365_v4 = vand.u32 4294901760, %v364_v31 }
  0x3d   : > { %350 = vmatmul.f32.gmra.mxu2 %v349_v21  ;;  %527 = vmatmul.f32.gmra.mxu3 %v3564_v47  ;;  %v3717_v7 = vsub.f32 %v205_v3, %v3699_v23  ;;  %v293_v21 = vand.u32 4294901760, %v292_v19  ;;  %v5149_v19 = vand.u32 4294901760, %v3483_v46 }
  0x3e   : > { %693 = vmatpush.msrb.mxu3 %v3385_v10  ;;  %828 = vmatpush.msrb.mxu0 %v414_v26  ;;  %v3714_v26 = vand.u32 4294901760, %v214_v5 }
  0x3f   : > { %495 = vmatmul.f32.gmra.mxu1 %v3596_v25  ;;  %575 = vmatpush.msrb.mxu2 %v3457_v36  ;;  %v5148_v36 = vand.u32 4294901760, %v3470_v40 }
  0x40   : > { %695 = vmatpush.msrb.mxu3 %v3387_v11  ;;  %949 = vmatpush.msrb.mxu1 %v3383_v9  ;;  %v206_v9 = vld [vmem:[%s3464_s18 + $0x28] sm:$0xff]  ;;  %v3733_v20 = vsub.f32 %v214_v5, %v3714_v26 }
  0x41   : > { %286 = vmatmul.f32.gmra.mxu0 %v285_v22  ;;  %578 = vmatpush.msrb.mxu2 %v3470_v40  ;;  %v3737_v54 = vand.u32 4294901760, %v206_v9 }
  0x42   : > { %697 = vmatpush.msrb.mxu3 %v3409_v18  ;;  %832 = vmatpush.msrb.mxu0 %v420_v32  ;;  %v215_v32 = vld [vmem:[%s3464_s18 + $0x70] sm:$0xff]  ;;  %v5127_v22 = vand.u32 4294901760, %v3733_v20 }
  0x43   : > { %951 = vmatpush.msrb.mxu1 %v3385_v10  ;;  %581 = vmatpush.msrb.mxu2 %v3483_v46  ;;  %v299_v10 = vand.u32 4294901760, %v3717_v7  ;;  %v3746_v3 = vand.u32 4294901760, %v215_v32  ;;  %v3754_v5 = vsub.f32 %v206_v9, %v3737_v54  ;;  %v216_v46 = vld [vmem:[%s3464_s18 + $0x78] sm:$0xff] }
  0x44   : > { %699 = vmatpush.msrb.mxu3 %v3421_v24  ;;  %836 = vmatpush.msrb.mxu0 %v5146_v37  ;;  %v372_v40 = vsub.f32 %v3733_v20, %v5127_v22  ;;  %v5150_v37 = vand.u32 4294901760, %v3498_v53 }
  0x45   : > { %358 = vmatmul.f32.gmra.mxu2 %v357_v57  ;;  %531 = vmatmul.f32.gmra.mxu3 %v3609_v1  ;;  %v3763_v57 = vsub.f32 %v215_v32, %v3746_v3 }
  0x46   : > { %953 = vmatpush.msrb.mxu1 %v3387_v11  ;;  %701 = vmatpush.msrb.mxu3 %v3430_v27  ;;  %v300_v11 = vsub.f32 %v3717_v7, %v299_v10  ;;  %v373_v32 = vand.u32 4294901760, %v372_v40 }
  0x47   : > { %499 = vmatmul.f32.gmra.mxu1 %v3637_v39  ;;  %840 = vmatpush.msrb.mxu0 %v5147_v28  ;;  %v3787_v28 = vand.u32 4294901760, %v216_v46 }
  0x48   : > { %584 = vmatpush.msrb.mxu2 %v3498_v53  ;;  %955 = vmatpush.msrb.mxu1 %v3409_v18  ;;  %v207_v18 = vld [vmem:[%s3464_s18 + $0x30] sm:$0xff]  ;;  %v301_v9 = vand.u32 4294901760, %v300_v11  ;;  %v5151_v53 = vand.u32 4294901760, %v3514_v60  ;;  %v208_v11 = vld [vmem:[%s3464_s18 + $0x38] sm:$0xff] }
  0x49   : > { %294 = vmatmul.f32.gmra.mxu0 %v293_v21  ;;  %703 = vmatpush.msrb.mxu3 %v3454_v35  ;;  %v3773_v31 = vand.u32 4294901760, %v207_v18  ;;  %v5121_v21 = vand.u32 4294901760, %v3763_v57 }
  0x4a   : > { %844 = vmatpush.msrb.mxu0 %v5148_v36  ;;  %587 = vmatpush.msrb.mxu2 %v3514_v60  ;;  %v5152_v36 = vand.u32 4294901760, %v3531_v6 }
  0x4b   : > { %957 = vmatpush.msrb.mxu1 %v3421_v24  ;;  %705 = vmatpush.msrb.mxu3 %v3472_v41  ;;  %v307_v24 = vand.u32 4294901760, %v3754_v5 }
  0x4c   : > { %848 = vmatpush.msrb.mxu0 %v5149_v19  ;;  %590 = vmatpush.msrb.mxu2 %v3531_v6  ;;  %v3810_v19 = vand.u32 4294901760, %v208_v11  ;;  %v5153_v6 = vand.u32 4294901760, %v3546_v29 }
  0x4d   : > { %366 = vmatmul.f32.gmra.mxu2 %v365_v4  ;;  %535 = vmatmul.f32.gmra.mxu3 %v3642_v34  ;;  %v3791_v4 = vsub.f32 %v207_v18, %v3773_v31  ;;  %v3807_v18 = vsub.f32 %v216_v46, %v3787_v28 }
  0x4e   : > { %959 = vmatpush.msrb.mxu1 %v3430_v27  ;;  %707 = vmatpush.msrb.mxu3 %v3495_v52  ;;  %v308_v27 = vsub.f32 %v3754_v5, %v307_v24 }
  0x4f   : > { %503 = vmatmul.f32.gmra.mxu1 %v3665_v50  ;;  %852 = vmatpush.msrb.mxu0 %v5150_v37  ;;  %v5154_v37 = vand.u32 4294901760, %v3558_v38 }
  0x50   : > { %593 = vmatpush.msrb.mxu2 %v3546_v29  ;;  %961 = vmatpush.msrb.mxu1 %v3454_v35  ;;  %v380_v35 = vsub.f32 %v3763_v57, %v5121_v21  ;;  %v309_v60 = vand.u32 4294901760, %v308_v27 }
  0x51   : > { %302 = vmatmul.f32.gmra.mxu0 %v301_v9  ;;  %709 = vmatpush.msrb.mxu3 %v3511_v59  ;;  %v5114_v9 = vand.u32 4294901760, %v3807_v18 }
  0x52   : > { %856 = vmatpush.msrb.mxu0 %v5151_v53  ;;  %596 = vmatpush.msrb.mxu2 %v3558_v38  ;;  %v381_v40 = vand.u32 4294901760, %v380_v35  ;;  %v1069_v53 = vld [vmem:[%s5097_s2 + $0x70] sm:$0xff] }
  0x53   : > { %963 = vmatpush.msrb.mxu1 %v3472_v41  ;;  %711 = vmatpush.msrb.mxu3 %v3524_v0  ;;  %v315_v41 = vand.u32 4294901760, %v3791_v4  ;;  %v388_v29 = vsub.f32 %v3807_v18, %v5114_v9 }
  0x54   : > { %860 = vmatpush.msrb.mxu0 %v5152_v36  ;;  %599 = vmatpush.msrb.mxu2 %v3572_v51 }
  0x55   : > { %374 = vmatmul.f32.gmra.mxu2 %v373_v32  ;;  %539 = vmatmul.f32.gmra.mxu3 %v3673_v14  ;;  %v316_v46 = vsub.f32 %v3791_v4, %v315_v41 }
  0x56   : > { %965 = vmatpush.msrb.mxu1 %v3495_v52  ;;  %602 = vmatpush.msrb.mxu2 %v3585_v62  ;;  %v3825_v52 = vsub.f32 %v208_v11, %v3810_v19  ;;  %v3864_v11 = vand.u32 4294901760, %v1069_v53 }
  0x57   : > { %507 = vmatmul.f32.gmra.mxu1 %v3699_v23  ;;  %713 = vmatpush.msrb.mxu3 %v3542_v17  ;;  %v317_v32 = vand.u32 4294901760, %v316_v46 }
  0x58   : > { %864 = vmatpush.msrb.mxu0 %v5153_v6  ;;  %967 = vmatpush.msrb.mxu1 %v3511_v59  ;;  %v5155_v59 = vand.u32 4294901760, %v3572_v51  ;;  %v323_v27 = vand.u32 4294901760, %v3825_v52  ;;  %v1070_v51 = vld [vmem:[%s5097_s2 + $0x78] sm:$0xff]  ;;  %v3877_v6 = vsub.f32 %v1069_v53, %v3864_v11 }
  0x59   : > { %310 = vmatmul.f32.gmra.mxu0 %v309_v60  ;;  %715 = vmatpush.msrb.mxu3 %v3549_v33  ;;  %v3849_v62 = vand.u32 4294901760, %v1070_v51  ;;  %v5156_v60 = vand.u32 4294901760, %v3575_v55 }
  0x5a   : > { %868 = vmatpush.msrb.mxu0 %v5154_v37  ;;  %969 = vmatpush.msrb.mxu1 %v3524_v0  ;;  %v389_v0 = vand.u32 4294901760, %v388_v29  ;;  %v5126_v37 = vand.u32 4294901760, %v3877_v6  ;;  %v1067_v29 = vld [vmem:[%s5097_s2 + $0x60] sm:$0xff] }
  0x5b   : > { %1072 = vmatpush.msra.mxu2 %v3849_v62 }
  0x5c   : > { %872 = vmatpush.msrb.mxu0 %v5155_v59  ;;  %971 = vmatpush.msrb.mxu1 %v3542_v17  ;;  %v324_v17 = vsub.f32 %v3825_v52, %v323_v27 }
  0x5d   : > { %382 = vmatmul.f32.gmra.mxu2 %v381_v40  ;;  %543 = vmatmul.f32.gmra.mxu3 %v3714_v26  ;;  %v1068_v40 = vld [vmem:[%s5097_s2 + $0x68] sm:$0xff] }
  0x5e   : > { %876 = vmatpush.msrb.mxu0 %v486_v49  ;;  %973 = vmatpush.msrb.mxu1 %v3549_v33  ;;  %v325_v38 = vand.u32 4294901760, %v324_v17  ;;  %v3854_v33 = vsub.f32 %v1070_v51, %v3849_v62  ;;  %v3882_v46 = vand.u32 4294901760, %v1068_v40  ;;  %v1066_v17 = vld [vmem:[%s5097_s2 + $0x58] sm:$0xff] }
  0x5f   : > { %511 = vmatmul.f32.gmra.mxu1 %v3737_v54  ;;  %1074 = vmatpush.msra.mxu2 %v3864_v11 }
  0x60   : > { %1523 = vmatpush.msra.mxu1 %v3849_v62  ;;  %1395 = vmatpush.msra.mxu0 %v3854_v33  ;;  %v5128_v49 = vand.u32 4294901760, %v3854_v33 }
  0x61   : > { %318 = vmatmul.f32.gmra.mxu0 %v317_v32  ;;  %1076 = vmatpush.msra.mxu2 %v3882_v46  ;;  %v3902_v32 = vand.u32 4294901760, %v1067_v29 }
  0x62   : > { %v1235_v35 = vsub.f32 %v3854_v33, %v5128_v49  ;;  %1525 = vmatpush.msra.mxu1 %v3864_v11  ;;  %1398 = vmatpush.msra.mxu0 %v3877_v6 }
  0x63   : > { %1078 = vmatpush.msra.mxu2 %v3902_v32 }
  0x64   : > { %v1236_v36 = vand.u32 4294901760, %v1235_v35  ;;  %1527 = vmatpush.msra.mxu1 %v3882_v46  ;;  %v1065_v35 = vld [vmem:[%s5097_s2 + $0x50] sm:$0xff] }
  0x65   : > { %390 = vmatmul.f32.gmra.mxu2 %v389_v0  ;;  %547 = vmatmul.f32.gmra.mxu3 %v3746_v3 }
  0x66   : > { %1237 = vmatpush.msra.mxu3 %v1236_v36  ;;  %1529 = vmatpush.msra.mxu1 %v3902_v32 }
  0x67   : > { %515 = vmatmul.f32.gmra.mxu1 %v3773_v31 }
  0x69   : > { %326 = vmatmul.f32.gmra.mxu0 %v325_v38  ;;  %v3922_v38 = vand.u32 4294901760, %v1066_v17 }
  0x6b   : > { %1080 = vmatpush.msra.mxu2 %v3922_v38  ;;  %1531 = vmatpush.msra.mxu1 %v3922_v38 }
  0x6d   : > { %551 = vmatmul.f32.gmra.mxu3 %v3787_v28  ;;  %605 = vmatmul.f32.vlgmr.msrb.gmra.mxu2 %v3575_v55  ;;  %v1241_v55 = vsub.f32 %v3877_v6, %v5126_v37 }
  0x6f   : > { %519 = vmatmul.f32.gmra.mxu1 %v3810_v19  ;;  %v1242_v59 = vand.u32 4294901760, %v1241_v55 }
  0x71   : > { %878 = vmatmul.f32.vlgmr.msrb.gmra.mxu0 %v3560_v42  ;;  %1243 = vmatpush.msra.mxu3 %v1242_v59 }
  0x75   : > { %610 = vmatmul.f32.gmra.mxu2 %v3617_v61  ;;  %719 = vmatmul.f32.vlgmr.msrb.gmra.mxu3 %v5156_v60 }
  0x77   : > { %975 = vmatmul.f32.vlgmr.msrb.gmra.mxu1 %v3560_v42  ;;  %v3897_v42 = vsub.f32 %v1068_v40, %v3882_v46 }
  0x79   : > { %882 = vmatmul.f32.gmra.mxu0 %v3596_v25  ;;  %v5125_v0 = vand.u32 4294901760, %v3897_v42 }
  0x7a   : > { %1401 = vmatpush.msra.mxu0 %v3897_v42 }
  0x7d   : > { %615 = vmatmul.f32.gmra.mxu2 %v3649_v63  ;;  %725 = vmatmul.f32.gmra.mxu3 %v275_v44  ;;  %v1247_v44 = vsub.f32 %v3897_v42, %v5125_v0 }
  0x7f   : > { %979 = vmatmul.f32.gmra.mxu1 %v3596_v25  ;;  %v1248_v61 = vand.u32 4294901760, %v1247_v44  ;;  %v3917_v25 = vsub.f32 %v1067_v29, %v3902_v32 }
  0x81   : > { %886 = vmatmul.f32.gmra.mxu0 %v3637_v39  ;;  %1249 = vmatpush.msra.mxu3 %v1248_v61  ;;  %v5123_v51 = vand.u32 4294901760, %v3917_v25 }
  0x82   : > { %1404 = vmatpush.msra.mxu0 %v3917_v25 }
  0x83   : > { %v1253_v63 = vsub.f32 %v3917_v25, %v5123_v51 }
  0x85   : > { %620 = vmatmul.f32.gmra.mxu2 %v3681_v30  ;;  %731 = vmatmul.f32.gmra.mxu3 %v283_v2  ;;  %v1254_v2 = vand.u32 4294901760, %v1253_v63 }
  0x87   : > { %983 = vmatmul.f32.gmra.mxu1 %v3637_v39  ;;  %v3937_v39 = vsub.f32 %v1066_v17, %v3922_v38  ;;  %1255 = vmatpush.msra.mxu3 %v1254_v2 }
  0x89   : > { %890 = vmatmul.f32.gmra.mxu0 %v3665_v50  ;;  %v5122_v53 = vand.u32 4294901760, %v3937_v39 }
  0x8a   : > { %1407 = vmatpush.msra.mxu0 %v3937_v39 }
  0x8b   : > { %v1259_v30 = vsub.f32 %v3937_v39, %v5122_v53 }
  0x8d   : > { %625 = vmatmul.f32.gmra.mxu2 %v3717_v7  ;;  %737 = vmatmul.f32.gmra.mxu3 %v291_v16  ;;  %v3949_v16 = vand.u32 4294901760, %v1065_v35  ;;  %v1260_v36 = vand.u32 4294901760, %v1259_v30  ;;  %v1064_v7 = vld [vmem:[%s5097_s2 + $0x48] sm:$0xff] }
  0x8f   : > { %987 = vmatmul.f32.gmra.mxu1 %v3665_v50  ;;  %1082 = vmatpush.msra.mxu2 %v3949_v16  ;;  %v3957_v50 = vsub.f32 %v1065_v35, %v3949_v16 }
  0x90   : > { %1533 = vmatpush.msra.mxu1 %v3949_v16  ;;  %1261 = vmatpush.msra.mxu3 %v1260_v36 }
  0x91   : > { %894 = vmatmul.f32.gmra.mxu0 %v3699_v23  ;;  %v5120_v60 = vand.u32 4294901760, %v3957_v50 }
  0x92   : > { %1410 = vmatpush.msra.mxu0 %v3957_v50 }
  0x93   : > { %v1265_v40 = vsub.f32 %v3957_v50, %v5120_v60 }
  0x95   : > { %630 = vmatmul.f32.gmra.mxu2 %v3754_v5  ;;  %743 = vmatmul.f32.gmra.mxu3 %v299_v10  ;;  %v3969_v10 = vand.u32 4294901760, %v1064_v7  ;;  %v1266_v55 = vand.u32 4294901760, %v1265_v40  ;;  %v1063_v5 = vld [vmem:[%s5097_s2 + $0x40] sm:$0xff] }
  0x97   : > { %991 = vmatmul.f32.gmra.mxu1 %v3699_v23  ;;  %1084 = vmatpush.msra.mxu2 %v3969_v10  ;;  %v3977_v23 = vsub.f32 %v1064_v7, %v3969_v10  ;;  %v5157_v7 = vand.u32 4294901760, %v3538_v8 }
  0x98   : > { %1535 = vmatpush.msra.mxu1 %v3969_v10  ;;  %1267 = vmatpush.msra.mxu3 %v1266_v55 }
  0x99   : > { %898 = vmatmul.f32.gmra.mxu0 %v3737_v54  ;;  %v5118_v59 = vand.u32 4294901760, %v3977_v23 }
  0x9a   : > { %1413 = vmatpush.msra.mxu0 %v3977_v23 }
  0x9b   : > { %v1271_v29 = vsub.f32 %v3977_v23, %v5118_v59 }
  0x9d   : > { %635 = vmatmul.f32.gmra.mxu2 %v3791_v4  ;;  %749 = vmatmul.f32.gmra.mxu3 %v307_v24  ;;  %v3989_v24 = vand.u32 4294901760, %v1063_v5  ;;  %v1272_v44 = vand.u32 4294901760, %v1271_v29  ;;  %v1062_v4 = vld [vmem:[%s5097_s2 + $0x38] sm:$0xff] }
  0x9f   : > { %995 = vmatmul.f32.gmra.mxu1 %v3737_v54  ;;  %1086 = vmatpush.msra.mxu2 %v3989_v24  ;;  %v3997_v54 = vsub.f32 %v1063_v5, %v3989_v24 }
  0xa0   : > { %1537 = vmatpush.msra.mxu1 %v3989_v24  ;;  %1273 = vmatpush.msra.mxu3 %v1272_v44 }
  0xa1   : > { %902 = vmatmul.f32.gmra.mxu0 %v3773_v31  ;;  %v5117_v61 = vand.u32 4294901760, %v3997_v54 }
  0xa2   : > { %1416 = vmatpush.msra.mxu0 %v3997_v54 }
  0xa3   : > { %v1277_v17 = vsub.f32 %v3997_v54, %v5117_v61 }
  0xa5   : > { %640 = vmatmul.f32.gmra.mxu2 %v3825_v52  ;;  %755 = vmatmul.f32.gmra.mxu3 %v315_v41  ;;  %v4009_v41 = vand.u32 4294901760, %v1062_v4  ;;  %v1278_v63 = vand.u32 4294901760, %v1277_v17 }
  0xa7   : > { %999 = vmatmul.f32.gmra.mxu1 %v3773_v31  ;;  %1088 = vmatpush.msra.mxu2 %v4009_v41  ;;  %v4017_v31 = vsub.f32 %v1062_v4, %v4009_v41  ;;  %v1060_v4 = vld [vmem:[%s5097_s2 + $0x28] sm:$0xff] }
  0xa8   : > { %1539 = vmatpush.msra.mxu1 %v4009_v41  ;;  %1279 = vmatpush.msra.mxu3 %v1278_v63  ;;  %v4061_v63 = vand.u32 4294901760, %v1060_v4 }
  0xa9   : > { %906 = vmatmul.f32.gmra.mxu0 %v3810_v19  ;;  %v5116_v35 = vand.u32 4294901760, %v4017_v31 }
  0xaa   : > { %1419 = vmatpush.msra.mxu0 %v4017_v31 }
  0xab   : > { %v1283_v52 = vsub.f32 %v4017_v31, %v5116_v35 }
  0xad   : > { %645 = vmatmul.f32.gmra.mxu2 %v3538_v8  ;;  %761 = vmatmul.f32.gmra.mxu3 %v323_v27  ;;  %v1061_v27 = vld [vmem:[%s5097_s2 + $0x30] sm:$0xff]  ;;  %v1284_v40 = vand.u32 4294901760, %v1283_v52 }
  0xae   : > { %v4019_v2 = vpop.f32.mrf.mxu0  ;;  %v4033_v36 = vand.u32 4294901760, %v1061_v27 }
  0xaf   : > { %1003 = vmatmul.f32.gmra.mxu1 %v3810_v19  ;;  %1285 = vmatpush.msra.mxu3 %v1284_v40  ;;  %v4071_v40 = vsub.f32 %v1060_v4, %v4061_v63  ;;  %v1059_v4 = vld [vmem:[%s5097_s2 + $0x20] sm:$0xff] }
  0xb0   : > { %v4024_v30 = vpop.f32.mrf.mxu2  ;;  %1090 = vmatpush.msra.mxu2 %v4033_v36  ;;  %1541 = vmatpush.msra.mxu1 %v4033_v36  ;;  %v4043_v55 = vsub.f32 %v1061_v27, %v4033_v36  ;;  %v5158_v27 = vand.u32 4294901760, %v3592_v12 }
  0xb1   : > { %910 = vmatmul.f32.gmra.mxu0 %v3505_v56 }
  0xb2   : > { %v5113_v5 = vand.u32 4294901760, %v4043_v55  ;;  %1422 = vmatpush.msra.mxu0 %v4043_v55  ;;  %1092 = vmatpush.msra.mxu2 %v4061_v63 }
  0xb3   : > { %1543 = vmatpush.msra.mxu1 %v4061_v63 }
  0xb4   : > { %v4035_v19 = vpop.f32.mrf.mxu1  ;;  %v1289_v8 = vsub.f32 %v4043_v55, %v5113_v5  ;;  %1425 = vmatpush.msra.mxu0 %v4071_v40 }
  0xb5   : > { %650 = vmatmul.f32.gmra.mxu2 %v3592_v12  ;;  %767 = vmatmul.f32.gmra.mxu3 %v5157_v7 }
  0xb6   : > { %v4045_v29 = vpop.f32.mrf.mxu0 }
  0xb7   : > { %1007 = vmatmul.f32.gmra.mxu1 %v3505_v56  ;;  %v1290_v56 = vand.u32 4294901760, %v1289_v8  ;;  %v5115_v8 = vand.u32 4294901760, %v4071_v40 }
  0xb8   : > { %v4050_v44 = vpop.f32.mrf.mxu2  ;;  %v4052_v17 = vpop.f32.mrf.mxu3 }
  0xb9   : > { %914 = vmatmul.f32.gmra.mxu0 %v3564_v47  ;;  %1291 = vmatpush.msra.mxu3 %v1290_v56  ;;  %v1295_v12 = vsub.f32 %v4071_v40, %v5115_v8  ;;  %v4089_v56 = vand.u32 4294901760, %v1059_v4 }
  0xbb   : > { %1094 = vmatpush.msra.mxu2 %v4089_v56  ;;  %1545 = vmatpush.msra.mxu1 %v4089_v56  ;;  %v4099_v8 = vsub.f32 %v1059_v4, %v4089_v56 }
  0xbc   : > { %v4063_v52 = vpop.f32.mrf.mxu1 }
  0xbd   : > { %655 = vmatmul.f32.gmra.mxu2 %v3630_v48  ;;  %773 = vmatmul.f32.gmra.mxu3 %v5158_v27 }
  0xbe   : > { %v4073_v7 = vpop.f32.mrf.mxu0  ;;  %1428 = vmatpush.msra.mxu0 %v4099_v8 }
  0xbf   : > { %1011 = vmatmul.f32.gmra.mxu1 %v3564_v47  ;;  %v1296_v47 = vand.u32 4294901760, %v1295_v12  ;;  %v5119_v12 = vand.u32 4294901760, %v4099_v8 }
  0xc0   : > { %v4078_v5 = vpop.f32.mrf.mxu2  ;;  %v4080_v9 = vpop.f32.mrf.mxu3 }
  0xc1   : > { %5159 = vst [vmem:[#allocation2_spill] sm:$0xff] %v4078_v5  ;;  %918 = vmatmul.f32.gmra.mxu0 %v3609_v1  ;;  %1297 = vmatpush.msra.mxu3 %v1296_v47  ;;  %v1301_v48 = vsub.f32 %v4099_v8, %v5119_v12  ;;  %v5169_v5 = vand.u32 4294901760, %v3897_v42 }
  0xc4   : > { %v4091_v27 = vpop.f32.mrf.mxu1 }
  0xc5   : > { %660 = vmatmul.f32.gmra.mxu2 %v3657_v13  ;;  %779 = vmatmul.f32.gmra.mxu3 %v347_v43  ;;  %v1058_v43 = vld [vmem:[%s5097_s2 + $0x18] sm:$0xff] }
  0xc6   : > { %v4101_v35 = vpop.f32.mrf.mxu0  ;;  %v4117_v4 = vand.u32 4294901760, %v1058_v43 }
  0xc7   : > { %1015 = vmatmul.f32.gmra.mxu1 %v3609_v1  ;;  %v1302_v1 = vand.u32 4294901760, %v1301_v48 }
  0xc8   : > { %v4106_v61 = vpop.f32.mrf.mxu2  ;;  %v4108_v59 = vpop.f32.mrf.mxu3  ;;  %1096 = vmatpush.msra.mxu2 %v4117_v4  ;;  %1547 = vmatpush.msra.mxu1 %v4117_v4  ;;  %v4127_v12 = vsub.f32 %v1058_v43, %v4117_v4 }
  0xc9   : > { %5160 = vst [vmem:[#allocation3_spill] sm:$0xff] %v4106_v61  ;;  %922 = vmatmul.f32.gmra.mxu0 %v3642_v34  ;;  %1303 = vmatpush.msra.mxu3 %v1302_v1 }
  0xca   : > { %5161 = vst [vmem:[#allocation4_spill] sm:$0xff] %v4108_v59  ;;  %v5124_v48 = vand.u32 4294901760, %v4127_v12  ;;  %1431 = vmatpush.msra.mxu0 %v4127_v12 }
  0xcc   : > { %v4119_v47 = vpop.f32.mrf.mxu1  ;;  %v1307_v13 = vsub.f32 %v4127_v12, %v5124_v48  ;;  %v1056_v48 = vld [vmem:[%s5097_s2 + $0x8] sm:$0xff] }
  0xcd   : > { %665 = vmatmul.f32.gmra.mxu2 %v3692_v15  ;;  %785 = vmatmul.f32.gmra.mxu3 %v355_v45  ;;  %v1057_v45 = vld [vmem:[%s5097_s2 + $0x10] sm:$0xff]  ;;  %v4163_v37 = vand.u32 4294901760, %v1056_v48  ;;  %v1055_v15 = vld [vmem:[%s5097_s2] sm:$0xff] }
  0xce   : > { %v4129_v60 = vpop.f32.mrf.mxu0  ;;  %v4145_v43 = vand.u32 4294901760, %v1057_v45  ;;  %v4181_v49 = vand.u32 4294901760, %v1055_v15 }
  0xcf   : > { %1019 = vmatmul.f32.gmra.mxu1 %v3642_v34  ;;  %v1308_v34 = vand.u32 4294901760, %v1307_v13  ;;  %v4179_v22 = vsub.f32 %v1056_v48, %v4163_v37  ;;  %v5166_v48 = vand.u32 4294901760, %v3854_v33 }
  0xd0   : > { %v4134_v21 = vpop.f32.mrf.mxu2  ;;  %v4136_v53 = vpop.f32.mrf.mxu3  ;;  %1098 = vmatpush.msra.mxu2 %v4145_v43  ;;  %v4151_v51 = vsub.f32 %v1057_v45, %v4145_v43  ;;  %1549 = vmatpush.msra.mxu1 %v4145_v43 }
  0xd1   : > { %5162 = vst [vmem:[#allocation5_spill] sm:$0xff] %v4134_v21  ;;  %926 = vmatmul.f32.gmra.mxu0 %v3673_v14  ;;  %1309 = vmatpush.msra.mxu3 %v1308_v34 }
  0xd2   : > { %5163 = vst [vmem:[#allocation6_spill] sm:$0xff] %v4136_v53  ;;  %v5129_v13 = vand.u32 4294901760, %v4151_v51  ;;  %1434 = vmatpush.msra.mxu0 %v4151_v51  ;;  %1100 = vmatpush.msra.mxu2 %v4163_v37 }
  0xd3   : > { %1551 = vmatpush.msra.mxu1 %v4163_v37 }
  0xd4   : > { %v4147_v1 = vpop.f32.mrf.mxu1  ;;  %v1313_v34 = vsub.f32 %v4151_v51, %v5129_v13  ;;  %1437 = vmatpush.msra.mxu0 %v4179_v22  ;;  %1102 = vmatpush.msra.mxu2 %v4181_v49 }
  0xd5   : > { %670 = vmatmul.f32.gmra.mxu2 %v3733_v20  ;;  %791 = vmatmul.f32.gmra.mxu3 %v363_v58 }
  0xd6   : > { %v4160_v0 = vpop.f32.mrf.mxu0  ;;  %1553 = vmatpush.msra.mxu1 %v4181_v49  ;;  %1654 = vmatpush.msrb.mxu2 %v5166_v48 }
  0xd7   : > { %1023 = vmatmul.f32.gmra.mxu1 %v3673_v14  ;;  %v1314_v14 = vand.u32 4294901760, %v1313_v34 }
  0xd8   : > { %v4170_v58 = vpop.f32.mrf.mxu2  ;;  %v4172_v45 = vpop.f32.mrf.mxu3 }
  0xd9   : > { %5164 = vst [vmem:[#allocation7_spill] sm:$0xff] %v4170_v58  ;;  %930 = vmatmul.f32.gmra.mxu0 %v3714_v26  ;;  %v5130_v58 = vand.u32 4294901760, %v4179_v22  ;;  %1315 = vmatpush.msra.mxu3 %v1314_v14  ;;  %v5168_v14 = vand.u32 4294901760, %v3877_v6 }
  0xda   : > { %5165 = vst [vmem:[#allocation8_spill] sm:$0xff] %v4172_v45  ;;  %v4187_v45 = vsub.f32 %v1055_v15, %v4181_v49  ;;  %v5167_v15 = vand.u32 4294901760, %v3733_v20  ;;  %v5170_v20 = vand.u32 4294901760, %v3917_v25 }
  0xdb   : > { %v1319_v34 = vsub.f32 %v4179_v22, %v5130_v58  ;;  %1658 = vmatpush.msrb.mxu2 %v5168_v14 }
  0xdc   : > { %v4194_v13 = vpop.f32.mrf.mxu1  ;;  %v1324_v21 = vand.u32 4294901760, %v4187_v45  ;;  %1440 = vmatpush.msra.mxu0 %v4187_v45 }
  0xdd   : > { %675 = vmatmul.f32.gmra.mxu2 %v3763_v57  ;;  %797 = vmatmul.f32.gmra.mxu3 %v5167_v15  ;;  %v1320_v33 = vand.u32 4294901760, %v1319_v34 }
  0xde   : > { %v4204_v53 = vpop.f32.mrf.mxu0  ;;  %v1325_v48 = vsub.f32 %v4187_v45, %v1324_v21  ;;  %1662 = vmatpush.msrb.mxu2 %v5169_v5  ;;  %v5172_v45 = vand.u32 4294901760, %v3763_v57  ;;  %v5175_v57 = vand.u32 4294901760, %v3997_v54 }
  0xdf   : > { %1027 = vmatmul.f32.gmra.mxu1 %v3714_v26  ;;  %1321 = vmatpush.msra.mxu3 %v1320_v33  ;;  %v5171_v26 = vand.u32 4294901760, %v3937_v39  ;;  %v5174_v39 = vand.u32 4294901760, %v3977_v23  ;;  %v5178_v23 = vand.u32 4294901760, %v4043_v55 }
  0xe0   : > { %v4210_v58 = vpop.f32.mrf.mxu2  ;;  %v4212_v61 = vpop.f32.mrf.mxu3  ;;  %v1326_v59 = vand.u32 4294901760, %v1325_v48  ;;  %1666 = vmatpush.msrb.mxu2 %v5170_v20 }
  0xe1   : > { %934 = vmatmul.f32.gmra.mxu0 %v3746_v3 }
  0xe2   : > { %1327 = vmatpush.msra.mxu3 %v1326_v59  ;;  %1670 = vmatpush.msrb.mxu2 %v5171_v26  ;;  %v5173_v59 = vand.u32 4294901760, %v3957_v50  ;;  %v5177_v50 = vand.u32 4294901760, %v3807_v18 }
  0xe4   : > { %1781 = vmatpush.msrb.mxu3 %v3849_v62  ;;  %v4220_v6 = vpop.f32.mrf.mxu1  ;;  %1674 = vmatpush.msrb.mxu2 %v5173_v59 }
  0xe5   : > { %680 = vmatmul.f32.gmra.mxu2 %v3807_v18  ;;  %803 = vmatmul.f32.gmra.mxu3 %v5172_v45  ;;  %v5180_v18 = vand.u32 4294901760, %v4099_v8  ;;  %v5183_v8 = vand.u32 4294901760, %v4179_v22 }
  0xe6   : > { %v4227_v42 = vpop.f32.mrf.mxu0  ;;  %1783 = vmatpush.msrb.mxu3 %v3864_v11  ;;  %1678 = vmatpush.msrb.mxu2 %v5174_v39 }
  0xe7   : > { %1031 = vmatmul.f32.gmra.mxu1 %v3746_v3  ;;  %v5176_v3 = vand.u32 4294901760, %v4017_v31 }
  0xe8   : > { %v4233_v62 = vpop.f32.mrf.mxu2  ;;  %v4235_v25 = vpop.f32.mrf.mxu3  ;;  %1785 = vmatpush.msrb.mxu3 %v3882_v46  ;;  %1682 = vmatpush.msrb.mxu2 %v5175_v57 }
  0xe9   : > { %938 = vmatmul.f32.gmra.mxu0 %v3787_v28 }
  0xea   : > { %1787 = vmatpush.msrb.mxu3 %v3902_v32  ;;  %1686 = vmatpush.msrb.mxu2 %v5176_v3 }
  0xec   : > { %v4244_v11 = vpop.f32.mrf.mxu1  ;;  %1789 = vmatpush.msrb.mxu3 %v3922_v38  ;;  %1690 = vmatpush.msrb.mxu2 %v5178_v23  ;;  %v5179_v38 = vand.u32 4294901760, %v4071_v40 }
  0xed   : > { %809 = vmatmul.f32.gmra.mxu3 %v5177_v50  ;;  %v505_v50 = vadd.f32 %v4119_v47, %v4101_v35 }
  0xee   : > { %v879_v46 = vpop.f32.mrf.mxu0  ;;  %1791 = vmatpush.msrb.mxu3 %v3949_v16  ;;  %1694 = vmatpush.msrb.mxu2 %v5179_v38  ;;  %v5181_v16 = vand.u32 4294901760, %v4127_v12 }
  0xef   : > { %1035 = vmatmul.f32.gmra.mxu1 %v3787_v28  ;;  %v493_v28 = vadd.f32 %v4035_v19, %v4019_v2 }
  0xf0   : > { %v4255_v32 = vpop.f32.mrf.mxu3  ;;  %v606_v54 = vpop.f32.mrf.mxu2  ;;  %1793 = vmatpush.msrb.mxu3 %v3969_v10  ;;  %1698 = vmatpush.msrb.mxu2 %v5180_v18  ;;  %v5182_v10 = vand.u32 4294901760, %v4151_v51  ;;  %v497_v51 = vadd.f32 %v4063_v52, %v4045_v29  ;;  %v501_v52 = vadd.f32 %v4091_v27, %v4073_v7 }
  0xf1   : > { %v607_v5 = vadd.f32 %v606_v54, %v493_v28 }
  0xf2   : > { %1795 = vmatpush.msrb.mxu3 %v3989_v24  ;;  %1702 = vmatpush.msrb.mxu2 %v5181_v16 }
  0xf4   : > { %v976_v31 = vpop.f32.mrf.mxu1  ;;  %1797 = vmatpush.msrb.mxu3 %v4009_v41  ;;  %1706 = vmatpush.msrb.mxu2 %v5182_v10 }
  0xf6   : > { %v883_v55 = vpop.f32.mrf.mxu0  ;;  %1799 = vmatpush.msrb.mxu3 %v4033_v36  ;;  %1710 = vmatpush.msrb.mxu2 %v5183_v8 }
  0xf8   : > { %v611_v24 = vpop.f32.mrf.mxu2  ;;  %v720_v40 = vpop.f32.mrf.mxu3  ;;  %1801 = vmatpush.msrb.mxu3 %v4061_v63  ;;  %1714 = vmatpush.msrb.mxu2 %v1324_v21 }
  0xf9   : > { %v721_v41 = vadd.f32 %v720_v40, %v607_v5  ;;  %v612_v34 = vadd.f32 %v611_v24, %v497_v51  ;;  %v509_v40 = vadd.f32 %v4147_v1, %v4129_v60 }
  0xfa   : > { %1803 = vmatpush.msrb.mxu3 %v4089_v56 }
  0xfb   : > { %v880_v12 = vadd.f32 %v879_v46, %v721_v41 }
  0xfc   : > { %v980_v2 = vpop.f32.mrf.mxu1  ;;  %1805 = vmatpush.msrb.mxu3 %v4117_v4 }
  0xfd   : > { %v977_v36 = vadd.f32 %v976_v31, %v880_v12 }
  0xfe   : > { %v887_v19 = vpop.f32.mrf.mxu0  ;;  %1807 = vmatpush.msrb.mxu3 %v4145_v43 }
  0xff   : > { %v1039_v63 = vmul.f32 %v977_v36, %v977_v36 }
 0x100   : > { %v616_v15 = vpop.f32.mrf.mxu2  ;;  %v726_v22 = vpop.f32.mrf.mxu3  ;;  %1809 = vmatpush.msrb.mxu3 %v4163_v37 }
 0x101   : > { %v4280_v33 = vand.u32 4294901760, %v1039_v63  ;;  %v727_v21 = vadd.f32 %v726_v22, %v612_v34  ;;  %v617_v37 = vadd.f32 %v616_v15, %v501_v52 }
 0x102   : > { %1811 = vmatpush.msrb.mxu3 %v4181_v49 }
 0x103   : > { %v1104_v56 = vsub.f32 %v1039_v63, %v4280_v33  ;;  %v884_v4 = vadd.f32 %v883_v55, %v727_v21  ;;  %1329 = vmatmul.f32.vlgmr.msra.gmra.mxu3 %v4280_v33 }
 0x104   : > { %v984_v29 = vpop.f32.mrf.mxu1 }
 0x105   : > { %v1105_v43 = vand.u32 4294901760, %v1104_v56  ;;  %v981_v48 = vadd.f32 %v980_v2, %v884_v4  ;;  %1443 = vmatmul.f32.vlgmr.msra.gmra.mxu0 %v1104_v56 }
 0x106   : > { %v891_v14 = vpop.f32.mrf.mxu0 }
 0x107   : > { %v1106_v20 = vsub.f32 %v1104_v56, %v1105_v43  ;;  %v1040_v26 = vmul.f32 %v981_v48, %v981_v48  ;;  %1557 = vmatmul.f32.vlgmr.msra.gmra.mxu1 %v1105_v43  ;;  %v513_v56 = vadd.f32 %v4194_v13, %v4160_v0 }
 0x108   : > { %v621_v45 = vpop.f32.mrf.mxu2  ;;  %v732_v59 = vpop.f32.mrf.mxu3 }
 0x109   : > { %v1107_v49 = vand.u32 4294901760, %v1106_v20  ;;  %v4287_v39 = vand.u32 4294901760, %v1040_v26  ;;  %v733_v57 = vadd.f32 %v732_v59, %v617_v37  ;;  %v622_v38 = vadd.f32 %v621_v45, %v505_v50 }
 0x10b   : > { %v888_v3 = vadd.f32 %v887_v19, %v733_v57  ;;  %1108 = vmatmul.f32.vlgmr.msra.gmra.mxu2 %v1107_v49  ;;  %1333 = vmatmul.f32.gmra.mxu3 %v4287_v39  ;;  %v1112_v7 = vsub.f32 %v1040_v26, %v4287_v39  ;;  %v517_v57 = vadd.f32 %v4220_v6, %v4204_v53 }
 0x10c   : > { %v988_v27 = vpop.f32.mrf.mxu1 }
 0x10d   : > { %v985_v46 = vadd.f32 %v984_v29, %v888_v3  ;;  %1448 = vmatmul.f32.gmra.mxu0 %v1112_v7  ;;  %v1113_v23 = vand.u32 4294901760, %v1112_v7 }
 0x10e   : > { %v895_v54 = vpop.f32.mrf.mxu0 }
 0x10f   : > { %v1041_v18 = vmul.f32 %v985_v46, %v985_v46  ;;  %1563 = vmatmul.f32.gmra.mxu1 %v1113_v23  ;;  %v1114_v31 = vsub.f32 %v1112_v7, %v1113_v23 }
 0x110   : > { %v626_v16 = vpop.f32.mrf.mxu2  ;;  %v738_v28 = vpop.f32.mrf.mxu3 }
 0x111   : > { %v4293_v55 = vand.u32 4294901760, %v1041_v18  ;;  %v739_v10 = vadd.f32 %v738_v28, %v622_v38  ;;  %v1115_v5 = vand.u32 4294901760, %v1114_v31  ;;  %v627_v2 = vadd.f32 %v626_v16, %v509_v40 }
 0x113   : > { %v892_v24 = vadd.f32 %v891_v14, %v739_v10  ;;  %1116 = vmatmul.f32.gmra.mxu2 %v1115_v5  ;;  %1337 = vmatmul.f32.gmra.mxu3 %v4293_v55  ;;  %v1120_v35 = vsub.f32 %v1041_v18, %v4293_v55  ;;  %v521_v10 = vadd.f32 %v4244_v11, %v4227_v42 }
 0x114   : > { %v992_v47 = vpop.f32.mrf.mxu1 }
 0x115   : > { %v989_v8 = vadd.f32 %v988_v27, %v892_v24  ;;  %1453 = vmatmul.f32.gmra.mxu0 %v1120_v35  ;;  %v1121_v41 = vand.u32 4294901760, %v1120_v35 }
 0x116   : > { %v899_v12 = vpop.f32.mrf.mxu0 }
 0x117   : > { %v1042_v51 = vmul.f32 %v989_v8, %v989_v8  ;;  %1569 = vmatmul.f32.gmra.mxu1 %v1121_v41  ;;  %v1122_v36 = vsub.f32 %v1120_v35, %v1121_v41 }
 0x118   : > { %v631_v19 = vpop.f32.mrf.mxu2  ;;  %v744_v34 = vpop.f32.mrf.mxu3 }
 0x119   : > { %v4299_v63 = vand.u32 4294901760, %v1042_v51  ;;  %v745_v15 = vadd.f32 %v744_v34, %v627_v2  ;;  %v1123_v22 = vand.u32 4294901760, %v1122_v36  ;;  %v632_v43 = vadd.f32 %v631_v19, %v513_v56 }
 0x11a   : > { %v525_v34 = vadd.f32 %v4052_v17, %v4024_v30 }
 0x11b   : > { %v896_v21 = vadd.f32 %v895_v54, %v745_v15  ;;  %1124 = vmatmul.f32.gmra.mxu2 %v1123_v22  ;;  %1341 = vmatmul.f32.gmra.mxu3 %v4299_v63  ;;  %v1128_v60 = vsub.f32 %v1042_v51, %v4299_v63 }
 0x11c   : > { %v996_v1 = vpop.f32.mrf.mxu1 }
 0x11d   : > { %v993_v4 = vadd.f32 %v992_v47, %v896_v21  ;;  %1458 = vmatmul.f32.gmra.mxu0 %v1128_v60  ;;  %v1129_v29 = vand.u32 4294901760, %v1128_v60 }
 0x11e   : > { %v903_v52 = vpop.f32.mrf.mxu0 }
 0x11f   : > { %v1043_v48 = vmul.f32 %v993_v4, %v993_v4  ;;  %1575 = vmatmul.f32.gmra.mxu1 %v1129_v29  ;;  %v1130_v14 = vsub.f32 %v1128_v60, %v1129_v29 }
 0x120   : > { %v636_v20 = vpop.f32.mrf.mxu2  ;;  %v750_v37 = vpop.f32.mrf.mxu3 }
 0x121   : > { %v4305_v26 = vand.u32 4294901760, %v1043_v48  ;;  %v751_v45 = vadd.f32 %v750_v37, %v632_v43  ;;  %v1131_v59 = vand.u32 4294901760, %v1130_v14  ;;  %v637_v50 = vadd.f32 %v636_v20, %v517_v57 }
 0x122   : > { %v529_v20 = vadd.f32 %v4080_v9, %v4050_v44 }
 0x123   : > { %v900_v49 = vadd.f32 %v899_v12, %v751_v45  ;;  %1132 = vmatmul.f32.gmra.mxu2 %v1131_v59  ;;  %1345 = vmatmul.f32.gmra.mxu3 %v4305_v26  ;;  %v1136_v0 = vsub.f32 %v1043_v48, %v4305_v26 }
 0x124   : > { %v1000_v13 = vpop.f32.mrf.mxu1 }
 0x125   : > { %v997_v3 = vadd.f32 %v996_v1, %v900_v49  ;;  %1463 = vmatmul.f32.gmra.mxu0 %v1136_v0  ;;  %v1137_v7 = vand.u32 4294901760, %v1136_v0 }
 0x126   : > { %v907_v27 = vpop.f32.mrf.mxu0 }
 0x127   : > { %v1044_v46 = vmul.f32 %v997_v3, %v997_v3  ;;  %1581 = vmatmul.f32.gmra.mxu1 %v1137_v7  ;;  %v1138_v23 = vsub.f32 %v1136_v0, %v1137_v7 }
 0x128   : > { %v641_v54 = vpop.f32.mrf.mxu2  ;;  %v756_v38 = vpop.f32.mrf.mxu3 }
 0x129   : > { %v4311_v18 = vand.u32 4294901760, %v1044_v46  ;;  %v757_v31 = vadd.f32 %v756_v38, %v637_v50  ;;  %v1139_v16 = vand.u32 4294901760, %v1138_v23  ;;  %v642_v47 = vadd.f32 %v641_v54, %v521_v10  ;;  %v5184_v23 = vld [vmem:[#allocation2_spill] sm:$0xff]  ;;  %v5185_v54 = vld [vmem:[#allocation4_spill] sm:$0xff] }
 0x12a   : > { %v533_v38 = vadd.f32 %v5185_v54, %v5184_v23  ;;  %v5190_v23 = vld [vmem:[#allocation7_spill] sm:$0xff] }
 0x12b   : > { %v904_v28 = vadd.f32 %v903_v52, %v757_v31  ;;  %1140 = vmatmul.f32.gmra.mxu2 %v1139_v16  ;;  %1349 = vmatmul.f32.gmra.mxu3 %v4311_v18  ;;  %v1144_v53 = vsub.f32 %v1044_v46, %v4311_v18  ;;  %v545_v54 = vadd.f32 %v4212_v61, %v5190_v23 }
 0x12c   : > { %v1004_v6 = vpop.f32.mrf.mxu1 }
 0x12d   : > { %v1001_v5 = vadd.f32 %v1000_v13, %v904_v28  ;;  %1468 = vmatmul.f32.gmra.mxu0 %v1144_v53  ;;  %v1145_v24 = vand.u32 4294901760, %v1144_v53 }
 0x12e   : > { %v911_v35 = vpop.f32.mrf.mxu0 }
 0x12f   : > { %v1045_v40 = vmul.f32 %v1001_v5, %v1001_v5  ;;  %1587 = vmatmul.f32.gmra.mxu1 %v1145_v24  ;;  %v1146_v8 = vsub.f32 %v1144_v53, %v1145_v24 }
 0x130   : > { %v646_v41 = vpop.f32.mrf.mxu2  ;;  %v762_v12 = vpop.f32.mrf.mxu3 }
 0x131   : > { %v4317_v2 = vand.u32 4294901760, %v1045_v40  ;;  %v763_v51 = vadd.f32 %v762_v12, %v642_v47  ;;  %v1147_v36 = vand.u32 4294901760, %v1146_v8  ;;  %v647_v60 = vadd.f32 %v646_v41, %v525_v34 }
 0x133   : > { %v908_v19 = vadd.f32 %v907_v27, %v763_v51  ;;  %1148 = vmatmul.f32.gmra.mxu2 %v1147_v36  ;;  %1353 = vmatmul.f32.gmra.mxu3 %v4317_v2  ;;  %v1152_v42 = vsub.f32 %v1045_v40, %v4317_v2  ;;  %v5186_v51 = vld [vmem:[#allocation3_spill] sm:$0xff]  ;;  %v5187_v36 = vld [vmem:[#allocation6_spill] sm:$0xff] }
 0x134   : > { %v1008_v11 = vpop.f32.mrf.mxu1 }
 0x135   : > { %v1005_v15 = vadd.f32 %v1004_v6, %v908_v19  ;;  %1473 = vmatmul.f32.gmra.mxu0 %v1152_v42  ;;  %v1153_v22 = vand.u32 4294901760, %v1152_v42  ;;  %v537_v19 = vadd.f32 %v5187_v36, %v5186_v51 }
 0x136   : > { %v915_v21 = vpop.f32.mrf.mxu0 }
 0x137   : > { %v1046_v1 = vmul.f32 %v1005_v15, %v1005_v15  ;;  %1593 = vmatmul.f32.gmra.mxu1 %v1153_v22  ;;  %v1154_v56 = vsub.f32 %v1152_v42, %v1153_v22 }
 0x138   : > { %v651_v4 = vpop.f32.mrf.mxu2  ;;  %v768_v29 = vpop.f32.mrf.mxu3 }
 0x139   : > { %v4323_v52 = vand.u32 4294901760, %v1046_v1  ;;  %v769_v43 = vadd.f32 %v768_v29, %v647_v60  ;;  %v1155_v48 = vand.u32 4294901760, %v1154_v56  ;;  %v652_v49 = vadd.f32 %v651_v4, %v529_v20 }
 0x13b   : > { %v912_v14 = vadd.f32 %v911_v35, %v769_v43  ;;  %1156 = vmatmul.f32.gmra.mxu2 %v1155_v48  ;;  %1357 = vmatmul.f32.gmra.mxu3 %v4323_v52  ;;  %v1160_v30 = vsub.f32 %v1046_v1, %v4323_v52 }
 0x13c   : > { %v1012_v17 = vpop.f32.mrf.mxu1 }
 0x13d   : > { %v1009_v37 = vadd.f32 %v1008_v11, %v912_v14  ;;  %1478 = vmatmul.f32.gmra.mxu0 %v1160_v30  ;;  %v1161_v45 = vand.u32 4294901760, %v1160_v30 }
 0x13e   : > { %v919_v59 = vpop.f32.mrf.mxu0 }
 0x13f   : > { %v1047_v0 = vmul.f32 %v1009_v37, %v1009_v37  ;;  %1599 = vmatmul.f32.gmra.mxu1 %v1161_v45  ;;  %v1162_v13 = vsub.f32 %v1160_v30, %v1161_v45  ;;  %v5188_v30 = vld [vmem:[#allocation5_spill] sm:$0xff] }
 0x140   : > { %v656_v57 = vpop.f32.mrf.mxu2  ;;  %v774_v3 = vpop.f32.mrf.mxu3 }
 0x141   : > { %v4329_v7 = vand.u32 4294901760, %v1047_v0  ;;  %v775_v27 = vadd.f32 %v774_v3, %v652_v49  ;;  %v1163_v50 = vand.u32 4294901760, %v1162_v13  ;;  %v657_v28 = vadd.f32 %v656_v57, %v533_v38 }
 0x143   : > { %v916_v46 = vadd.f32 %v915_v21, %v775_v27  ;;  %1164 = vmatmul.f32.gmra.mxu2 %v1163_v50  ;;  %1361 = vmatmul.f32.gmra.mxu3 %v4329_v7  ;;  %v1168_v9 = vsub.f32 %v1047_v0, %v4329_v7 }
 0x144   : > { %v1016_v44 = vpop.f32.mrf.mxu1 }
 0x145   : > { %v1013_v31 = vadd.f32 %v1012_v17, %v916_v46  ;;  %1483 = vmatmul.f32.gmra.mxu0 %v1168_v9  ;;  %v1169_v16 = vand.u32 4294901760, %v1168_v9  ;;  %v5189_v17 = vld [vmem:[#allocation8_spill] sm:$0xff] }
 0x146   : > { %v923_v10 = vpop.f32.mrf.mxu0  ;;  %v541_v20 = vadd.f32 %v5189_v17, %v5188_v30 }
 0x147   : > { %v1048_v53 = vmul.f32 %v1013_v31, %v1013_v31  ;;  %1605 = vmatmul.f32.gmra.mxu1 %v1169_v16  ;;  %v1170_v6 = vsub.f32 %v1168_v9, %v1169_v16 }
 0x148   : > { %v661_v5 = vpop.f32.mrf.mxu2  ;;  %v780_v24 = vpop.f32.mrf.mxu3 }
 0x149   : > { %v4335_v35 = vand.u32 4294901760, %v1048_v53  ;;  %v781_v47 = vadd.f32 %v780_v24, %v657_v28  ;;  %v1171_v40 = vand.u32 4294901760, %v1170_v6  ;;  %v662_v34 = vadd.f32 %v661_v5, %v537_v19 }
 0x14b   : > { %v920_v8 = vadd.f32 %v919_v59, %v781_v47  ;;  %1172 = vmatmul.f32.gmra.mxu2 %v1171_v40  ;;  %1365 = vmatmul.f32.gmra.mxu3 %v4335_v35  ;;  %v1176_v41 = vsub.f32 %v1048_v53, %v4335_v35 }
 0x14c   : > { %v1020_v12 = vpop.f32.mrf.mxu1 }
 0x14d   : > { %v1017_v42 = vadd.f32 %v1016_v44, %v920_v8  ;;  %1488 = vmatmul.f32.gmra.mxu0 %v1176_v41  ;;  %v1177_v11 = vand.u32 4294901760, %v1176_v41 }
 0x14e   : > { %v927_v29 = vpop.f32.mrf.mxu0 }
 0x14f   : > { %v1049_v15 = vmul.f32 %v1017_v42, %v1017_v42  ;;  %1611 = vmatmul.f32.gmra.mxu1 %v1177_v11  ;;  %v1178_v22 = vsub.f32 %v1176_v41, %v1177_v11  ;;  %v549_v41 = vadd.f32 %v4235_v25, %v4210_v58 }
 0x150   : > { %v666_v21 = vpop.f32.mrf.mxu2  ;;  %v786_v60 = vpop.f32.mrf.mxu3 }
 0x151   : > { %v4341_v1 = vand.u32 4294901760, %v1049_v15  ;;  %v787_v56 = vadd.f32 %v786_v60, %v662_v34  ;;  %v1179_v4 = vand.u32 4294901760, %v1178_v22  ;;  %v667_v59 = vadd.f32 %v666_v21, %v541_v20 }
 0x153   : > { %v924_v43 = vadd.f32 %v923_v10, %v787_v56  ;;  %1180 = vmatmul.f32.gmra.mxu2 %v1179_v4  ;;  %1369 = vmatmul.f32.gmra.mxu3 %v4341_v1  ;;  %v1184_v48 = vsub.f32 %v1049_v15, %v4341_v1  ;;  %v553_v4 = vadd.f32 %v4255_v32, %v4233_v62 }
 0x154   : > { %v1024_v14 = vpop.f32.mrf.mxu1 }
 0x155   : > { %v1021_v37 = vadd.f32 %v1020_v12, %v924_v43  ;;  %1493 = vmatmul.f32.gmra.mxu0 %v1184_v48  ;;  %v1185_v45 = vand.u32 4294901760, %v1184_v48 }
 0x156   : > { %v931_v44 = vpop.f32.mrf.mxu0 }
 0x157   : > { %v1050_v49 = vmul.f32 %v1021_v37, %v1021_v37  ;;  %1617 = vmatmul.f32.gmra.mxu1 %v1185_v45  ;;  %v1186_v0 = vsub.f32 %v1184_v48, %v1185_v45 }
 0x158   : > { %v671_v13 = vpop.f32.mrf.mxu2  ;;  %v792_v57 = vpop.f32.mrf.mxu3 }
 0x159   : > { %v4347_v3 = vand.u32 4294901760, %v1050_v49  ;;  %v793_v27 = vadd.f32 %v792_v57, %v667_v59  ;;  %v1187_v50 = vand.u32 4294901760, %v1186_v0  ;;  %v672_v28 = vadd.f32 %v671_v13, %v545_v54 }
 0x15b   : > { %v928_v46 = vadd.f32 %v927_v29, %v793_v27  ;;  %1188 = vmatmul.f32.gmra.mxu2 %v1187_v50  ;;  %1373 = vmatmul.f32.gmra.mxu3 %v4347_v3  ;;  %v1192_v9 = vsub.f32 %v1050_v49, %v4347_v3 }
 0x15c   : > { %v1028_v16 = vpop.f32.mrf.mxu1 }
 0x15d   : > { %v1025_v38 = vadd.f32 %v1024_v14, %v928_v46  ;;  %1498 = vmatmul.f32.gmra.mxu0 %v1192_v9  ;;  %v1193_v31 = vand.u32 4294901760, %v1192_v9 }
 0x15e   : > { %v935_v36 = vpop.f32.mrf.mxu0 }
 0x15f   : > { %v1051_v53 = vmul.f32 %v1025_v38, %v1025_v38  ;;  %1623 = vmatmul.f32.gmra.mxu1 %v1193_v31  ;;  %v1194_v6 = vsub.f32 %v1192_v9, %v1193_v31  ;;  %v1940_v31 = vld [vmem:[%s5098_s3 + $0x78] sm:$0xff] }
 0x160   : > { %v798_v10 = vpop.f32.mrf.mxu3  ;;  %v676_v40 = vpop.f32.mrf.mxu2 }
 0x161   : > { %v4353_v5 = vand.u32 4294901760, %v1051_v53  ;;  %v799_v24 = vadd.f32 %v798_v10, %v672_v28  ;;  %v1195_v47 = vand.u32 4294901760, %v1194_v6  ;;  %v677_v19 = vadd.f32 %v676_v40, %v549_v41 }
 0x163   : > { %v932_v8 = vadd.f32 %v931_v44, %v799_v24  ;;  %1196 = vmatmul.f32.gmra.mxu2 %v1195_v47  ;;  %1377 = vmatmul.f32.gmra.mxu3 %v4353_v5  ;;  %v1200_v61 = vsub.f32 %v1051_v53, %v4353_v5  ;;  %v1939_v47 = vld [vmem:[%s5098_s3 + $0x70] sm:$0xff] }
 0x164   : > { %v1032_v15 = vpop.f32.mrf.mxu1 }
 0x165   : > { %v1029_v12 = vadd.f32 %v1028_v16, %v932_v8  ;;  %1503 = vmatmul.f32.gmra.mxu0 %v1200_v61  ;;  %v1201_v51 = vand.u32 4294901760, %v1200_v61  ;;  %v4377_v16 = vand.u32 4294901760, %v1940_v31  ;;  %v4396_v8 = vand.u32 4294901760, %v1939_v47 }
 0x166   : > { %v939_v20 = vpop.f32.mrf.mxu0 }
 0x167   : > { %v1052_v42 = vmul.f32 %v1029_v12, %v1029_v12  ;;  %1629 = vmatmul.f32.gmra.mxu1 %v1201_v51  ;;  %v1202_v11 = vsub.f32 %v1200_v61, %v1201_v51  ;;  %1942 = vmatpush.msrb.mxu0 %v4377_v16  ;;  %v4383_v28 = vsub.f32 %v1940_v31, %v4377_v16 }
 0x168   : > { %v804_v34 = vpop.f32.mrf.mxu3  ;;  %v681_v25 = vpop.f32.mrf.mxu2  ;;  %2393 = vmatpush.msra.mxu3 %v4377_v16  ;;  %v4402_v61 = vsub.f32 %v1939_v47, %v4396_v8 }
 0x169   : > { %v4359_v22 = vand.u32 4294901760, %v1052_v42  ;;  %v805_v21 = vadd.f32 %v804_v34, %v677_v19  ;;  %v1203_v60 = vand.u32 4294901760, %v1202_v11  ;;  %v682_v48 = vadd.f32 %v681_v25, %v553_v4  ;;  %2265 = vmatpush.msra.mxu2 %v4383_v28  ;;  %1944 = vmatpush.msrb.mxu0 %v4396_v8  ;;  %v1938_v19 = vld [vmem:[%s5098_s3 + $0x68] sm:$0xff] }
 0x16a   : > { %v5143_v10 = vand.u32 4294901760, %v4383_v28  ;;  %2395 = vmatpush.msra.mxu3 %v4396_v8  ;;  %v5142_v51 = vand.u32 4294901760, %v4402_v61  ;;  %v4415_v11 = vand.u32 4294901760, %v1938_v19 }
 0x16b   : > { %v936_v56 = vadd.f32 %v935_v36, %v805_v21  ;;  %1204 = vmatmul.f32.gmra.mxu2 %v1203_v60  ;;  %1381 = vmatmul.f32.gmra.mxu3 %v4359_v22  ;;  %v1208_v58 = vsub.f32 %v1052_v42, %v4359_v22 }
 0x16c   : > { %v1036_v49 = vpop.f32.mrf.mxu1  ;;  %2268 = vmatpush.msra.mxu2 %v4402_v61  ;;  %1946 = vmatpush.msrb.mxu0 %v4415_v11  ;;  %v4421_v34 = vsub.f32 %v1938_v19, %v4415_v11 }
 0x16d   : > { %v1033_v29 = vadd.f32 %v1032_v15, %v936_v56  ;;  %1508 = vmatmul.f32.gmra.mxu0 %v1208_v58  ;;  %v1209_v43 = vand.u32 4294901760, %v1208_v58  ;;  %2397 = vmatpush.msra.mxu3 %v4415_v11 }
 0x16e   : > { %v5141_v60 = vand.u32 4294901760, %v4421_v34  ;;  %2271 = vmatpush.msra.mxu2 %v4421_v34 }
 0x16f   : > { %v1053_v14 = vmul.f32 %v1033_v29, %v1033_v29  ;;  %1635 = vmatmul.f32.gmra.mxu1 %v1209_v43  ;;  %v1210_v30 = vsub.f32 %v1208_v58, %v1209_v43  ;;  %v1937_v58 = vld [vmem:[%s5098_s3 + $0x60] sm:$0xff] }
 0x170   : > { %v810_v17 = vpop.f32.mrf.mxu3  ;;  %v4434_v4 = vand.u32 4294901760, %v1937_v58 }
 0x171   : > { %v4365_v37 = vand.u32 4294901760, %v1053_v14  ;;  %v811_v45 = vadd.f32 %v810_v17, %v682_v48  ;;  %v1211_v59 = vand.u32 4294901760, %v1210_v30  ;;  %v1936_v17 = vld [vmem:[%s5098_s3 + $0x58] sm:$0xff] }
 0x172   : > { %1948 = vmatpush.msrb.mxu0 %v4434_v4  ;;  %v4440_v29 = vsub.f32 %v1937_v58, %v4434_v4  ;;  %2399 = vmatpush.msra.mxu3 %v4434_v4 }
 0x173   : > { %v940_v0 = vadd.f32 %v939_v20, %v811_v45  ;;  %1212 = vmatmul.f32.gmra.mxu2 %v1211_v59  ;;  %1385 = vmatmul.f32.gmra.mxu3 %v4365_v37  ;;  %v1216_v62 = vsub.f32 %v1053_v14, %v4365_v37  ;;  %v4453_v45 = vand.u32 4294901760, %v1936_v17 }
 0x174   : > { %v5140_v14 = vand.u32 4294901760, %v4440_v29  ;;  %2274 = vmatpush.msra.mxu2 %v4440_v29 }
 0x175   : > { %v1037_v32 = vadd.f32 %v1036_v49, %v940_v0  ;;  %1513 = vmatmul.f32.gmra.mxu0 %v1216_v62  ;;  %v1217_v13 = vand.u32 4294901760, %v1216_v62  ;;  %v4459_v59 = vsub.f32 %v1936_v17, %v4453_v45  ;;  %2401 = vmatpush.msra.mxu3 %v4453_v45 }
 0x176   : > { %1950 = vmatpush.msrb.mxu0 %v4453_v45 }
 0x177   : > { %v1054_v57 = vmul.f32 %v1037_v32, %v1037_v32  ;;  %1641 = vmatmul.f32.gmra.mxu1 %v1217_v13  ;;  %v1218_v27 = vsub.f32 %v1216_v62, %v1217_v13  ;;  %v5139_v62 = vand.u32 4294901760, %v4459_v59  ;;  %2277 = vmatpush.msra.mxu2 %v4459_v59  ;;  %v1935_v13 = vld [vmem:[%s5098_s3 + $0x50] sm:$0xff] }
 0x179   : > { %v4369_v50 = vand.u32 4294901760, %v1054_v57  ;;  %v1219_v46 = vand.u32 4294901760, %v1218_v27  ;;  %v4472_v27 = vand.u32 4294901760, %v1935_v13 }
 0x17b   : > { %1220 = vmatmul.f32.gmra.mxu2 %v1219_v46  ;;  %1389 = vmatmul.f32.gmra.mxu3 %v4369_v50  ;;  %v1224_v9 = vsub.f32 %v1054_v57, %v4369_v50  ;;  %v4478_v46 = vsub.f32 %v1935_v13, %v4472_v27 }
 0x17c   : > { %1952 = vmatpush.msrb.mxu0 %v4472_v27  ;;  %2403 = vmatpush.msra.mxu3 %v4472_v27 }
 0x17d   : > { %1518 = vmatmul.f32.gmra.mxu0 %v1224_v9  ;;  %v1225_v44 = vand.u32 4294901760, %v1224_v9  ;;  %2280 = vmatpush.msra.mxu2 %v4478_v46 }
 0x17f   : > { %1647 = vmatmul.f32.gmra.mxu1 %v1225_v44  ;;  %v1226_v23 = vsub.f32 %v1224_v9, %v1225_v44 }
 0x181   : > { %v1227_v54 = vand.u32 4294901760, %v1226_v23  ;;  %v5138_v23 = vand.u32 4294901760, %v4478_v46 }
 0x183   : > { %1228 = vmatmul.f32.gmra.mxu2 %v1227_v54  ;;  %1813 = vmatmul.f32.vlgmr.msrb.gmra.mxu3 %v4280_v33 }
 0x186   : > { %v1330_v38 = vpop.f32.mrf.mxu3 }
 0x18b   : > { %1716 = vmatmul.f32.vlgmr.msrb.gmra.mxu2 %v4280_v33  ;;  %1817 = vmatmul.f32.gmra.mxu3 %v4287_v39  ;;  %v2105_v33 = vsub.f32 %v4383_v28, %v5143_v10 }
 0x18d   : > { %v2106_v40 = vand.u32 4294901760, %v2105_v33 }
 0x18e   : > { %v1109_v53 = vpop.f32.mrf.mxu2  ;;  %v1334_v6 = vpop.f32.mrf.mxu3 }
 0x18f   : > { %v4388_v24 = vadd.f32 %v1330_v38, %v1109_v53  ;;  %2107 = vmatpush.msrb.mxu1 %v2106_v40  ;;  %v1934_v38 = vld [vmem:[%s5098_s3 + $0x48] sm:$0xff] }
 0x190   : > { %v4491_v53 = vand.u32 4294901760, %v1934_v38 }
 0x192   : > { %1954 = vmatpush.msrb.mxu0 %v4491_v53  ;;  %2405 = vmatpush.msra.mxu3 %v4491_v53 }
 0x193   : > { %1720 = vmatmul.f32.gmra.mxu2 %v4287_v39  ;;  %1821 = vmatmul.f32.gmra.mxu3 %v4293_v55  ;;  %v2111_v39 = vsub.f32 %v4402_v61, %v5142_v51 }
 0x195   : > { %v2112_v42 = vand.u32 4294901760, %v2111_v39 }
 0x196   : > { %v1117_v41 = vpop.f32.mrf.mxu2  ;;  %v1338_v12 = vpop.f32.mrf.mxu3 }
 0x197   : > { %v4407_v36 = vadd.f32 %v1334_v6, %v1117_v41  ;;  %2113 = vmatpush.msrb.mxu1 %v2112_v42  ;;  %v4497_v6 = vsub.f32 %v1934_v38, %v4491_v53  ;;  %v1930_v38 = vld [vmem:[%s5098_s3 + $0x28] sm:$0xff] }
 0x199   : > { %v5136_v40 = vand.u32 4294901760, %v4497_v6  ;;  %2283 = vmatpush.msra.mxu2 %v4497_v6 }
 0x19b   : > { %1724 = vmatmul.f32.gmra.mxu2 %v4293_v55  ;;  %1825 = vmatmul.f32.gmra.mxu3 %v4299_v63  ;;  %v2117_v55 = vsub.f32 %v4421_v34, %v5141_v60 }
 0x19d   : > { %v2118_v25 = vand.u32 4294901760, %v2117_v55 }
 0x19e   : > { %v1125_v15 = vpop.f32.mrf.mxu2  ;;  %v1342_v21 = vpop.f32.mrf.mxu3 }
 0x19f   : > { %v4426_v56 = vadd.f32 %v1338_v12, %v1125_v15  ;;  %2119 = vmatpush.msrb.mxu1 %v2118_v25  ;;  %v1933_v12 = vld [vmem:[%s5098_s3 + $0x40] sm:$0xff]  ;;  %v1932_v25 = vld [vmem:[%s5098_s3 + $0x38] sm:$0xff] }
 0x1a0   : > { %v4510_v19 = vand.u32 4294901760, %v1933_v12 }
 0x1a2   : > { %1956 = vmatpush.msrb.mxu0 %v4510_v19  ;;  %v4516_v42 = vsub.f32 %v1933_v12, %v4510_v19  ;;  %2407 = vmatpush.msra.mxu3 %v4510_v19 }
 0x1a3   : > { %1728 = vmatmul.f32.gmra.mxu2 %v4299_v63  ;;  %1829 = vmatmul.f32.gmra.mxu3 %v4305_v26  ;;  %v2123_v63 = vsub.f32 %v4440_v29, %v5140_v14 }
 0x1a4   : > { %v5135_v55 = vand.u32 4294901760, %v4516_v42  ;;  %2286 = vmatpush.msra.mxu2 %v4516_v42 }
 0x1a5   : > { %v2124_v20 = vand.u32 4294901760, %v2123_v63 }
 0x1a6   : > { %v1133_v43 = vpop.f32.mrf.mxu2  ;;  %v1346_v48 = vpop.f32.mrf.mxu3 }
 0x1a7   : > { %v4445_v30 = vadd.f32 %v1342_v21, %v1133_v43  ;;  %2125 = vmatpush.msrb.mxu1 %v2124_v20 }
 0x1ab   : > { %1732 = vmatmul.f32.gmra.mxu2 %v4305_v26  ;;  %1833 = vmatmul.f32.gmra.mxu3 %v4311_v18  ;;  %v2129_v26 = vsub.f32 %v4459_v59, %v5139_v62 }
 0x1ad   : > { %v2130_v57 = vand.u32 4294901760, %v2129_v26 }
 0x1ae   : > { %v1141_v49 = vpop.f32.mrf.mxu2  ;;  %v1350_v0 = vpop.f32.mrf.mxu3 }
 0x1af   : > { %v4464_v32 = vadd.f32 %v1346_v48, %v1141_v49  ;;  %2131 = vmatpush.msrb.mxu1 %v2130_v57  ;;  %v4531_v48 = vand.u32 4294901760, %v1932_v25 }
 0x1b1   : > { %1958 = vmatpush.msrb.mxu0 %v4531_v48  ;;  %v4537_v63 = vsub.f32 %v1932_v25, %v4531_v48  ;;  %2409 = vmatpush.msra.mxu3 %v4531_v48 }
 0x1b3   : > { %1736 = vmatmul.f32.gmra.mxu2 %v4311_v18  ;;  %1837 = vmatmul.f32.gmra.mxu3 %v4317_v2  ;;  %v2135_v18 = vsub.f32 %v4478_v46, %v5138_v23  ;;  %v5134_v49 = vand.u32 4294901760, %v4537_v63 }
 0x1b4   : > { %2289 = vmatpush.msra.mxu2 %v4537_v63 }
 0x1b5   : > { %v2136_v31 = vand.u32 4294901760, %v2135_v18 }
 0x1b6   : > { %v1149_v9 = vpop.f32.mrf.mxu2  ;;  %v1354_v44 = vpop.f32.mrf.mxu3 }
 0x1b7   : > { %v4483_v54 = vadd.f32 %v1350_v0, %v1149_v9  ;;  %2137 = vmatpush.msrb.mxu1 %v2136_v31  ;;  %v1931_v0 = vld [vmem:[%s5098_s3 + $0x30] sm:$0xff] }
 0x1b8   : > { %v4552_v13 = vand.u32 4294901760, %v1931_v0 }
 0x1ba   : > { %1960 = vmatpush.msrb.mxu0 %v4552_v13  ;;  %v4558_v57 = vsub.f32 %v1931_v0, %v4552_v13  ;;  %2411 = vmatpush.msra.mxu3 %v4552_v13 }
 0x1bb   : > { %1740 = vmatmul.f32.gmra.mxu2 %v4317_v2  ;;  %1841 = vmatmul.f32.gmra.mxu3 %v4323_v52  ;;  %v2141_v2 = vsub.f32 %v4497_v6, %v5136_v40 }
 0x1bc   : > { %v5133_v18 = vand.u32 4294901760, %v4558_v57  ;;  %2292 = vmatpush.msra.mxu2 %v4558_v57 }
 0x1bd   : > { %v2142_v39 = vand.u32 4294901760, %v2141_v2 }
 0x1be   : > { %v1157_v33 = vpop.f32.mrf.mxu2  ;;  %v1358_v47 = vpop.f32.mrf.mxu3 }
 0x1bf   : > { %v4502_v41 = vadd.f32 %v1354_v44, %v1157_v33  ;;  %2143 = vmatpush.msrb.mxu1 %v2142_v39  ;;  %v4573_v33 = vand.u32 4294901760, %v1930_v38 }
 0x1c1   : > { %1962 = vmatpush.msrb.mxu0 %v4573_v33  ;;  %2413 = vmatpush.msra.mxu3 %v4573_v33 }
 0x1c3   : > { %1744 = vmatmul.f32.gmra.mxu2 %v4323_v52  ;;  %1845 = vmatmul.f32.gmra.mxu3 %v4329_v7  ;;  %v2147_v52 = vsub.f32 %v4516_v42, %v5135_v55 }
 0x1c5   : > { %v2148_v43 = vand.u32 4294901760, %v2147_v52 }
 0x1c6   : > { %v1165_v15 = vpop.f32.mrf.mxu2  ;;  %v4519_v21 = vpop.f32.mrf.mxu3 }
 0x1c7   : > { %v4523_v58 = vadd.f32 %v1358_v47, %v1165_v15  ;;  %2149 = vmatpush.msrb.mxu1 %v2148_v43  ;;  %v4579_v47 = vsub.f32 %v1930_v38, %v4573_v33  ;;  %v1929_v15 = vld [vmem:[%s5098_s3 + $0x20] sm:$0xff]  ;;  %v1928_v38 = vld [vmem:[%s5098_s3 + $0x18] sm:$0xff] }
 0x1c8   : > { %v4594_v25 = vand.u32 4294901760, %v1929_v15 }
 0x1c9   : > { %v5132_v39 = vand.u32 4294901760, %v4579_v47  ;;  %2295 = vmatpush.msra.mxu2 %v4579_v47 }
 0x1ca   : > { %1964 = vmatpush.msrb.mxu0 %v4594_v25  ;;  %v4600_v43 = vsub.f32 %v1929_v15, %v4594_v25  ;;  %2415 = vmatpush.msra.mxu3 %v4594_v25 }
 0x1cb   : > { %1748 = vmatmul.f32.gmra.mxu2 %v4329_v7  ;;  %1849 = vmatmul.f32.gmra.mxu3 %v4335_v35  ;;  %v2153_v7 = vsub.f32 %v4537_v63, %v5134_v49  ;;  %v1926_v49 = vld [vmem:[%s5098_s3 + $0x8] sm:$0xff] }
 0x1cc   : > { %2298 = vmatpush.msra.mxu2 %v4600_v43 }
 0x1cd   : > { %v2154_v26 = vand.u32 4294901760, %v2153_v7 }
 0x1ce   : > { %v4540_v17 = vpop.f32.mrf.mxu2  ;;  %v4542_v20 = vpop.f32.mrf.mxu3 }
 0x1cf   : > { %2155 = vmatpush.msrb.mxu1 %v2154_v26  ;;  %v5131_v26 = vand.u32 4294901760, %v4600_v43 }
 0x1d3   : > { %1752 = vmatmul.f32.gmra.mxu2 %v4335_v35  ;;  %1853 = vmatmul.f32.gmra.mxu3 %v4341_v1  ;;  %v2159_v35 = vsub.f32 %v4558_v57, %v5133_v18 }
 0x1d5   : > { %v2160_v31 = vand.u32 4294901760, %v2159_v35  ;;  %v4612_v35 = vpop.f32.mrf.mxu0 }
 0x1d6   : > { %v4561_v9 = vpop.f32.mrf.mxu2  ;;  %v4563_v44 = vpop.f32.mrf.mxu3 }
 0x1d7   : > { %2161 = vmatpush.msrb.mxu1 %v2160_v31 }
 0x1db   : > { %1756 = vmatmul.f32.gmra.mxu2 %v4341_v1  ;;  %1857 = vmatmul.f32.gmra.mxu3 %v4347_v3  ;;  %v2165_v1 = vsub.f32 %v4579_v47, %v5132_v39 }
 0x1dd   : > { %v2166_v52 = vand.u32 4294901760, %v2165_v1  ;;  %v4617_v1 = vand.u32 4294901760, %v1928_v38  ;;  %v4645_v55 = vpop.f32.mrf.mxu0 }
 0x1de   : > { %v4582_v2 = vpop.f32.mrf.mxu2  ;;  %v4584_v12 = vpop.f32.mrf.mxu3 }
 0x1df   : > { %5191 = vst [vmem:[#allocation2_spill] sm:$0xff] %v4584_v12  ;;  %2167 = vmatpush.msrb.mxu1 %v2166_v52  ;;  %1966 = vmatpush.msrb.mxu0 %v4617_v1  ;;  %v4623_v15 = vsub.f32 %v1928_v38, %v4617_v1  ;;  %v4625_v52 = vpop.f32.mrf.mxu1  ;;  %v1927_v38 = vld [vmem:[%s5098_s3 + $0x10] sm:$0xff] }
 0x1e0   : > { %2417 = vmatpush.msra.mxu3 %v4617_v1 }
 0x1e1   : > { %2301 = vmatpush.msra.mxu2 %v4623_v15 }
 0x1e3   : > { %1760 = vmatmul.f32.gmra.mxu2 %v4347_v3  ;;  %1861 = vmatmul.f32.gmra.mxu3 %v4353_v5  ;;  %v2171_v3 = vsub.f32 %v4600_v43, %v5131_v26 }
 0x1e5   : > { %v2172_v31 = vand.u32 4294901760, %v2171_v3  ;;  %v5137_v3 = vand.u32 4294901760, %v4623_v15 }
 0x1e6   : > { %v4603_v7 = vpop.f32.mrf.mxu2  ;;  %v4605_v0 = vpop.f32.mrf.mxu3 }
 0x1e7   : > { %5192 = vst [vmem:[#allocation4_spill] sm:$0xff] %v4605_v0  ;;  %2173 = vmatpush.msrb.mxu1 %v2172_v31  ;;  %v4640_v31 = vand.u32 4294901760, %v1927_v38  ;;  %v4671_v14 = vpop.f32.mrf.mxu1 }
 0x1e9   : > { %v4650_v40 = vsub.f32 %v1927_v38, %v4640_v31  ;;  %1968 = vmatpush.msrb.mxu0 %v4640_v31  ;;  %2419 = vmatpush.msra.mxu3 %v4640_v31 }
 0x1eb   : > { %1764 = vmatmul.f32.gmra.mxu2 %v4353_v5  ;;  %1865 = vmatmul.f32.gmra.mxu3 %v4359_v22  ;;  %v2177_v5 = vsub.f32 %v4623_v15, %v5137_v3  ;;  %v4652_v3 = vand.u32 4294901760, %v1926_v49  ;;  %v5144_v23 = vand.u32 4294901760, %v4650_v40 }
 0x1ec   : > { %2304 = vmatpush.msra.mxu2 %v4650_v40 }
 0x1ed   : > { %v2178_v18 = vand.u32 4294901760, %v2177_v5  ;;  %v1925_v5 = vld [vmem:[%s5098_s3] sm:$0xff]  ;;  %v4660_v62 = vsub.f32 %v1926_v49, %v4652_v3  ;;  %1970 = vmatpush.msrb.mxu0 %v4652_v3  ;;  %v2183_v60 = vsub.f32 %v4650_v40, %v5144_v23  ;;  %2421 = vmatpush.msra.mxu3 %v4652_v3 }
 0x1ee   : > { %v4628_v26 = vpop.f32.mrf.mxu2  ;;  %v4630_v39 = vpop.f32.mrf.mxu3 }
 0x1ef   : > { %5193 = vst [vmem:[#allocation3_spill] sm:$0xff] %v4628_v26  ;;  %2179 = vmatpush.msrb.mxu1 %v2178_v18  ;;  %v5145_v49 = vand.u32 4294901760, %v4660_v62  ;;  %2307 = vmatpush.msra.mxu2 %v4660_v62  ;;  %v2184_v10 = vand.u32 4294901760, %v2183_v60 }
 0x1f0   : > { %5194 = vst [vmem:[#allocation6_spill] sm:$0xff] %v4630_v39 }
 0x1f1   : > { %2185 = vmatpush.msrb.mxu1 %v2184_v10  ;;  %v5201_v10 = vand.u32 4294901760, %v4459_v59  ;;  %v5206_v59 = vand.u32 4294901760, %v4558_v57 }
 0x1f3   : > { %1768 = vmatmul.f32.gmra.mxu2 %v4359_v22  ;;  %1869 = vmatmul.f32.gmra.mxu3 %v4365_v37  ;;  %v4663_v22 = vand.u32 4294901760, %v1925_v5 }
 0x1f5   : > { %v4678_v51 = vsub.f32 %v1925_v5, %v4663_v22  ;;  %1972 = vmatpush.msrb.mxu0 %v4663_v22  ;;  %2423 = vmatpush.msra.mxu3 %v4663_v22  ;;  %v5197_v5 = vand.u32 4294901760, %v4383_v28  ;;  %v5199_v28 = vand.u32 4294901760, %v4421_v34 }
 0x1f6   : > { %v4666_v38 = vpop.f32.mrf.mxu2  ;;  %v4668_v18 = vpop.f32.mrf.mxu3 }
 0x1f7   : > { %5195 = vst [vmem:[#allocation5_spill] sm:$0xff] %v4666_v38  ;;  %v2194_v39 = vand.u32 4294901760, %v4678_v51  ;;  %2310 = vmatpush.msra.mxu2 %v4678_v51  ;;  %2524 = vmatpush.msra.mxu0 %v5197_v5  ;;  %v5198_v38 = vand.u32 4294901760, %v4402_v61  ;;  %v5202_v61 = vand.u32 4294901760, %v4478_v46 }
 0x1f8   : > { %5196 = vst [vmem:[#allocation8_spill] sm:$0xff] %v4668_v18  ;;  %v2189_v18 = vsub.f32 %v4660_v62, %v5145_v49  ;;  %v1454_v49 = vpop.f32.mrf.mxu0 }
 0x1f9   : > { %v2195_v60 = vsub.f32 %v4678_v51, %v2194_v39  ;;  %2528 = vmatpush.msra.mxu0 %v5198_v38 }
 0x1fa   : > { %v2190_v23 = vand.u32 4294901760, %v2189_v18  ;;  %v1570_v18 = vpop.f32.mrf.mxu1 }
 0x1fb   : > { %1772 = vmatmul.f32.gmra.mxu2 %v4365_v37  ;;  %1873 = vmatmul.f32.gmra.mxu3 %v4369_v50  ;;  %v2196_v0 = vand.u32 4294901760, %v2195_v60  ;;  %v5200_v37 = vand.u32 4294901760, %v4440_v29  ;;  %v5203_v29 = vand.u32 4294901760, %v4497_v6 }
 0x1fc   : > { %2191 = vmatpush.msrb.mxu1 %v2190_v23  ;;  %2532 = vmatpush.msra.mxu0 %v5199_v28 }
 0x1fe   : > { %v4696_v26 = vpop.f32.mrf.mxu2  ;;  %v4698_v12 = vpop.f32.mrf.mxu3  ;;  %2197 = vmatpush.msrb.mxu1 %v2196_v0  ;;  %2536 = vmatpush.msra.mxu0 %v5200_v37 }
 0x200   : > { %2651 = vmatpush.msra.mxu1 %v4377_v16  ;;  %2540 = vmatpush.msra.mxu0 %v5201_v10  ;;  %v1459_v23 = vpop.f32.mrf.mxu0  ;;  %v5204_v16 = vand.u32 4294901760, %v4516_v42  ;;  %v5207_v42 = vand.u32 4294901760, %v4579_v47  ;;  %v5210_v47 = vand.u32 4294901760, %v4650_v40 }
 0x202   : > { %2653 = vmatpush.msra.mxu1 %v4396_v8  ;;  %2544 = vmatpush.msra.mxu0 %v5202_v61  ;;  %v5205_v8 = vand.u32 4294901760, %v4537_v63 }
 0x203   : > { %1776 = vmatmul.f32.gmra.mxu2 %v4369_v50  ;;  %v1445_v50 = vadd.f32 %v4612_v35, %v4388_v24  ;;  %v5211_v35 = vand.u32 4294901760, %v4660_v62 }
 0x204   : > { %2655 = vmatpush.msra.mxu1 %v4415_v11  ;;  %2548 = vmatpush.msra.mxu0 %v5203_v29  ;;  %v1576_v11 = vpop.f32.mrf.mxu1 }
 0x205   : > { %v1559_v46 = vadd.f32 %v4625_v52, %v1445_v50 }
 0x206   : > { %v4712_v51 = vpop.f32.mrf.mxu2  ;;  %v1814_v34 = vpop.f32.mrf.mxu3  ;;  %2657 = vmatpush.msra.mxu1 %v4434_v4  ;;  %2552 = vmatpush.msra.mxu0 %v5204_v16 }
 0x208   : > { %2659 = vmatpush.msra.mxu1 %v4453_v45  ;;  %2556 = vmatpush.msra.mxu0 %v5205_v8  ;;  %v5208_v45 = vand.u32 4294901760, %v4600_v43  ;;  %v1464_v63 = vpop.f32.mrf.mxu0 }
 0x20a   : > { %2661 = vmatpush.msra.mxu1 %v4472_v27  ;;  %2560 = vmatpush.msra.mxu0 %v5206_v59  ;;  %v1450_v27 = vadd.f32 %v4645_v55, %v4407_v36 }
 0x20c   : > { %2663 = vmatpush.msra.mxu1 %v4491_v53  ;;  %2564 = vmatpush.msra.mxu0 %v5207_v42  ;;  %v5209_v53 = vand.u32 4294901760, %v4623_v15  ;;  %v1565_v43 = vadd.f32 %v4671_v14, %v1450_v27 }
 0x20e   : > { %v1717_v4 = vpop.f32.mrf.mxu2  ;;  %v1818_v6 = vpop.f32.mrf.mxu3  ;;  %2665 = vmatpush.msra.mxu1 %v4510_v19  ;;  %2568 = vmatpush.msra.mxu0 %v5208_v45 }
 0x20f   : > { %v1718_v24 = vadd.f32 %v1717_v4, %v1559_v46  ;;  %v1582_v19 = vpop.f32.mrf.mxu1 }
 0x210   : > { %2667 = vmatpush.msra.mxu1 %v4531_v48  ;;  %2572 = vmatpush.msra.mxu0 %v5209_v53  ;;  %v1469_v52 = vpop.f32.mrf.mxu0 }
 0x211   : > { %v1815_v57 = vadd.f32 %v1814_v34, %v1718_v24 }
 0x212   : > { %2669 = vmatpush.msra.mxu1 %v4552_v13  ;;  %2576 = vmatpush.msra.mxu0 %v5210_v47  ;;  %v1455_v13 = vadd.f32 %v1454_v49, %v4426_v56 }
 0x213   : > { %v1877_v0 = vmax.f32 %v1815_v57, 1e-06 }
 0x214   : > { %2671 = vmatpush.msra.mxu1 %v4573_v33  ;;  %2580 = vmatpush.msra.mxu0 %v5211_v35  ;;  %v1571_v33 = vadd.f32 %v1570_v18, %v1455_v13 }
 0x215   : > { %3222 = vlog2.f32 %v1877_v0 }
 0x216   : > { %v1721_v36 = vpop.f32.mrf.mxu2  ;;  %v1822_v55 = vpop.f32.mrf.mxu3  ;;  %2673 = vmatpush.msra.mxu1 %v4594_v25  ;;  %2584 = vmatpush.msra.mxu0 %v2194_v39 }
 0x217   : > { %v1722_v48 = vadd.f32 %v1721_v36, %v1565_v43  ;;  %v1588_v39 = vpop.f32.mrf.mxu1 }
 0x218   : > { %2675 = vmatpush.msra.mxu1 %v4617_v1  ;;  %v1460_v1 = vadd.f32 %v1459_v23, %v4445_v30  ;;  %v1474_v10 = vpop.f32.mrf.mxu0  ;;  %v1465_v23 = vadd.f32 %v1464_v63, %v4464_v32  ;;  %v1470_v63 = vadd.f32 %v1469_v52, %v4483_v54 }
 0x219   : > { %v1819_v15 = vadd.f32 %v1818_v6, %v1722_v48  ;;  %v1475_v52 = vadd.f32 %v1474_v10, %v4502_v41 }
 0x21a   : > { %2677 = vmatpush.msra.mxu1 %v4640_v31  ;;  %v1577_v61 = vadd.f32 %v1576_v11, %v1460_v1  ;;  %v1583_v24 = vadd.f32 %v1582_v19, %v1465_v23 }
 0x21b   : > { %v3223_v40 = vpop.eup %3222  ;;  %v1878_v38 = vmax.f32 %v1819_v15, 1e-06  ;;  %v1589_v15 = vadd.f32 %v1588_v39, %v1470_v63 }
 0x21c   : > { %v1894_v14 = vmul.f32 0.6931472, %v3223_v40  ;;  %2679 = vmatpush.msra.mxu1 %v4652_v3 }
 0x21d   : > { %3224 = vlog2.f32 %v1878_v38 }
 0x21e   : > { %v4751_v62 = vand.u32 4294901760, %v1894_v14  ;;  %v1725_v5 = vpop.f32.mrf.mxu2  ;;  %v1826_v25 = vpop.f32.mrf.mxu3  ;;  %2681 = vmatpush.msra.mxu1 %v4663_v22 }
 0x21f   : > { %v1726_v60 = vadd.f32 %v1725_v5, %v1571_v33  ;;  %v1594_v8 = vpop.f32.mrf.mxu1 }
 0x220   : > { %v1974_v56 = vsub.f32 %v1894_v14, %v4751_v62  ;;  %2199 = vmatmul.f32.vlgmr.msrb.gmra.mxu1 %v4751_v62  ;;  %v1479_v0 = vpop.f32.mrf.mxu0 }
 0x221   : > { %v1823_v31 = vadd.f32 %v1822_v55, %v1726_v60  ;;  %v1480_v10 = vadd.f32 %v1479_v0, %v4523_v58 }
 0x222   : > { %2313 = vmatmul.f32.vlgmr.msra.gmra.mxu2 %v1974_v56  ;;  %v1975_v49 = vand.u32 4294901760, %v1974_v56 }
 0x223   : > { %v3225_v28 = vpop.eup %3224  ;;  %v1879_v37 = vmax.f32 %v1823_v31, 1e-06 }
 0x224   : > { %v1896_v3 = vmul.f32 0.6931472, %v3225_v28  ;;  %2427 = vmatmul.f32.vlgmr.msra.gmra.mxu3 %v1975_v49  ;;  %v1976_v18 = vsub.f32 %v1974_v56, %v1975_v49 }
 0x225   : > { %3226 = vlog2.f32 %v1879_v37  ;;  %v1595_v37 = vadd.f32 %v1594_v8, %v1475_v52 }
 0x226   : > { %v1729_v34 = vpop.f32.mrf.mxu2  ;;  %v1830_v29 = vpop.f32.mrf.mxu3  ;;  %v1977_v22 = vand.u32 4294901760, %v1976_v18  ;;  %v4757_v16 = vand.u32 4294901760, %v1896_v3 }
 0x227   : > { %v1730_v50 = vadd.f32 %v1729_v34, %v1577_v61  ;;  %v1600_v35 = vpop.f32.mrf.mxu1 }
 0x228   : > { %1978 = vmatmul.f32.vlgmr.msrb.gmra.mxu0 %v1977_v22  ;;  %2203 = vmatmul.f32.gmra.mxu1 %v4757_v16  ;;  %v1982_v30 = vsub.f32 %v1896_v3, %v4757_v16 }
 0x229   : > { %v1827_v59 = vadd.f32 %v1826_v25, %v1730_v50  ;;  %v1484_v25 = vpop.f32.mrf.mxu0 }
 0x22a   : > { %2318 = vmatmul.f32.gmra.mxu2 %v1982_v30  ;;  %v1983_v46 = vand.u32 4294901760, %v1982_v30 }
 0x22b   : > { %v3227_v4 = vpop.eup %3226  ;;  %v1880_v6 = vmax.f32 %v1827_v59, 1e-06 }
 0x22c   : > { %v1898_v11 = vmul.f32 0.6931472, %v3227_v4  ;;  %2433 = vmatmul.f32.gmra.mxu3 %v1983_v46  ;;  %v1984_v42 = vsub.f32 %v1982_v30, %v1983_v46  ;;  %v1363_v4 = vadd.f32 %v4519_v21, %v4540_v17 }
 0x22d   : > { %3228 = vlog2.f32 %v1880_v6  ;;  %v1601_v6 = vadd.f32 %v1600_v35, %v1480_v10 }
 0x22e   : > { %v1733_v45 = vpop.f32.mrf.mxu2  ;;  %v1834_v27 = vpop.f32.mrf.mxu3  ;;  %v1985_v57 = vand.u32 4294901760, %v1984_v42  ;;  %v4762_v53 = vand.u32 4294901760, %v1898_v11  ;;  %v1485_v0 = vadd.f32 %v1484_v25, %v1363_v4 }
 0x22f   : > { %v1734_v47 = vadd.f32 %v1733_v45, %v1583_v24  ;;  %v1606_v28 = vpop.f32.mrf.mxu1 }
 0x230   : > { %1986 = vmatmul.f32.gmra.mxu0 %v1985_v57  ;;  %2207 = vmatmul.f32.gmra.mxu1 %v4762_v53  ;;  %v1990_v32 = vsub.f32 %v1898_v11, %v4762_v53  ;;  %v1607_v35 = vadd.f32 %v1606_v28, %v1485_v0 }
 0x231   : > { %v1831_v43 = vadd.f32 %v1830_v29, %v1734_v47  ;;  %v1489_v23 = vpop.f32.mrf.mxu0 }
 0x232   : > { %2323 = vmatmul.f32.gmra.mxu2 %v1990_v32  ;;  %v1991_v36 = vand.u32 4294901760, %v1990_v32 }
 0x233   : > { %v3229_v55 = vpop.eup %3228  ;;  %v1881_v19 = vmax.f32 %v1831_v43, 1e-06 }
 0x234   : > { %v1900_v48 = vmul.f32 0.6931472, %v3229_v55  ;;  %2439 = vmatmul.f32.gmra.mxu3 %v1991_v36  ;;  %v1992_v13 = vsub.f32 %v1990_v32, %v1991_v36  ;;  %v1367_v55 = vadd.f32 %v4542_v20, %v4561_v9 }
 0x235   : > { %3230 = vlog2.f32 %v1881_v19 }
 0x236   : > { %v1737_v40 = vpop.f32.mrf.mxu2  ;;  %v1838_v38 = vpop.f32.mrf.mxu3  ;;  %v1993_v14 = vand.u32 4294901760, %v1992_v13  ;;  %v4767_v33 = vand.u32 4294901760, %v1900_v48 }
 0x237   : > { %v1738_v5 = vadd.f32 %v1737_v40, %v1589_v15 }
 0x238   : > { %1994 = vmatmul.f32.gmra.mxu0 %v1993_v14  ;;  %2211 = vmatmul.f32.gmra.mxu1 %v4767_v33  ;;  %v1998_v54 = vsub.f32 %v1900_v48, %v4767_v33  ;;  %v1490_v14 = vadd.f32 %v1489_v23, %v1367_v55 }
 0x239   : > { %v1835_v60 = vadd.f32 %v1834_v27, %v1738_v5  ;;  %v1612_v27 = vpop.f32.mrf.mxu1  ;;  %v1494_v36 = vpop.f32.mrf.mxu0 }
 0x23a   : > { %2328 = vmatmul.f32.gmra.mxu2 %v1998_v54  ;;  %v1999_v56 = vand.u32 4294901760, %v1998_v54 }
 0x23b   : > { %v3231_v1 = vpop.eup %3230  ;;  %v1882_v31 = vmax.f32 %v1835_v60, 1e-06 }
 0x23c   : > { %v1902_v39 = vmul.f32 0.6931472, %v3231_v1  ;;  %2445 = vmatmul.f32.gmra.mxu3 %v1999_v56  ;;  %v2000_v49 = vsub.f32 %v1998_v54, %v1999_v56  ;;  %v1371_v56 = vadd.f32 %v4563_v44, %v4582_v2  ;;  %v1613_v1 = vadd.f32 %v1612_v27, %v1490_v14 }
 0x23d   : > { %3232 = vlog2.f32 %v1882_v31 }
 0x23e   : > { %v1741_v3 = vpop.f32.mrf.mxu2  ;;  %v1842_v18 = vpop.f32.mrf.mxu3  ;;  %v2001_v61 = vand.u32 4294901760, %v2000_v49  ;;  %v4772_v34 = vand.u32 4294901760, %v1902_v39 }
 0x23f   : > { %v1742_v29 = vadd.f32 %v1741_v3, %v1595_v37 }
 0x240   : > { %2002 = vmatmul.f32.gmra.mxu0 %v2001_v61  ;;  %2215 = vmatmul.f32.gmra.mxu1 %v4772_v34  ;;  %v2006_v41 = vsub.f32 %v1902_v39, %v4772_v34  ;;  %v1495_v61 = vadd.f32 %v1494_v36, %v1371_v56  ;;  %v5216_v56 = vld [vmem:[#allocation6_spill] sm:$0xff] }
 0x241   : > { %v1839_v22 = vadd.f32 %v1838_v38, %v1742_v29  ;;  %v1618_v54 = vpop.f32.mrf.mxu1  ;;  %v1499_v3 = vpop.f32.mrf.mxu0 }
 0x242   : > { %2333 = vmatmul.f32.gmra.mxu2 %v2006_v41  ;;  %v2007_v50 = vand.u32 4294901760, %v2006_v41 }
 0x243   : > { %v3233_v30 = vpop.eup %3232  ;;  %v1883_v59 = vmax.f32 %v1839_v22, 1e-06 }
 0x244   : > { %v1904_v8 = vmul.f32 0.6931472, %v3233_v30  ;;  %2451 = vmatmul.f32.gmra.mxu3 %v2007_v50  ;;  %v2008_v46 = vsub.f32 %v2006_v41, %v2007_v50  ;;  %v5212_v30 = vld [vmem:[#allocation2_spill] sm:$0xff] }
 0x245   : > { %3234 = vlog2.f32 %v1883_v59  ;;  %v1375_v23 = vadd.f32 %v5212_v30, %v4603_v7  ;;  %v1619_v59 = vadd.f32 %v1618_v54, %v1495_v61 }
 0x246   : > { %v1745_v11 = vpop.f32.mrf.mxu2  ;;  %v1846_v42 = vpop.f32.mrf.mxu3  ;;  %v2009_v24 = vand.u32 4294901760, %v2008_v46  ;;  %v4779_v45 = vand.u32 4294901760, %v1904_v8 }
 0x247   : > { %v1746_v58 = vadd.f32 %v1745_v11, %v1601_v6 }
 0x248   : > { %2010 = vmatmul.f32.gmra.mxu0 %v2009_v24  ;;  %2219 = vmatmul.f32.gmra.mxu1 %v4779_v45  ;;  %v2014_v57 = vsub.f32 %v1904_v8, %v4779_v45  ;;  %v1500_v24 = vadd.f32 %v1499_v3, %v1375_v23  ;;  %v5217_v23 = vld [vmem:[#allocation8_spill] sm:$0xff] }
 0x249   : > { %v1843_v47 = vadd.f32 %v1842_v18, %v1746_v58  ;;  %v1624_v2 = vpop.f32.mrf.mxu1  ;;  %v1504_v27 = vpop.f32.mrf.mxu0 }
 0x24a   : > { %2338 = vmatmul.f32.gmra.mxu2 %v2014_v57  ;;  %v2015_v32 = vand.u32 4294901760, %v2014_v57 }
 0x24b   : > { %v3235_v63 = vpop.eup %3234  ;;  %v1884_v21 = vmax.f32 %v1843_v47, 1e-06 }
 0x24c   : > { %v1906_v17 = vmul.f32 0.6931472, %v3235_v63  ;;  %2457 = vmatmul.f32.gmra.mxu3 %v2015_v32  ;;  %v2016_v43 = vsub.f32 %v2014_v57, %v2015_v32  ;;  %v5213_v63 = vld [vmem:[#allocation3_spill] sm:$0xff] }
 0x24d   : > { %3236 = vlog2.f32 %v1884_v21  ;;  %v5214_v21 = vld [vmem:[#allocation4_spill] sm:$0xff] }
 0x24e   : > { %v1749_v19 = vpop.f32.mrf.mxu2  ;;  %v1850_v48 = vpop.f32.mrf.mxu3  ;;  %v2017_v13 = vand.u32 4294901760, %v2016_v43  ;;  %v4785_v15 = vand.u32 4294901760, %v1906_v17  ;;  %v1625_v43 = vadd.f32 %v1624_v2, %v1500_v24 }
 0x24f   : > { %v1750_v40 = vadd.f32 %v1749_v19, %v1607_v35 }
 0x250   : > { %2018 = vmatmul.f32.gmra.mxu0 %v2017_v13  ;;  %2223 = vmatmul.f32.gmra.mxu1 %v4785_v15  ;;  %v2022_v38 = vsub.f32 %v1906_v17, %v4785_v15  ;;  %v1379_v17 = vadd.f32 %v5214_v21, %v5213_v63  ;;  %v1391_v21 = vadd.f32 %v4698_v12, %v4712_v51 }
 0x251   : > { %v1847_v5 = vadd.f32 %v1846_v42, %v1750_v40  ;;  %v1630_v36 = vpop.f32.mrf.mxu1 }
 0x252   : > { %2343 = vmatmul.f32.gmra.mxu2 %v2022_v38  ;;  %v2023_v52 = vand.u32 4294901760, %v2022_v38  ;;  %v1505_v40 = vadd.f32 %v1504_v27, %v1379_v17 }
 0x253   : > { %v3237_v25 = vpop.eup %3236  ;;  %v1885_v20 = vmax.f32 %v1847_v5, 1e-06 }
 0x254   : > { %v1908_v9 = vmul.f32 0.6931472, %v3237_v25  ;;  %2463 = vmatmul.f32.gmra.mxu3 %v2023_v52  ;;  %v2024_v60 = vsub.f32 %v2022_v38, %v2023_v52  ;;  %v1509_v25 = vpop.f32.mrf.mxu0 }
 0x255   : > { %3238 = vlog2.f32 %v1885_v20 }
 0x256   : > { %v1753_v31 = vpop.f32.mrf.mxu2  ;;  %v1854_v39 = vpop.f32.mrf.mxu3  ;;  %v2025_v49 = vand.u32 4294901760, %v2024_v60  ;;  %v4791_v28 = vand.u32 4294901760, %v1908_v9  ;;  %v5215_v60 = vld [vmem:[#allocation5_spill] sm:$0xff] }
 0x257   : > { %v1754_v37 = vadd.f32 %v1753_v31, %v1613_v1  ;;  %v1383_v1 = vadd.f32 %v5216_v56, %v5215_v60  ;;  %v1631_v31 = vadd.f32 %v1630_v36, %v1505_v40 }
 0x258   : > { %2026 = vmatmul.f32.gmra.mxu0 %v2025_v49  ;;  %2227 = vmatmul.f32.gmra.mxu1 %v4791_v28  ;;  %v2030_v18 = vsub.f32 %v1908_v9, %v4791_v28 }
 0x259   : > { %v1851_v29 = vadd.f32 %v1850_v48, %v1754_v37 }
 0x25a   : > { %2348 = vmatmul.f32.gmra.mxu2 %v2030_v18  ;;  %v2031_v41 = vand.u32 4294901760, %v2030_v18 }
 0x25b   : > { %v3239_v10 = vpop.eup %3238  ;;  %v1886_v44 = vmax.f32 %v1851_v29, 1e-06  ;;  %v1510_v29 = vadd.f32 %v1509_v25, %v1383_v1 }
 0x25c   : > { %v1910_v22 = vmul.f32 0.6931472, %v3239_v10  ;;  %2469 = vmatmul.f32.gmra.mxu3 %v2031_v41  ;;  %v2032_v50 = vsub.f32 %v2030_v18, %v2031_v41  ;;  %v1636_v18 = vpop.f32.mrf.mxu1 }
 0x25d   : > { %3240 = vlog2.f32 %v1886_v44 }
 0x25e   : > { %v4797_v8 = vand.u32 4294901760, %v1910_v22  ;;  %v1757_v46 = vpop.f32.mrf.mxu2  ;;  %v2033_v4 = vand.u32 4294901760, %v2032_v50  ;;  %v1858_v11 = vpop.f32.mrf.mxu3 }
 0x25f   : > { %v1758_v6 = vadd.f32 %v1757_v46, %v1619_v59  ;;  %v1387_v59 = vadd.f32 %v5217_v23, %v4696_v26  ;;  %v1637_v46 = vadd.f32 %v1636_v18, %v1510_v29 }
 0x260   : > { %2034 = vmatmul.f32.gmra.mxu0 %v2033_v4  ;;  %2231 = vmatmul.f32.gmra.mxu1 %v4797_v8  ;;  %v2038_v42 = vsub.f32 %v1910_v22, %v4797_v8  ;;  %v1514_v4 = vpop.f32.mrf.mxu0 }
 0x261   : > { %v1855_v58 = vadd.f32 %v1854_v39, %v1758_v6  ;;  %v1515_v27 = vadd.f32 %v1514_v4, %v1387_v59 }
 0x262   : > { %2353 = vmatmul.f32.gmra.mxu2 %v2038_v42  ;;  %v2039_v57 = vand.u32 4294901760, %v2038_v42 }
 0x263   : > { %v3241_v0 = vpop.eup %3240  ;;  %v1887_v7 = vmax.f32 %v1855_v58, 1e-06 }
 0x264   : > { %v1912_v47 = vmul.f32 0.6931472, %v3241_v0  ;;  %2475 = vmatmul.f32.gmra.mxu3 %v2039_v57  ;;  %v2040_v32 = vsub.f32 %v2038_v42, %v2039_v57  ;;  %v1642_v0 = vpop.f32.mrf.mxu1 }
 0x265   : > { %3242 = vlog2.f32 %v1887_v7  ;;  %v1643_v17 = vadd.f32 %v1642_v0, %v1515_v27 }
 0x266   : > { %v4803_v55 = vand.u32 4294901760, %v1912_v47  ;;  %v1761_v35 = vpop.f32.mrf.mxu2  ;;  %v2041_v19 = vand.u32 4294901760, %v2040_v32  ;;  %v1862_v14 = vpop.f32.mrf.mxu3 }
 0x267   : > { %v1762_v48 = vadd.f32 %v1761_v35, %v1625_v43 }
 0x268   : > { %2042 = vmatmul.f32.gmra.mxu0 %v2041_v19  ;;  %2235 = vmatmul.f32.gmra.mxu1 %v4803_v55  ;;  %v2046_v13 = vsub.f32 %v1912_v47, %v4803_v55 }
 0x269   : > { %v1859_v38 = vadd.f32 %v1858_v11, %v1762_v48 }
 0x26a   : > { %2358 = vmatmul.f32.gmra.mxu2 %v2046_v13  ;;  %v2047_v5 = vand.u32 4294901760, %v2046_v13 }
 0x26b   : > { %v3243_v54 = vpop.eup %3242  ;;  %v1888_v52 = vmax.f32 %v1859_v38, 1e-06 }
 0x26c   : > { %v1914_v20 = vmul.f32 0.6931472, %v3243_v54  ;;  %2481 = vmatmul.f32.gmra.mxu3 %v2047_v5  ;;  %v2048_v9 = vsub.f32 %v2046_v13, %v2047_v5  ;;  %v1519_v13 = vpop.f32.mrf.mxu0  ;;  %v1648_v51 = vpop.f32.mrf.mxu1 }
 0x26d   : > { %3244 = vlog2.f32 %v1888_v52  ;;  %v1520_v38 = vadd.f32 %v1519_v13, %v1391_v21 }
 0x26e   : > { %v4809_v39 = vand.u32 4294901760, %v1914_v20  ;;  %v1765_v49 = vpop.f32.mrf.mxu2  ;;  %v2049_v37 = vand.u32 4294901760, %v2048_v9  ;;  %v1866_v50 = vpop.f32.mrf.mxu3 }
 0x26f   : > { %v1766_v3 = vadd.f32 %v1765_v49, %v1631_v31 }
 0x270   : > { %2050 = vmatmul.f32.gmra.mxu0 %v2049_v37  ;;  %2239 = vmatmul.f32.gmra.mxu1 %v4809_v39  ;;  %v2054_v61 = vsub.f32 %v1914_v20, %v4809_v39  ;;  %v1649_v20 = vadd.f32 %v1648_v51, %v1520_v38 }
 0x271   : > { %v1863_v41 = vadd.f32 %v1862_v14, %v1766_v3 }
 0x272   : > { %2363 = vmatmul.f32.gmra.mxu2 %v2054_v61  ;;  %v2055_v10 = vand.u32 4294901760, %v2054_v61 }
 0x273   : > { %v3245_v44 = vpop.eup %3244  ;;  %v1889_v2 = vmax.f32 %v1863_v41, 1e-06 }
 0x274   : > { %v1916_v22 = vmul.f32 0.6931472, %v3245_v44  ;;  %2487 = vmatmul.f32.gmra.mxu3 %v2055_v10  ;;  %v2056_v30 = vsub.f32 %v2054_v61, %v2055_v10 }
 0x275   : > { %3246 = vlog2.f32 %v1889_v2 }
 0x276   : > { %v4815_v6 = vand.u32 4294901760, %v1916_v22  ;;  %v1769_v11 = vpop.f32.mrf.mxu2  ;;  %v2057_v42 = vand.u32 4294901760, %v2056_v30  ;;  %v1870_v36 = vpop.f32.mrf.mxu3 }
 0x277   : > { %v1770_v24 = vadd.f32 %v1769_v11, %v1637_v46 }
 0x278   : > { %2058 = vmatmul.f32.gmra.mxu0 %v2057_v42  ;;  %2243 = vmatmul.f32.gmra.mxu1 %v4815_v6  ;;  %v2062_v58 = vsub.f32 %v1916_v22, %v4815_v6 }
 0x279   : > { %v1867_v57 = vadd.f32 %v1866_v50, %v1770_v24 }
 0x27a   : > { %2368 = vmatmul.f32.gmra.mxu2 %v2062_v58  ;;  %v2063_v7 = vand.u32 4294901760, %v2062_v58 }
 0x27b   : > { %v3247_v47 = vpop.eup %3246  ;;  %v1890_v26 = vmax.f32 %v1867_v57, 1e-06 }
 0x27c   : > { %v1918_v32 = vmul.f32 0.6931472, %v3247_v47  ;;  %2493 = vmatmul.f32.gmra.mxu3 %v2063_v7  ;;  %v2064_v63 = vsub.f32 %v2062_v58, %v2063_v7 }
 0x27d   : > { %3248 = vlog2.f32 %v1890_v26 }
 0x27e   : > { %v4821_v43 = vand.u32 4294901760, %v1918_v32  ;;  %v1773_v35 = vpop.f32.mrf.mxu2  ;;  %v2065_v19 = vand.u32 4294901760, %v2064_v63  ;;  %v1874_v31 = vpop.f32.mrf.mxu3 }
 0x27f   : > { %v1774_v48 = vadd.f32 %v1773_v35, %v1643_v17 }
 0x280   : > { %2066 = vmatmul.f32.gmra.mxu0 %v2065_v19  ;;  %2247 = vmatmul.f32.gmra.mxu1 %v4821_v43  ;;  %v2070_v40 = vsub.f32 %v1918_v32, %v4821_v43 }
 0x281   : > { %v1871_v14 = vadd.f32 %v1870_v36, %v1774_v48 }
 0x282   : > { %2373 = vmatmul.f32.gmra.mxu2 %v2070_v40  ;;  %v2071_v5 = vand.u32 4294901760, %v2070_v40 }
 0x283   : > { %v3249_v54 = vpop.eup %3248  ;;  %v1891_v12 = vmax.f32 %v1871_v14, 1e-06 }
 0x284   : > { %v1920_v52 = vmul.f32 0.6931472, %v3249_v54  ;;  %2499 = vmatmul.f32.gmra.mxu3 %v2071_v5  ;;  %v2072_v25 = vsub.f32 %v2070_v40, %v2071_v5 }
 0x285   : > { %3250 = vlog2.f32 %v1891_v12 }
 0x286   : > { %v4825_v9 = vand.u32 4294901760, %v1920_v52  ;;  %v1777_v60 = vpop.f32.mrf.mxu2  ;;  %v2073_v56 = vand.u32 4294901760, %v2072_v25 }
 0x287   : > { %v1778_v1 = vadd.f32 %v1777_v60, %v1649_v20 }
 0x288   : > { %2074 = vmatmul.f32.gmra.mxu0 %v2073_v56  ;;  %2251 = vmatmul.f32.gmra.mxu1 %v4825_v9  ;;  %v2078_v49 = vsub.f32 %v1920_v52, %v4825_v9 }
 0x289   : > { %v1875_v37 = vadd.f32 %v1874_v31, %v1778_v1 }
 0x28a   : > { %2378 = vmatmul.f32.gmra.mxu2 %v2078_v49  ;;  %v2079_v3 = vand.u32 4294901760, %v2078_v49 }
 0x28b   : > { %v3251_v18 = vpop.eup %3250  ;;  %v1892_v61 = vmax.f32 %v1875_v37, 1e-06 }
 0x28c   : > { %v1922_v29 = vmul.f32 0.6931472, %v3251_v18  ;;  %2505 = vmatmul.f32.gmra.mxu3 %v2079_v3  ;;  %v2080_v41 = vsub.f32 %v2078_v49, %v2079_v3 }
 0x28d   : > { %3252 = vlog2.f32 %v1892_v61 }
 0x28e   : > { %v4829_v10 = vand.u32 4294901760, %v1922_v29  ;;  %v2081_v44 = vand.u32 4294901760, %v2080_v41 }
 0x290   : > { %2082 = vmatmul.f32.gmra.mxu0 %v2081_v44  ;;  %2255 = vmatmul.f32.gmra.mxu1 %v4829_v10  ;;  %v2086_v2 = vsub.f32 %v1922_v29, %v4829_v10 }
 0x292   : > { %2383 = vmatmul.f32.gmra.mxu2 %v2086_v2  ;;  %v2087_v22 = vand.u32 4294901760, %v2086_v2 }
 0x293   : > { %v3253_v50 = vpop.eup %3252 }
 0x294   : > { %v1924_v30 = vmul.f32 0.6931472, %v3253_v50  ;;  %2511 = vmatmul.f32.gmra.mxu3 %v2087_v22  ;;  %v2088_v23 = vsub.f32 %v2086_v2, %v2087_v22 }
 0x296   : > { %v4833_v59 = vand.u32 4294901760, %v1924_v30  ;;  %v2089_v46 = vand.u32 4294901760, %v2088_v23 }
 0x298   : > { %2090 = vmatmul.f32.gmra.mxu0 %v2089_v46  ;;  %2259 = vmatmul.f32.gmra.mxu1 %v4833_v59  ;;  %v2094_v4 = vsub.f32 %v1924_v30, %v4833_v59 }
 0x29a   : > { %2388 = vmatmul.f32.gmra.mxu2 %v2094_v4  ;;  %v2095_v11 = vand.u32 4294901760, %v2094_v4 }
 0x29c   : > { %2517 = vmatmul.f32.gmra.mxu3 %v2095_v11  ;;  %v2096_v42 = vsub.f32 %v2094_v4, %v2095_v11 }
 0x29d   : > { %v4837_v24 = vpop.f32.mrf.mxu1 }
 0x29e   : > { %v2097_v58 = vand.u32 4294901760, %v2096_v42 }
 0x2a0   : > { %2098 = vmatmul.f32.gmra.mxu0 %v2097_v58  ;;  %2683 = vmatmul.f32.vlgmr.msra.gmra.mxu1 %v4751_v62 }
 0x2a5   : > { %v4840_v27 = vpop.f32.mrf.mxu0  ;;  %v4842_v57 = vpop.f32.mrf.mxu1 }
 0x2a6   : > { %v2314_v54 = vpop.f32.mrf.mxu2 }
 0x2a8   : > { %2586 = vmatmul.f32.vlgmr.msra.gmra.mxu0 %v4751_v62  ;;  %2687 = vmatmul.f32.gmra.mxu1 %v4757_v16 }
 0x2ad   : > { %v4846_v0 = vpop.f32.mrf.mxu0  ;;  %v4848_v7 = vpop.f32.mrf.mxu1 }
 0x2ae   : > { %v2205_v2 = vadd.f32 %v4842_v57, %v4846_v0 }
 0x2b0   : > { %2590 = vmatmul.f32.gmra.mxu0 %v4757_v16  ;;  %2691 = vmatmul.f32.gmra.mxu1 %v4762_v53 }
 0x2b5   : > { %v4852_v47 = vpop.f32.mrf.mxu0  ;;  %v4854_v26 = vpop.f32.mrf.mxu1 }
 0x2b6   : > { %v2209_v11 = vadd.f32 %v4848_v7, %v4852_v47 }
 0x2b8   : > { %2594 = vmatmul.f32.gmra.mxu0 %v4762_v53  ;;  %2695 = vmatmul.f32.gmra.mxu1 %v4767_v33 }
 0x2bd   : > { %v4858_v32 = vpop.f32.mrf.mxu0  ;;  %v4860_v62 = vpop.f32.mrf.mxu1 }
 0x2c0   : > { %2598 = vmatmul.f32.gmra.mxu0 %v4767_v33  ;;  %2699 = vmatmul.f32.gmra.mxu1 %v4772_v34 }
 0x2c5   : > { %v4864_v63 = vpop.f32.mrf.mxu0  ;;  %v4866_v16 = vpop.f32.mrf.mxu1 }
 0x2c8   : > { %2602 = vmatmul.f32.gmra.mxu0 %v4772_v34  ;;  %2703 = vmatmul.f32.gmra.mxu1 %v4779_v45 }
 0x2cd   : > { %v4870_v21 = vpop.f32.mrf.mxu0  ;;  %v4872_v53 = vpop.f32.mrf.mxu1 }
 0x2d0   : > { %2606 = vmatmul.f32.gmra.mxu0 %v4779_v45  ;;  %2707 = vmatmul.f32.gmra.mxu1 %v4785_v15 }
 0x2d5   : > { %v4876_v17 = vpop.f32.mrf.mxu0  ;;  %v4878_v33 = vpop.f32.mrf.mxu1 }
 0x2d8   : > { %2610 = vmatmul.f32.gmra.mxu0 %v4785_v15  ;;  %2711 = vmatmul.f32.gmra.mxu1 %v4791_v28 }
 0x2dd   : > { %v4882_v36 = vpop.f32.mrf.mxu0  ;;  %v2232_v34 = vpop.f32.mrf.mxu1 }
 0x2e0   : > { %2614 = vmatmul.f32.gmra.mxu0 %v4791_v28  ;;  %2715 = vmatmul.f32.gmra.mxu1 %v4797_v8 }
 0x2e5   : > { %v2043_v35 = vpop.f32.mrf.mxu0  ;;  %v2236_v19 = vpop.f32.mrf.mxu1 }
 0x2e6   : > { %v4886_v45 = vadd.f32 %v2232_v34, %v2043_v35  ;;  %v2213_v35 = vadd.f32 %v4854_v26, %v4858_v32 }
 0x2e8   : > { %2618 = vmatmul.f32.gmra.mxu0 %v4797_v8  ;;  %2719 = vmatmul.f32.gmra.mxu1 %v4803_v55 }
 0x2ed   : > { %v2051_v48 = vpop.f32.mrf.mxu0  ;;  %v2240_v13 = vpop.f32.mrf.mxu1 }
 0x2ee   : > { %v4890_v15 = vadd.f32 %v2236_v19, %v2051_v48 }
 0x2f0   : > { %2622 = vmatmul.f32.gmra.mxu0 %v4803_v55  ;;  %2723 = vmatmul.f32.gmra.mxu1 %v4809_v39  ;;  %v2428_v55 = vpop.f32.mrf.mxu3 }
 0x2f5   : > { %v2059_v40 = vpop.f32.mrf.mxu0  ;;  %v2244_v28 = vpop.f32.mrf.mxu1 }
 0x2f6   : > { %v4894_v38 = vadd.f32 %v2240_v13, %v2059_v40 }
 0x2f8   : > { %2626 = vmatmul.f32.gmra.mxu0 %v4809_v39  ;;  %2727 = vmatmul.f32.gmra.mxu1 %v4815_v6  ;;  %v2319_v39 = vpop.f32.mrf.mxu2  ;;  %v2434_v60 = vpop.f32.mrf.mxu3 }
 0x2f9   : > { %v2320_v30 = vadd.f32 %v2319_v39, %v2205_v2 }
 0x2fb   : > { %v2435_v4 = vadd.f32 %v2434_v60, %v2320_v30 }
 0x2fd   : > { %v2067_v14 = vpop.f32.mrf.mxu0  ;;  %v2248_v8 = vpop.f32.mrf.mxu1 }
 0x2fe   : > { %v4898_v5 = vadd.f32 %v2244_v28, %v2067_v14  ;;  %v2217_v14 = vadd.f32 %v4860_v62, %v4864_v63 }
 0x300   : > { %2630 = vmatmul.f32.gmra.mxu0 %v4815_v6  ;;  %2731 = vmatmul.f32.gmra.mxu1 %v4821_v43  ;;  %v2324_v6 = vpop.f32.mrf.mxu2  ;;  %v2440_v37 = vpop.f32.mrf.mxu3 }
 0x305   : > { %v2075_v12 = vpop.f32.mrf.mxu0  ;;  %v2252_v51 = vpop.f32.mrf.mxu1 }
 0x306   : > { %v4902_v52 = vadd.f32 %v2248_v8, %v2075_v12 }
 0x308   : > { %2634 = vmatmul.f32.gmra.mxu0 %v4821_v43  ;;  %2735 = vmatmul.f32.gmra.mxu1 %v4825_v9  ;;  %v2201_v43 = vadd.f32 %v4837_v24, %v4840_v27  ;;  %v2329_v61 = vpop.f32.mrf.mxu2  ;;  %v2446_v41 = vpop.f32.mrf.mxu3  ;;  %v2325_v27 = vadd.f32 %v2324_v6, %v2209_v11 }
 0x309   : > { %v2330_v28 = vadd.f32 %v2329_v61, %v2213_v35 }
 0x30a   : > { %v2441_v0 = vadd.f32 %v2440_v37, %v2325_v27 }
 0x30b   : > { %v2447_v47 = vadd.f32 %v2446_v41, %v2330_v28 }
 0x30d   : > { %v2083_v25 = vpop.f32.mrf.mxu0  ;;  %v2256_v20 = vpop.f32.mrf.mxu1 }
 0x30e   : > { %v4906_v56 = vadd.f32 %v2252_v51, %v2083_v25  ;;  %v2221_v25 = vadd.f32 %v4866_v16, %v4870_v21 }
 0x310   : > { %2638 = vmatmul.f32.gmra.mxu0 %v4825_v9  ;;  %2739 = vmatmul.f32.gmra.mxu1 %v4829_v10  ;;  %v2315_v9 = vadd.f32 %v2314_v54, %v2201_v43  ;;  %v2334_v23 = vpop.f32.mrf.mxu2  ;;  %v2452_v42 = vpop.f32.mrf.mxu3  ;;  %v2225_v43 = vadd.f32 %v4872_v53, %v4876_v17 }
 0x311   : > { %v2335_v51 = vadd.f32 %v2334_v23, %v2217_v14 }
 0x312   : > { %v2429_v44 = vadd.f32 %v2428_v55, %v2315_v9 }
 0x313   : > { %v2453_v32 = vadd.f32 %v2452_v42, %v2335_v51 }
 0x315   : > { %v2091_v1 = vpop.f32.mrf.mxu0  ;;  %v2260_v31 = vpop.f32.mrf.mxu1 }
 0x316   : > { %v4910_v49 = vadd.f32 %v2256_v20, %v2091_v1 }
 0x318   : > { %2642 = vmatmul.f32.gmra.mxu0 %v4829_v10  ;;  %2743 = vmatmul.f32.gmra.mxu1 %v4833_v59  ;;  %v2339_v57 = vpop.f32.mrf.mxu2  ;;  %v2458_v13 = vpop.f32.mrf.mxu3 }
 0x31d   : > { %v2099_v3 = vpop.f32.mrf.mxu0  ;;  %v2684_v18 = vpop.f32.mrf.mxu1 }
 0x31e   : > { %v4916_v29 = vadd.f32 %v2260_v31, %v2099_v3  ;;  %v2340_v31 = vadd.f32 %v2339_v57, %v2221_v25 }
 0x320   : > { %2646 = vmatmul.f32.gmra.mxu0 %v4833_v59  ;;  %v2344_v8 = vpop.f32.mrf.mxu2  ;;  %v2464_v39 = vpop.f32.mrf.mxu3  ;;  %v2459_v37 = vadd.f32 %v2458_v13, %v2340_v31 }
 0x321   : > { %v2345_v9 = vadd.f32 %v2344_v8, %v2225_v43 }
 0x323   : > { %v2465_v21 = vadd.f32 %v2464_v39, %v2345_v9 }
 0x325   : > { %v2587_v22 = vpop.f32.mrf.mxu0  ;;  %v2688_v10 = vpop.f32.mrf.mxu1 }
 0x326   : > { %v2588_v50 = vadd.f32 %v2587_v22, %v2429_v44  ;;  %v2229_v44 = vadd.f32 %v4878_v33, %v4882_v36 }
 0x328   : > { %v4921_v46 = vadd.f32 %v2684_v18, %v2588_v50  ;;  %v2349_v6 = vpop.f32.mrf.mxu2  ;;  %v2470_v63 = vpop.f32.mrf.mxu3 }
 0x329   : > { %v2350_v30 = vadd.f32 %v2349_v6, %v2229_v44 }
 0x32a   : > { %2747 = vmax.xlane.f32.xlu0 %v4921_v46 }
 0x32b   : > { %v2471_v17 = vadd.f32 %v2470_v63, %v2350_v30 }
 0x32d   : > { %v2591_v59 = vpop.f32.mrf.mxu0  ;;  %v2692_v24 = vpop.f32.mrf.mxu1 }
 0x32e   : > { %v2592_v58 = vadd.f32 %v2591_v59, %v2435_v4 }
 0x330   : > { %v4926_v34 = vadd.f32 %v2688_v10, %v2592_v58  ;;  %v2354_v41 = vpop.f32.mrf.mxu2  ;;  %v2476_v2 = vpop.f32.mrf.mxu3 }
 0x332   : > { %2749 = vmax.xlane.f32.xlu0 %v4926_v34 }
 0x335   : > { %v2595_v19 = vpop.f32.mrf.mxu0  ;;  %v2696_v48 = vpop.f32.mrf.mxu1 }
 0x336   : > { %v2596_v40 = vadd.f32 %v2595_v19, %v2441_v0 }
 0x338   : > { %v4931_v7 = vadd.f32 %v2692_v24, %v2596_v40  ;;  %v2359_v53 = vpop.f32.mrf.mxu2  ;;  %v2482_v59 = vpop.f32.mrf.mxu3  ;;  %v2355_v24 = vadd.f32 %v2354_v41, %v4886_v45 }
 0x339   : > { %v2360_v35 = vadd.f32 %v2359_v53, %v4890_v15 }
 0x33a   : > { %2751 = vmax.xlane.f32.xlu1 %v4931_v7  ;;  %v2477_v33 = vadd.f32 %v2476_v2, %v2355_v24 }
 0x33b   : > { %v2483_v13 = vadd.f32 %v2482_v59, %v2360_v35 }
 0x33d   : > { %v2599_v54 = vpop.f32.mrf.mxu0  ;;  %v2700_v55 = vpop.f32.mrf.mxu1 }
 0x33e   : > { %v2600_v12 = vadd.f32 %v2599_v54, %v2447_v47 }
 0x340   : > { %v4936_v26 = vadd.f32 %v2696_v48, %v2600_v12  ;;  %v2364_v36 = vpop.f32.mrf.mxu2  ;;  %v2488_v48 = vpop.f32.mrf.mxu3 }
 0x341   : > { %v2365_v14 = vadd.f32 %v2364_v36, %v4894_v38 }
 0x342   : > { %2753 = vmax.xlane.f32.xlu1 %v4936_v26 }
 0x345   : > { %v2603_v20 = vpop.f32.mrf.mxu0  ;;  %v2704_v60 = vpop.f32.mrf.mxu1 }
 0x346   : > { %v2604_v1 = vadd.f32 %v2603_v20, %v2453_v32 }
 0x348   : > { %v4941_v62 = vadd.f32 %v2700_v55, %v2604_v1  ;;  %v2369_v47 = vpop.f32.mrf.mxu2  ;;  %v2494_v54 = vpop.f32.mrf.mxu3  ;;  %v2489_v55 = vadd.f32 %v2488_v48, %v2365_v14 }
 0x349   : > { %v2370_v39 = vadd.f32 %v2369_v47, %v4898_v5 }
 0x34a   : > { %2755 = vmax.xlane.f32.xlu2 %v4941_v62 }
 0x34b   : > { %v2495_v20 = vadd.f32 %v2494_v54, %v2370_v39 }
 0x34d   : > { %v2607_v3 = vpop.f32.mrf.mxu0  ;;  %v2708_v18 = vpop.f32.mrf.mxu1 }
 0x34e   : > { %v2608_v61 = vadd.f32 %v2607_v3, %v2459_v37 }
 0x350   : > { %v4946_v16 = vadd.f32 %v2704_v60, %v2608_v61  ;;  %v2374_v25 = vpop.f32.mrf.mxu2  ;;  %v2500_v60 = vpop.f32.mrf.mxu3 }
 0x351   : > { %v2375_v1 = vadd.f32 %v2374_v25, %v4902_v52 }
 0x352   : > { %2757 = vmax.xlane.f32.xlu2 %v4946_v16 }
 0x353   : > { %v2501_v43 = vadd.f32 %v2500_v60, %v2375_v1 }
 0x355   : > { %v2611_v22 = vpop.f32.mrf.mxu0  ;;  %v2712_v10 = vpop.f32.mrf.mxu1 }
 0x356   : > { %v2612_v50 = vadd.f32 %v2611_v22, %v2465_v21 }
 0x358   : > { %v4951_v23 = vadd.f32 %v2708_v18, %v2612_v50  ;;  %v2379_v37 = vpop.f32.mrf.mxu2  ;;  %v2506_v18 = vpop.f32.mrf.mxu3 }
 0x359   : > { %v2380_v61 = vadd.f32 %v2379_v37, %v4906_v56 }
 0x35a   : > { %2759 = vmax.xlane.f32.xlu0 %v4951_v23 }
 0x35b   : > { %v2507_v21 = vadd.f32 %v2506_v18, %v2380_v61 }
 0x35d   : > { %v2615_v4 = vpop.f32.mrf.mxu0  ;;  %v2716_v11 = vpop.f32.mrf.mxu1 }
 0x35e   : > { %v2616_v42 = vadd.f32 %v2615_v4, %v2471_v17 }
 0x360   : > { %v4955_v58 = vadd.f32 %v2712_v10, %v2616_v42  ;;  %v2384_v44 = vpop.f32.mrf.mxu2  ;;  %v2512_v50 = vpop.f32.mrf.mxu3 }
 0x361   : > { %v2385_v22 = vadd.f32 %v2384_v44, %v4910_v49 }
 0x362   : > { %2761 = vmax.xlane.f32.xlu1 %v4955_v58 }
 0x363   : > { %v2513_v30 = vadd.f32 %v2512_v50, %v2385_v22 }
 0x365   : > { %v2619_v27 = vpop.f32.mrf.mxu0  ;;  %v2720_v57 = vpop.f32.mrf.mxu1 }
 0x366   : > { %v2620_v0 = vadd.f32 %v2619_v27, %v2477_v33 }
 0x368   : > { %v4959_v19 = vadd.f32 %v2716_v11, %v2620_v0  ;;  %v2389_v4 = vpop.f32.mrf.mxu2  ;;  %v2518_v59 = vpop.f32.mrf.mxu3 }
 0x369   : > { %v2390_v11 = vadd.f32 %v2389_v4, %v4916_v29 }
 0x36a   : > { %2763 = vmax.xlane.f32.xlu2 %v4959_v19 }
 0x36b   : > { %v2519_v24 = vadd.f32 %v2518_v59, %v2390_v11 }
 0x36d   : > { %v2623_v40 = vpop.f32.mrf.mxu0  ;;  %v2724_v28 = vpop.f32.mrf.mxu1 }
 0x36e   : > { %v2624_v45 = vadd.f32 %v2623_v40, %v2483_v13 }
 0x370   : > { %v4963_v8 = vadd.f32 %v2720_v57, %v2624_v45 }
 0x372   : > { %2765 = vmax.xlane.f32.xlu0 %v4963_v8 }
 0x375   : > { %v2627_v12 = vpop.f32.mrf.mxu0  ;;  %v2728_v51 = vpop.f32.mrf.mxu1 }
 0x376   : > { %v2628_v15 = vadd.f32 %v2627_v12, %v2489_v55 }
 0x378   : > { %v4967_v32 = vadd.f32 %v2724_v28, %v2628_v15 }
 0x37a   : > { %2767 = vmax.xlane.f32.xlu1 %v4967_v32 }
 0x37d   : > { %v2631_v6 = vpop.f32.mrf.mxu0  ;;  %v2732_v63 = vpop.f32.mrf.mxu1 }
 0x37e   : > { %v2632_v38 = vadd.f32 %v2631_v6, %v2495_v20 }
 0x380   : > { %v4971_v31 = vadd.f32 %v2728_v51, %v2632_v38 }
 0x382   : > { %2769 = vmax.xlane.f32.xlu2 %v4971_v31 }
 0x385   : > { %v2635_v3 = vpop.f32.mrf.mxu0  ;;  %v2736_v41 = vpop.f32.mrf.mxu1 }
 0x386   : > { %v2636_v5 = vadd.f32 %v2635_v3, %v2501_v43 }
 0x388   : > { %v4975_v9 = vadd.f32 %v2732_v63, %v2636_v5 }
 0x38a   : > { %2771 = vmax.xlane.f32.xlu0 %v4975_v9 }
 0x38d   : > { %v2639_v52 = vpop.f32.mrf.mxu0  ;;  %v2740_v53 = vpop.f32.mrf.mxu1 }
 0x38e   : > { %v2640_v2 = vadd.f32 %v2639_v52, %v2507_v21 }
 0x390   : > { %v4979_v10 = vadd.f32 %v2736_v41, %v2640_v2 }
 0x392   : > { %2773 = vmax.xlane.f32.xlu1 %v4979_v10 }
 0x395   : > { %v2643_v17 = vpop.f32.mrf.mxu0  ;;  %v2744_v57 = vpop.f32.mrf.mxu1 }
 0x396   : > { %v2644_v56 = vadd.f32 %v2643_v17, %v2513_v30 }
 0x398   : > { %v4983_v42 = vadd.f32 %v2740_v53, %v2644_v56 }
 0x39a   : > { %2775 = vmax.xlane.f32.xlu2 %v4983_v42 }
 0x39d   : > { %v2647_v33 = vpop.f32.mrf.mxu0  ;;  %v2748_v49 = vpop.xlane.xlu0 %2747 }
 0x39e   : > { %v2648_v36 = vadd.f32 %v2647_v33, %v2519_v24  ;;  %v2779_v27 = vsub.f32 %v4921_v46, %v2748_v49 }
 0x3a0   : > { %v2795_v0 = vmul.f32 1.442695, %v2779_v27  ;;  %v4987_v35 = vadd.f32 %v2744_v57, %v2648_v36 }
 0x3a2   : > { %3254 = vpow2.f32 %v2795_v0  ;;  %2777 = vmax.xlane.f32.xlu0 %v4987_v35 }
 0x3a5   : > { %v2750_v48 = vpop.xlane.xlu0 %2749 }
 0x3a6   : > { %v2780_v29 = vsub.f32 %v4926_v34, %v2750_v48 }
 0x3a8   : > { %v4991_v13 = vpop.eup %3254  ;;  %v2797_v40 = vmul.f32 1.442695, %v2780_v29 }
 0x3a9   : > { %2827 = vadd.xlane.f32.xlu1 %v4991_v13 }
 0x3aa   : > { %3256 = vpow2.f32 %v2797_v40 }
 0x3ad   : > { %v2752_v28 = vpop.xlane.xlu1 %2751 }
 0x3ae   : > { %v2781_v45 = vsub.f32 %v4931_v7, %v2752_v28 }
 0x3b0   : > { %v4995_v46 = vpop.eup %3256  ;;  %v2799_v47 = vmul.f32 1.442695, %v2781_v45 }
 0x3b1   : > { %2829 = vadd.xlane.f32.xlu2 %v4995_v46 }
 0x3b2   : > { %3258 = vpow2.f32 %v2799_v47 }
 0x3b5   : > { %v2754_v14 = vpop.xlane.xlu1 %2753 }
 0x3b6   : > { %v2782_v54 = vsub.f32 %v4936_v26, %v2754_v14 }
 0x3b8   : > { %v4999_v55 = vpop.eup %3258  ;;  %v2801_v34 = vmul.f32 1.442695, %v2782_v54 }
 0x3b9   : > { %2831 = vadd.xlane.f32.xlu0 %v4999_v55 }
 0x3ba   : > { %3260 = vpow2.f32 %v2801_v34 }
 0x3bd   : > { %v2756_v12 = vpop.xlane.xlu2 %2755 }
 0x3be   : > { %v2783_v15 = vsub.f32 %v4941_v62, %v2756_v12 }
 0x3c0   : > { %v5003_v51 = vpop.eup %3260  ;;  %v2803_v7 = vmul.f32 1.442695, %v2783_v15 }
 0x3c1   : > { %2833 = vadd.xlane.f32.xlu1 %v5003_v51 }
 0x3c2   : > { %3262 = vpow2.f32 %v2803_v7 }
 0x3c5   : > { %v2758_v39 = vpop.xlane.xlu2 %2757 }
 0x3c6   : > { %v2784_v25 = vsub.f32 %v4946_v16, %v2758_v39 }
 0x3c8   : > { %v5007_v20 = vpop.eup %3262  ;;  %v2805_v26 = vmul.f32 1.442695, %v2784_v25 }
 0x3c9   : > { %2835 = vadd.xlane.f32.xlu2 %v5007_v20 }
 0x3ca   : > { %3264 = vpow2.f32 %v2805_v26 }
 0x3cd   : > { %v2760_v60 = vpop.xlane.xlu0 %2759 }
 0x3ce   : > { %v2785_v6 = vsub.f32 %v4951_v23, %v2760_v60 }
 0x3d0   : > { %v5011_v38 = vpop.eup %3264  ;;  %v2807_v62 = vmul.f32 1.442695, %v2785_v6 }
 0x3d1   : > { %2837 = vadd.xlane.f32.xlu0 %v5011_v38 }
 0x3d2   : > { %3266 = vpow2.f32 %v2807_v62 }
 0x3d5   : > { %v2762_v1 = vpop.xlane.xlu1 %2761 }
 0x3d6   : > { %v2786_v63 = vsub.f32 %v4955_v58, %v2762_v1 }
 0x3d8   : > { %v5015_v37 = vpop.eup %3266  ;;  %v2809_v16 = vmul.f32 1.442695, %v2786_v63 }
 0x3d9   : > { %2839 = vadd.xlane.f32.xlu1 %v5015_v37 }
 0x3da   : > { %3268 = vpow2.f32 %v2809_v16 }
 0x3dd   : > { %v2764_v43 = vpop.xlane.xlu2 %2763 }
 0x3de   : > { %v2787_v3 = vsub.f32 %v4959_v19, %v2764_v43 }
 0x3e0   : > { %v5019_v5 = vpop.eup %3268  ;;  %v2811_v23 = vmul.f32 1.442695, %v2787_v3 }
 0x3e1   : > { %2841 = vadd.xlane.f32.xlu2 %v5019_v5 }
 0x3e2   : > { %3270 = vpow2.f32 %v2811_v23 }
 0x3e5   : > { %v2766_v18 = vpop.xlane.xlu0 %2765 }
 0x3e6   : > { %v2788_v61 = vsub.f32 %v4963_v8, %v2766_v18 }
 0x3e8   : > { %v5023_v41 = vpop.eup %3270  ;;  %v2813_v58 = vmul.f32 1.442695, %v2788_v61 }
 0x3e9   : > { %2843 = vadd.xlane.f32.xlu0 %v5023_v41 }
 0x3ea   : > { %3272 = vpow2.f32 %v2813_v58 }
 0x3ed   : > { %v2768_v21 = vpop.xlane.xlu1 %2767 }
 0x3ee   : > { %v2789_v44 = vsub.f32 %v4967_v32, %v2768_v21 }
 0x3f0   : > { %v5027_v52 = vpop.eup %3272  ;;  %v2815_v19 = vmul.f32 1.442695, %v2789_v44 }
 0x3f1   : > { %2845 = vadd.xlane.f32.xlu1 %v5027_v52 }
 0x3f2   : > { %3274 = vpow2.f32 %v2815_v19 }
 0x3f5   : > { %v2770_v2 = vpop.xlane.xlu2 %2769 }
 0x3f6   : > { %v2790_v22 = vsub.f32 %v4971_v31, %v2770_v2 }
 0x3f8   : > { %v5031_v50 = vpop.eup %3274  ;;  %v2817_v8 = vmul.f32 1.442695, %v2790_v22 }
 0x3f9   : > { %2847 = vadd.xlane.f32.xlu2 %v5031_v50 }
 0x3fa   : > { %3276 = vpow2.f32 %v2817_v8 }
 0x3fd   : > { %v2772_v30 = vpop.xlane.xlu0 %2771 }
 0x3fe   : > { %v2791_v53 = vsub.f32 %v4975_v9, %v2772_v30 }
 0x400   : > { %v5035_v17 = vpop.eup %3276  ;;  %v2819_v32 = vmul.f32 1.442695, %v2791_v53 }
 0x401   : > { %2849 = vadd.xlane.f32.xlu0 %v5035_v17 }
 0x402   : > { %3278 = vpow2.f32 %v2819_v32 }
 0x405   : > { %v2774_v56 = vpop.xlane.xlu1 %2773 }
 0x406   : > { %v2792_v4 = vsub.f32 %v4979_v10, %v2774_v56 }
 0x408   : > { %v5039_v11 = vpop.eup %3278  ;;  %v2821_v31 = vmul.f32 1.442695, %v2792_v4 }
 0x409   : > { %2851 = vadd.xlane.f32.xlu1 %v5039_v11 }
 0x40a   : > { %3280 = vpow2.f32 %v2821_v31 }
 0x40d   : > { %v2776_v59 = vpop.xlane.xlu2 %2775 }
 0x40e   : > { %v2793_v24 = vsub.f32 %v4983_v42, %v2776_v59 }
 0x410   : > { %v5043_v33 = vpop.eup %3280  ;;  %v2823_v9 = vmul.f32 1.442695, %v2793_v24 }
 0x411   : > { %2853 = vadd.xlane.f32.xlu2 %v5043_v33 }
 0x412   : > { %3282 = vpow2.f32 %v2823_v9 }
 0x415   : > { %v2778_v49 = vpop.xlane.xlu0 %2777 }
 0x416   : > { %v2794_v36 = vsub.f32 %v4987_v35, %v2778_v49 }
 0x418   : > { %v5047_v27 = vpop.eup %3282  ;;  %v2825_v10 = vmul.f32 1.442695, %v2794_v36 }
 0x419   : > { %2855 = vadd.xlane.f32.xlu0 %v5047_v27 }
 0x41a   : > { %3284 = vpow2.f32 %v2825_v10 }
 0x41c   : > { %v2828_v57 = vpop.xlane.xlu1 %2827 }
 0x41d   : > { %3286 = vrcp.f32 %v2828_v57  ;;  %v2870_v28 = vand.u32 2147483648, %v2828_v57  ;;  %v2868_v45 = vand.u32 2147483647, %v2828_v57  ;;  %vm2864_vm1 = vweird.f32 %v2828_v57 }
 0x41f   : > { %v2871_v54 = vor.u32 1.1754944e-38, %v2870_v28  ;;  %vm2869_vm3 = vcmp.eq.f32.partialorder %v2868_v45, 8.507059e+37 }
 0x420   : > { %v5050_v0 = vpop.eup %3284 }
 0x421   : > { %2857 = vadd.xlane.f32.xlu1 %v5050_v0 }
 0x423   : > { %v3287_v42 = vpop.eup %3286 }
 0x424   : > { %v2860_v48 = vmul.f32 %v3287_v42, %v2828_v57  ;;  %v2830_v29 = vpop.xlane.xlu2 %2829  ;;  %vm2865_vm0 = vweird.f32 %v3287_v42 }
 0x425   : > { %3288 = vrcp.f32 %v2830_v29  ;;  %vm2866_vm2 = vmor %vm2864_vm1, %vm2865_vm0  ;;  %v2885_v26 = vand.u32 2147483648, %v2830_v29  ;;  %v2883_v6 = vand.u32 2147483647, %v2830_v29  ;;  %vm2879_vm5 = vweird.f32 %v2830_v29 }
 0x426   : > { %v2861_v40 = vsub.f32 1.0, %v2860_v48 }
 0x427   : > { %v2886_v63 = vor.u32 1.1754944e-38, %v2885_v26  ;;  %vm2884_vm7 = vcmp.eq.f32.partialorder %v2883_v6, 8.507059e+37 }
 0x428   : > { %v2862_v35 = vmul.f32 %v3287_v42, %v2861_v40 }
 0x42a   : > { %v2863_v47 = vadd.f32 %v3287_v42, %v2862_v35 }
 0x42b   : > { %v3289_v14 = vpop.eup %3288 }
 0x42c   : > { %v2867_v34 = vsel %vm2866_vm2, %v3287_v42, %v2863_v47  ;;  %v2875_v12 = vmul.f32 %v3289_v14, %v2830_v29  ;;  %v2832_v15 = vpop.xlane.xlu0 %2831  ;;  %vm2880_vm4 = vweird.f32 %v3289_v14 }
 0x42d   : > { %v2872_v7 = vsel %vm2869_vm3, %v2871_v54, %v2867_v34  ;;  %3290 = vrcp.f32 %v2832_v15  ;;  %vm2881_vm6 = vmor %vm2879_vm5, %vm2880_vm4  ;;  %v2900_v61 = vand.u32 2147483648, %v2832_v15  ;;  %v2898_v21 = vand.u32 2147483647, %v2832_v15 }
 0x42e   : > { %v2873_v39 = vmul.f32 %v4991_v13, %v2872_v7  ;;  %v2876_v25 = vsub.f32 1.0, %v2875_v12  ;;  %vm2894_vm9 = vweird.f32 %v2832_v15 }
 0x42f   : > { %v2901_v2 = vor.u32 1.1754944e-38, %v2900_v61  ;;  %vm2899_vm11 = vcmp.eq.f32.partialorder %v2898_v21, 8.507059e+37 }
 0x430   : > { %3099 = vst [vmem:[%s5058_s27] sm:$0xff] %v2873_v39  ;;  %v2877_v60 = vmul.f32 %v3289_v14, %v2876_v25 }
 0x432   : > { %v2878_v62 = vadd.f32 %v3289_v14, %v2877_v60 }
 0x433   : > { %v3291_v1 = vpop.eup %3290 }
 0x434   : > { %v2882_v16 = vsel %vm2881_vm6, %v3289_v14, %v2878_v62  ;;  %v2890_v43 = vmul.f32 %v3291_v1, %v2832_v15  ;;  %v2834_v3 = vpop.xlane.xlu1 %2833  ;;  %vm2895_vm8 = vweird.f32 %v3291_v1 }
 0x435   : > { %v2887_v23 = vsel %vm2884_vm7, %v2886_v63, %v2882_v16  ;;  %3292 = vrcp.f32 %v2834_v3  ;;  %vm2896_vm10 = vmor %vm2894_vm9, %vm2895_vm8  ;;  %v2915_v56 = vand.u32 2147483648, %v2834_v3  ;;  %v2913_v31 = vand.u32 2147483647, %v2834_v3 }
 0x436   : > { %v2888_v13 = vmul.f32 %v4995_v46, %v2887_v23  ;;  %v2891_v18 = vsub.f32 1.0, %v2890_v43  ;;  %vm2909_vm13 = vweird.f32 %v2834_v3 }
 0x437   : > { %v2916_v9 = vor.u32 1.1754944e-38, %v2915_v56  ;;  %vm2914_vm15 = vcmp.eq.f32.partialorder %v2913_v31, 8.507059e+37 }
 0x438   : > { %3100 = vst [vmem:[%s5058_s27 + $0x8] sm:$0xff] %v2888_v13  ;;  %v2892_v58 = vmul.f32 %v3291_v1, %v2891_v18 }
 0x43a   : > { %v2893_v44 = vadd.f32 %v3291_v1, %v2892_v58 }
 0x43b   : > { %v3293_v19 = vpop.eup %3292 }
 0x43c   : > { %v2897_v22 = vsel %vm2896_vm10, %v3291_v1, %v2893_v44  ;;  %v2905_v8 = vmul.f32 %v3293_v19, %v2834_v3  ;;  %v2836_v30 = vpop.xlane.xlu2 %2835  ;;  %vm2910_vm12 = vweird.f32 %v3293_v19 }
 0x43d   : > { %v2902_v53 = vsel %vm2899_vm11, %v2901_v2, %v2897_v22  ;;  %3294 = vrcp.f32 %v2836_v30  ;;  %vm2911_vm14 = vmor %vm2909_vm13, %vm2910_vm12  ;;  %v2930_v48 = vand.u32 2147483648, %v2836_v30  ;;  %v2928_v40 = vand.u32 2147483647, %v2836_v30 }
 0x43e   : > { %v2903_v46 = vmul.f32 %v4999_v55, %v2902_v53  ;;  %v2906_v32 = vsub.f32 1.0, %v2905_v8  ;;  %vm2924_vm1 = vweird.f32 %v2836_v30 }
 0x43f   : > { %v2931_v45 = vor.u32 1.1754944e-38, %v2930_v48  ;;  %vm2929_vm3 = vcmp.eq.f32.partialorder %v2928_v40, 8.507059e+37 }
 0x440   : > { %3101 = vst [vmem:[%s5058_s27 + $0x10] sm:$0xff] %v2903_v46  ;;  %v2907_v4 = vmul.f32 %v3293_v19, %v2906_v32 }
 0x442   : > { %v2908_v59 = vadd.f32 %v3293_v19, %v2907_v4 }
 0x443   : > { %v3295_v24 = vpop.eup %3294 }
 0x444   : > { %v2912_v49 = vsel %vm2911_vm14, %v3293_v19, %v2908_v59  ;;  %v2920_v36 = vmul.f32 %v3295_v24, %v2836_v30  ;;  %v2838_v10 = vpop.xlane.xlu0 %2837  ;;  %vm2925_vm0 = vweird.f32 %v3295_v24 }
 0x445   : > { %v2917_v57 = vsel %vm2914_vm15, %v2916_v9, %v2912_v49  ;;  %3296 = vrcp.f32 %v2838_v10  ;;  %vm2926_vm2 = vmor %vm2924_vm1, %vm2925_vm0  ;;  %v2945_v15 = vand.u32 2147483648, %v2838_v10  ;;  %v2943_v39 = vand.u32 2147483647, %v2838_v10 }
 0x446   : > { %v2918_v55 = vmul.f32 %v5003_v51, %v2917_v57  ;;  %v2921_v42 = vsub.f32 1.0, %v2920_v36  ;;  %vm2939_vm5 = vweird.f32 %v2838_v10 }
 0x447   : > { %v2946_v60 = vor.u32 1.1754944e-38, %v2945_v15  ;;  %vm2944_vm7 = vcmp.eq.f32.partialorder %v2943_v39, 8.507059e+37 }
 0x448   : > { %3102 = vst [vmem:[%s5058_s27 + $0x18] sm:$0xff] %v2918_v55  ;;  %v2922_v29 = vmul.f32 %v3295_v24, %v2921_v42 }
 0x44a   : > { %v2923_v28 = vadd.f32 %v3295_v24, %v2922_v29 }
 0x44b   : > { %v3297_v35 = vpop.eup %3296 }
 0x44c   : > { %v2927_v47 = vsel %vm2926_vm2, %v3295_v24, %v2923_v28  ;;  %v2935_v14 = vmul.f32 %v3297_v35, %v2838_v10  ;;  %v2840_v54 = vpop.xlane.xlu1 %2839  ;;  %vm2940_vm4 = vweird.f32 %v3297_v35 }
 0x44d   : > { %v2932_v34 = vsel %vm2929_vm3, %v2931_v45, %v2927_v47  ;;  %3298 = vrcp.f32 %v2840_v54  ;;  %vm2941_vm6 = vmor %vm2939_vm5, %vm2940_vm4  ;;  %v2960_v43 = vand.u32 2147483648, %v2840_v54  ;;  %v2958_v23 = vand.u32 2147483647, %v2840_v54 }
 0x44e   : > { %v2933_v51 = vmul.f32 %v5007_v20, %v2932_v34  ;;  %v2936_v12 = vsub.f32 1.0, %v2935_v14  ;;  %vm2954_vm9 = vweird.f32 %v2840_v54 }
 0x44f   : > { %v2961_v61 = vor.u32 1.1754944e-38, %v2960_v43  ;;  %vm2959_vm11 = vcmp.eq.f32.partialorder %v2958_v23, 8.507059e+37 }
 0x450   : > { %3103 = vst [vmem:[%s5058_s27 + $0x20] sm:$0xff] %v2933_v51  ;;  %v2937_v7 = vmul.f32 %v3297_v35, %v2936_v12 }
 0x452   : > { %v2938_v25 = vadd.f32 %v3297_v35, %v2937_v7 }
 0x453   : > { %v3299_v26 = vpop.eup %3298 }
 0x454   : > { %v2942_v6 = vsel %vm2941_vm6, %v3297_v35, %v2938_v25  ;;  %v2950_v62 = vmul.f32 %v3299_v26, %v2840_v54  ;;  %v2842_v1 = vpop.xlane.xlu2 %2841  ;;  %vm2955_vm8 = vweird.f32 %v3299_v26 }
 0x455   : > { %v2947_v63 = vsel %vm2944_vm7, %v2946_v60, %v2942_v6  ;;  %3300 = vrcp.f32 %v2842_v1  ;;  %vm2956_vm10 = vmor %vm2954_vm9, %vm2955_vm8  ;;  %v2975_v22 = vand.u32 2147483648, %v2842_v1  ;;  %v2973_v30 = vand.u32 2147483647, %v2842_v1 }
 0x456   : > { %v2948_v20 = vmul.f32 %v5011_v38, %v2947_v63  ;;  %v2951_v16 = vsub.f32 1.0, %v2950_v62  ;;  %vm2969_vm13 = vweird.f32 %v2842_v1 }
 0x457   : > { %v2976_v32 = vor.u32 1.1754944e-38, %v2975_v22  ;;  %vm2974_vm15 = vcmp.eq.f32.partialorder %v2973_v30, 8.507059e+37 }
 0x458   : > { %3104 = vst [vmem:[%s5058_s27 + $0x28] sm:$0xff] %v2948_v20  ;;  %v2952_v3 = vmul.f32 %v3299_v26, %v2951_v16 }
 0x45a   : > { %v2953_v13 = vadd.f32 %v3299_v26, %v2952_v3 }
 0x45b   : > { %v3301_v18 = vpop.eup %3300 }
 0x45c   : > { %v2957_v58 = vsel %vm2956_vm10, %v3299_v26, %v2953_v13  ;;  %v2965_v21 = vmul.f32 %v3301_v18, %v2842_v1  ;;  %v2844_v44 = vpop.xlane.xlu0 %2843  ;;  %vm2970_vm12 = vweird.f32 %v3301_v18 }
 0x45d   : > { %v2962_v19 = vsel %vm2959_vm11, %v2961_v61, %v2957_v58  ;;  %3302 = vrcp.f32 %v2844_v44  ;;  %vm2971_vm14 = vmor %vm2969_vm13, %vm2970_vm12  ;;  %v2990_v9 = vand.u32 2147483648, %v2844_v44  ;;  %v2988_v36 = vand.u32 2147483647, %v2844_v44 }
 0x45e   : > { %v2963_v38 = vmul.f32 %v5015_v37, %v2962_v19  ;;  %v2966_v2 = vsub.f32 1.0, %v2965_v21  ;;  %vm2984_vm1 = vweird.f32 %v2844_v44 }
 0x45f   : > { %v2991_v55 = vor.u32 1.1754944e-38, %v2990_v9  ;;  %vm2989_vm3 = vcmp.eq.f32.partialorder %v2988_v36, 8.507059e+37 }
 0x460   : > { %3105 = vst [vmem:[%s5058_s27 + $0x30] sm:$0xff] %v2963_v38  ;;  %v2967_v8 = vmul.f32 %v3301_v18, %v2966_v2 }
 0x462   : > { %v2968_v53 = vadd.f32 %v3301_v18, %v2967_v8 }
 0x463   : > { %v3303_v46 = vpop.eup %3302 }
 0x464   : > { %v2972_v56 = vsel %vm2971_vm14, %v3301_v18, %v2968_v53  ;;  %v2980_v4 = vmul.f32 %v3303_v46, %v2844_v44  ;;  %v2846_v31 = vpop.xlane.xlu1 %2845  ;;  %vm2985_vm0 = vweird.f32 %v3303_v46 }
 0x465   : > { %v2977_v59 = vsel %vm2974_vm15, %v2976_v32, %v2972_v56  ;;  %3304 = vrcp.f32 %v2846_v31  ;;  %vm2986_vm2 = vmor %vm2984_vm1, %vm2985_vm0  ;;  %v3005_v35 = vand.u32 2147483648, %v2846_v31  ;;  %v3003_v47 = vand.u32 2147483647, %v2846_v31 }
 0x466   : > { %v2978_v37 = vmul.f32 %v5019_v5, %v2977_v59  ;;  %v2981_v24 = vsub.f32 1.0, %v2980_v4  ;;  %vm2999_vm5 = vweird.f32 %v2846_v31 }
 0x467   : > { %v3006_v34 = vor.u32 1.1754944e-38, %v3005_v35  ;;  %vm3004_vm7 = vcmp.eq.f32.partialorder %v3003_v47, 8.507059e+37 }
 0x468   : > { %3106 = vst [vmem:[%s5058_s27 + $0x38] sm:$0xff] %v2978_v37  ;;  %v2982_v49 = vmul.f32 %v3303_v46, %v2981_v24 }
 0x46a   : > { %v2983_v10 = vadd.f32 %v3303_v46, %v2982_v49 }
 0x46b   : > { %v3305_v57 = vpop.eup %3304 }
 0x46c   : > { %v2987_v42 = vsel %vm2986_vm2, %v3303_v46, %v2983_v10  ;;  %v2995_v48 = vmul.f32 %v3305_v57, %v2846_v31  ;;  %v2848_v29 = vpop.xlane.xlu2 %2847  ;;  %vm3000_vm4 = vweird.f32 %v3305_v57 }
 0x46d   : > { %v2992_v40 = vsel %vm2989_vm3, %v2991_v55, %v2987_v42  ;;  %3306 = vrcp.f32 %v2848_v29  ;;  %vm3001_vm6 = vmor %vm2999_vm5, %vm3000_vm4  ;;  %v3020_v25 = vand.u32 2147483648, %v2848_v29  ;;  %v3018_v60 = vand.u32 2147483647, %v2848_v29 }
 0x46e   : > { %v2993_v5 = vmul.f32 %v5023_v41, %v2992_v40  ;;  %v2996_v28 = vsub.f32 1.0, %v2995_v48  ;;  %vm3014_vm9 = vweird.f32 %v2848_v29 }
 0x46f   : > { %v3021_v1 = vor.u32 1.1754944e-38, %v3020_v25  ;;  %vm3019_vm11 = vcmp.eq.f32.partialorder %v3018_v60, 8.507059e+37 }
 0x470   : > { %3107 = vst [vmem:[%s5058_s27 + $0x40] sm:$0xff] %v2993_v5  ;;  %v2997_v45 = vmul.f32 %v3305_v57, %v2996_v28 }
 0x472   : > { %v2998_v14 = vadd.f32 %v3305_v57, %v2997_v45 }
 0x473   : > { %v3307_v54 = vpop.eup %3306 }
 0x474   : > { %v3002_v51 = vsel %vm3001_vm6, %v3305_v57, %v2998_v14  ;;  %v3010_v12 = vmul.f32 %v3307_v54, %v2848_v29  ;;  %v2850_v15 = vpop.xlane.xlu0 %2849  ;;  %vm3015_vm8 = vweird.f32 %v3307_v54 }
 0x475   : > { %v3007_v7 = vsel %vm3004_vm7, %v3006_v34, %v3002_v51  ;;  %3308 = vrcp.f32 %v2850_v15  ;;  %vm3016_vm10 = vmor %vm3014_vm9, %vm3015_vm8  ;;  %v3035_v23 = vand.u32 2147483648, %v2850_v15  ;;  %v3033_v18 = vand.u32 2147483647, %v2850_v15 }
 0x476   : > { %v3008_v41 = vmul.f32 %v5027_v52, %v3007_v7  ;;  %v3011_v39 = vsub.f32 1.0, %v3010_v12  ;;  %vm3029_vm13 = vweird.f32 %v2850_v15 }
 0x477   : > { %v3036_v21 = vor.u32 1.1754944e-38, %v3035_v23  ;;  %vm3034_vm15 = vcmp.eq.f32.partialorder %v3033_v18, 8.507059e+37 }
 0x478   : > { %3108 = vst [vmem:[%s5058_s27 + $0x48] sm:$0xff] %v3008_v41  ;;  %v3012_v26 = vmul.f32 %v3307_v54, %v3011_v39 }
 0x47a   : > { %v3013_v6 = vadd.f32 %v3307_v54, %v3012_v26 }
 0x47b   : > { %v3309_v62 = vpop.eup %3308 }
 0x47c   : > { %v3017_v63 = vsel %vm3016_vm10, %v3307_v54, %v3013_v6  ;;  %v3025_v20 = vmul.f32 %v3309_v62, %v2850_v15  ;;  %v2852_v16 = vpop.xlane.xlu1 %2851  ;;  %vm3030_vm12 = vweird.f32 %v3309_v62 }
 0x47d   : > { %v3022_v43 = vsel %vm3019_vm11, %v3021_v1, %v3017_v63  ;;  %3310 = vrcp.f32 %v2852_v16  ;;  %vm3031_vm14 = vmor %vm3029_vm13, %vm3030_vm12  ;;  %v3050_v8 = vand.u32 2147483648, %v2852_v16  ;;  %v3048_v53 = vand.u32 2147483647, %v2852_v16 }
 0x47e   : > { %v3023_v52 = vmul.f32 %v5031_v50, %v3022_v43  ;;  %v3026_v3 = vsub.f32 1.0, %v3025_v20  ;;  %vm3044_vm1 = vweird.f32 %v2852_v16 }
 0x47f   : > { %v3051_v56 = vor.u32 1.1754944e-38, %v3050_v8  ;;  %vm3049_vm3 = vcmp.eq.f32.partialorder %v3048_v53, 8.507059e+37 }
 0x480   : > { %3109 = vst [vmem:[%s5058_s27 + $0x50] sm:$0xff] %v3023_v52  ;;  %v3027_v13 = vmul.f32 %v3309_v62, %v3026_v3 }
 0x482   : > { %v3028_v61 = vadd.f32 %v3309_v62, %v3027_v13 }
 0x483   : > { %v3311_v58 = vpop.eup %3310 }
 0x484   : > { %v3032_v44 = vsel %vm3031_vm14, %v3309_v62, %v3028_v61  ;;  %v3040_v19 = vmul.f32 %v3311_v58, %v2852_v16  ;;  %v2854_v38 = vpop.xlane.xlu2 %2853  ;;  %vm3045_vm0 = vweird.f32 %v3311_v58 }
 0x485   : > { %v3037_v2 = vsel %vm3034_vm15, %v3036_v21, %v3032_v44  ;;  %3312 = vrcp.f32 %v2854_v38  ;;  %vm3046_vm2 = vmor %vm3044_vm1, %vm3045_vm0  ;;  %v3065_v9 = vand.u32 2147483648, %v2854_v38  ;;  %v3063_v36 = vand.u32 2147483647, %v2854_v38 }
 0x486   : > { %v3038_v50 = vmul.f32 %v5035_v17, %v3037_v2  ;;  %v3041_v22 = vsub.f32 1.0, %v3040_v19  ;;  %vm3059_vm5 = vweird.f32 %v2854_v38 }
 0x487   : > { %v3066_v55 = vor.u32 1.1754944e-38, %v3065_v9  ;;  %vm3064_vm7 = vcmp.eq.f32.partialorder %v3063_v36, 8.507059e+37 }
 0x488   : > { %3110 = vst [vmem:[%s5058_s27 + $0x58] sm:$0xff] %v3038_v50  ;;  %v3042_v30 = vmul.f32 %v3311_v58, %v3041_v22 }
 0x48a   : > { %v3043_v46 = vadd.f32 %v3311_v58, %v3042_v30 }
 0x48b   : > { %v3313_v32 = vpop.eup %3312 }
 0x48c   : > { %v3047_v4 = vsel %vm3046_vm2, %v3311_v58, %v3043_v46  ;;  %v3055_v31 = vmul.f32 %v3313_v32, %v2854_v38  ;;  %v2856_v59 = vpop.xlane.xlu0 %2855  ;;  %vm3060_vm4 = vweird.f32 %v3313_v32 }
 0x48d   : > { %v3052_v37 = vsel %vm3049_vm3, %v3051_v56, %v3047_v4  ;;  %3314 = vrcp.f32 %v2856_v59  ;;  %vm3061_vm6 = vmor %vm3059_vm5, %vm3060_vm4  ;;  %v3080_v28 = vand.u32 2147483648, %v2856_v59  ;;  %v3078_v45 = vand.u32 2147483647, %v2856_v59 }
 0x48e   : > { %v3053_v17 = vmul.f32 %v5039_v11, %v3052_v37  ;;  %v3056_v24 = vsub.f32 1.0, %v3055_v31  ;;  %vm3074_vm9 = vweird.f32 %v2856_v59 }
 0x48f   : > { %v3081_v54 = vor.u32 1.1754944e-38, %v3080_v28  ;;  %vm3079_vm11 = vcmp.eq.f32.partialorder %v3078_v45, 8.507059e+37 }
 0x490   : > { %3111 = vst [vmem:[%s5058_s27 + $0x60] sm:$0xff] %v3053_v17  ;;  %v3057_v49 = vmul.f32 %v3313_v32, %v3056_v24 }
 0x492   : > { %v3058_v10 = vadd.f32 %v3313_v32, %v3057_v49 }
 0x493   : > { %v3315_v57 = vpop.eup %3314 }
 0x494   : > { %v3062_v42 = vsel %vm3061_vm6, %v3313_v32, %v3058_v10  ;;  %v3070_v48 = vmul.f32 %v3315_v57, %v2856_v59  ;;  %v2858_v29 = vpop.xlane.xlu1 %2857  ;;  %vm3075_vm8 = vweird.f32 %v3315_v57 }
 0x495   : > { %v3067_v40 = vsel %vm3064_vm7, %v3066_v55, %v3062_v42  ;;  %3316 = vrcp.f32 %v2858_v29  ;;  %vm3076_vm10 = vmor %vm3074_vm9, %vm3075_vm8  ;;  %v3095_v7 = vand.u32 2147483648, %v2858_v29  ;;  %v3093_v39 = vand.u32 2147483647, %v2858_v29 }
 0x496   : > { %v3068_v11 = vmul.f32 %v5043_v33, %v3067_v40  ;;  %v3071_v5 = vsub.f32 1.0, %v3070_v48  ;;  %vm3089_vm13 = vweird.f32 %v2858_v29 }
 0x497   : > { %v3096_v26 = vor.u32 1.1754944e-38, %v3095_v7  ;;  %vm3094_vm15 = vcmp.eq.f32.partialorder %v3093_v39, 8.507059e+37 }
 0x498   : > { %3112 = vst [vmem:[%s5058_s27 + $0x68] sm:$0xff] %v3068_v11  ;;  %v3072_v35 = vmul.f32 %v3315_v57, %v3071_v5 }
 0x49a   : > { %v3073_v47 = vadd.f32 %v3315_v57, %v3072_v35 }
 0x49b   : > { %v3317_v14 = vpop.eup %3316 }
 0x49c   : > { %v3077_v34 = vsel %vm3076_vm10, %v3315_v57, %v3073_v47  ;;  %v3085_v51 = vmul.f32 %v3317_v14, %v2858_v29  ;;  %vm3090_vm12 = vweird.f32 %v3317_v14 }
 0x49d   : > { %v3082_v12 = vsel %vm3079_vm11, %v3081_v54, %v3077_v34  ;;  %vm3091_vm14 = vmor %vm3089_vm13, %vm3090_vm12 }
 0x49e   : > { %v3083_v15 = vmul.f32 %v5047_v27, %v3082_v12  ;;  %v3086_v33 = vsub.f32 1.0, %v3085_v51 }
 0x4a0   : > { %3113 = vst [vmem:[%s5058_s27 + $0x70] sm:$0xff] %v3083_v15  ;;  %v3087_v41 = vmul.f32 %v3317_v14, %v3086_v33 }
 0x4a2   : > { %v3088_v25 = vadd.f32 %v3317_v14, %v3087_v41 }
 0x4a4   : > { %v3092_v60 = vsel %vm3091_vm14, %v3317_v14, %v3088_v25 }
 0x4a5   : > { %v3097_v6 = vsel %vm3094_vm15, %v3096_v26, %v3092_v60 }
 0x4a6   : > { %v3098_v62 = vmul.f32 %v5050_v0, %v3097_v6 }
 0x4a8   : > { %3114 = vst [vmem:[%s5058_s27 + $0x78] sm:$0xff] %v3098_v62 }
 0x4a9 PF: > { %s14_s15 = sadd.s32 1, %s3324_s15  }
 0x4aa   : > { %p11_p4 = scmp.ge.s32.totalorder %s14_s15, 4  }
 0x4ac   :  { %13 = sbr.rel (!%p11_p4) target bundleno = 1 (0x1), region = 66 }

</bundles_post_ra>
